<compile_context>
chip_gen: v6e
topology: v6e:2x2x1
jax: 0.10.0
libtpu: 0.0.40
codegen_flags: <defaults>
</compile_context>

<pallas_src>
import functools
import math

import jax
import jax.numpy as jnp
from jax.experimental import pallas as pl
from jax.experimental.pallas import tpu as pltpu


# ----------------------------------------------------------------------------
# In-kernel helpers (traced inside the Pallas kernel)
# ----------------------------------------------------------------------------
def _layer_norm(x, g, b, eps=1e-5):
    mu = jnp.mean(x, axis=-1, keepdims=True)
    var = jnp.mean((x - mu) ** 2, axis=-1, keepdims=True)
    return (x - mu) * jax.lax.rsqrt(var + eps) * g + b


def _mha_ffn(xq, xkv, mask_bias, refs, n_heads):
    """MultiHeadWithFFN: QKV proj -> causal MHA -> out proj -> +q residual
    -> LN1 -> FFN(relu) -> LN2(ffn + LN1).  xq/xkv are (L, D) f32.
    Weight refs are indexed at point of use."""
    (wq_ref, bq_ref, wkv_ref, bkv_ref, wo_ref, bo_ref,
     ln1g_ref, ln1b_ref, w1_ref, b1_ref, w2_ref, b2_ref,
     ln2g_ref, ln2b_ref) = refs
    L, D = xq.shape
    dh = D // n_heads
    scale = 1.0 / math.sqrt(dh)

    xq_b = xq.astype(jnp.bfloat16)
    xkv_b = xkv.astype(jnp.bfloat16)

    # Full-D Q projection and fused K|V projection (2D output lanes).
    q = jnp.dot(xq_b, wq_ref[...], preferred_element_type=jnp.float32) + bq_ref[...]
    kvp = jnp.dot(xkv_b, wkv_ref[...], preferred_element_type=jnp.float32) + bkv_ref[...]
    k = kvp[:, :D]
    v = kvp[:, D:]

    # One reshape+transpose per tensor (not per head); bf16 MXU operands.
    q_h = jnp.transpose(q.reshape(L, n_heads, dh), (1, 0, 2)).astype(jnp.bfloat16)
    k_h = jnp.transpose(k.reshape(L, n_heads, dh), (1, 0, 2)).astype(jnp.bfloat16)
    v_h = jnp.transpose(v.reshape(L, n_heads, dh), (1, 0, 2)).astype(jnp.bfloat16)

    # Head-batched attention with precomputed additive causal bias.
    s = jnp.einsum("hqd,hkd->hqk", q_h, k_h,
                   preferred_element_type=jnp.float32) * scale
    s = s + mask_bias[None, :, :]
    s = s - jnp.max(s, axis=-1, keepdims=True)
    p = jnp.exp(s)
    p = p * pl.reciprocal(jnp.sum(p, axis=-1, keepdims=True), approx=True)
    o_h = jnp.einsum("hqk,hkd->hqd", p.astype(jnp.bfloat16), v_h,
                     preferred_element_type=jnp.float32)          # (H, L, dh)

    # Pack heads back along lanes (contiguous dh slices of D) and run ONE
    # full-contraction output projection.
    ctx = jnp.transpose(o_h, (1, 0, 2)).reshape(L, D)
    attn = jnp.dot(ctx.astype(jnp.bfloat16), wo_ref[...],
                   preferred_element_type=jnp.float32) + bo_ref[...]

    out_atten = attn + xq                       # residual with the query input
    norm1 = _layer_norm(out_atten, ln1g_ref[...], ln1b_ref[...])
    h1 = jnp.maximum(
        jnp.dot(norm1.astype(jnp.bfloat16), w1_ref[...],
                preferred_element_type=jnp.float32) + b1_ref[...], 0.0)
    ffn = jnp.dot(h1.astype(jnp.bfloat16), w2_ref[...],
                  preferred_element_type=jnp.float32) + b2_ref[...]
    return _layer_norm(ffn + norm1, ln2g_ref[...], ln2b_ref[...])


# ----------------------------------------------------------------------------
# Fused SSAKT kernel: ExerciseBlock -> encoder stack -> fc+sigmoid
# (one grid step == one batch element; weights resident across the grid)
# ----------------------------------------------------------------------------
def ssakt_kernel(*refs, dec_heads, enc_heads, n_encoder):
    ex_ref, inter_ref, eb_lng_ref, eb_lnb_ref = refs[0:4]
    eb_refs = refs[4:18]
    ep_refs = refs[18:32]
    fcw_ref, fcb_ref = refs[32], refs[33]
    out_ref = refs[34]

    L, D = ex_ref.shape

    exercise = ex_ref[...].astype(jnp.float32)       # (L, D)
    inter = inter_ref[...].astype(jnp.float32)       # (L, D)

    # Causal ut_mask as an additive bias, built once and reused by all blocks,
    # encoder layers and heads.
    row = jax.lax.broadcasted_iota(jnp.int32, (L, L), 0)
    col = jax.lax.broadcasted_iota(jnp.int32, (L, L), 1)
    mask_bias = jnp.where(col > row, -1e30, 0.0).astype(jnp.float32)

    # ---- ExerciseBlock -----------------------------------------------------
    out_norm = _layer_norm(exercise, eb_lng_ref[...], eb_lnb_ref[...])
    ex_out = _mha_ffn(exercise, exercise, mask_bias, eb_refs, dec_heads) + out_norm

    # ---- Encoder stack -----------------------------------------------------
    # TODO(synk): get_clones deep-copies one module, so all encoder clones
    # share identical initial parameters; a trained checkpoint with distinct
    # per-layer weights needs per-layer refs here.
    kv = inter
    for _ in range(n_encoder):
        kv = _mha_ffn(ex_out, kv, mask_bias, ep_refs, enc_heads)

    # ---- fc + sigmoid: VPU multiply + lane reduction -----------------------
    w_row = fcw_ref[...]                                           # (1, D) f32
    logits = jnp.sum(kv * w_row, axis=-1, keepdims=True) + fcb_ref[0]
    out_ref[...] = jax.nn.sigmoid(logits).astype(out_ref.dtype)    # (L, 1)


# ----------------------------------------------------------------------------
# Wrapper: weight packing + single pallas_call with grid over the batch
# ----------------------------------------------------------------------------
def _pack_mha_params(p, mm_dtype=jnp.bfloat16):
    (wq, bq, wk, bk, wv, bv, wo, bo,
     ln1g, ln1b, w1, b1, w2, b2, ln2g, ln2b) = p
    wkv = jnp.concatenate([wk, wv], axis=1).astype(mm_dtype)   # (D, 2D)
    bkv = jnp.concatenate([bk, bv], axis=1)                    # (1, 2D) f32
    return (wq.astype(mm_dtype), bq, wkv, bkv, wo.astype(mm_dtype), bo,
            ln1g, ln1b, w1.astype(mm_dtype), b1,
            w2.astype(mm_dtype), b2, ln2g, ln2b)


def ssakt_fused_call(exercise, interaction0, eb_ln_g, eb_ln_b,
                     eb_mha, ep_mha, fc_w, fc_b,
                     *, dec_heads, enc_heads, n_encoder):
    B, L, D = exercise.shape
    eb_p = _pack_mha_params(eb_mha)
    ep_p = _pack_mha_params(ep_mha)
    fc_w_row = fc_w.T                       # (1, D), f32 (VPU path)
    fc_b_flat = fc_b.reshape((1,))          # (1,), scalar lives in SMEM

    args = (exercise, interaction0, eb_ln_g, eb_ln_b,
            *eb_p, *ep_p, fc_w_row, fc_b_flat)

    def act_spec():
        return pl.BlockSpec((None, L, D), lambda b: (b, 0, 0))

    def resident_spec(x):
        nd = x.ndim
        return pl.BlockSpec(tuple(x.shape), lambda b, _nd=nd: (0,) * _nd)

    in_specs = (
        [act_spec(), act_spec()]
        + [resident_spec(a) for a in (eb_ln_g, eb_ln_b, *eb_p, *ep_p, fc_w_row)]
        + [pl.BlockSpec(memory_space=pltpu.MemorySpace.SMEM)]   # fc bias scalar
    )

    return pl.pallas_call(
        functools.partial(ssakt_kernel, dec_heads=dec_heads,
                          enc_heads=enc_heads, n_encoder=n_encoder),
        out_shape=jax.ShapeDtypeStruct((B, L, 1), jnp.float32),
        grid=(B,),
        in_specs=in_specs,
        out_specs=pl.BlockSpec((None, L, 1), lambda b: (b, 0, 0)),
        compiler_params=pltpu.CompilerParams(
            dimension_semantics=("parallel",),
            vmem_limit_bytes=48 * 1024 * 1024),
    )(*args)


# ----------------------------------------------------------------------------
# Parameter construction (deterministic, synthetic)
# ----------------------------------------------------------------------------
def _init_mha_ffn_params(key, D):
    ks = jax.random.split(key, 6)
    s = 0.05
    wq = jax.random.normal(ks[0], (D, D), jnp.float32) * s
    wk = jax.random.normal(ks[1], (D, D), jnp.float32) * s
    wv = jax.random.normal(ks[2], (D, D), jnp.float32) * s
    wo = jax.random.normal(ks[3], (D, D), jnp.float32) * s
    w1 = jax.random.normal(ks[4], (D, D), jnp.float32) * s
    w2 = jax.random.normal(ks[5], (D, D), jnp.float32) * s
    zeros = jnp.zeros((1, D), jnp.float32)
    ones = jnp.ones((1, D), jnp.float32)
    return (wq, zeros, wk, zeros, wv, zeros, wo, zeros,
            ones, zeros, w1, zeros, w2, zeros, ones, zeros)


def init_ssakt_params(key, *, n_dims, total_ex, total_cat, seq_len, max_time):
    keys = jax.random.split(key, 12)
    s = 0.1
    return {
        "exercise_block": {
            "exercise_embed": jax.random.normal(keys[0], (total_ex, n_dims), jnp.float32) * s,
            "position_embed": jax.random.normal(keys[1], (seq_len, n_dims), jnp.float32) * s,
            "ln_g": jnp.ones((1, n_dims), jnp.float32),
            "ln_b": jnp.zeros((1, n_dims), jnp.float32),
            "mha": _init_mha_ffn_params(keys[2], n_dims),
        },
        "encoder": {
            "exercise_embed": jax.random.normal(keys[3], (total_ex, n_dims), jnp.float32) * s,
            "category_embed": jax.random.normal(keys[4], (total_cat, n_dims), jnp.float32) * s,
            "position_embed": jax.random.normal(keys[5], (seq_len, n_dims), jnp.float32) * s,
            "response_embed": jax.random.normal(keys[6], (total_ex, n_dims), jnp.float32) * s,
            "elapsetime_embed": jax.random.normal(keys[7], (max_time, n_dims), jnp.float32) * s,
            "mha": _init_mha_ffn_params(keys[8], n_dims),
        },
        "fc_w": jax.random.normal(keys[9], (n_dims, 1), jnp.float32) * s,
        "fc_b": jnp.zeros((1, 1), jnp.float32),
    }


# ----------------------------------------------------------------------------
# SSAKT forward: embedding glue in JAX, everything else in one Pallas kernel
# ----------------------------------------------------------------------------
@functools.partial(jax.jit, static_argnames=("n_encoder", "enc_heads", "dec_heads"))
def ssakt_forward(params, in_exercise, in_category, in_response, in_etime,
                  *, n_encoder, enc_heads, dec_heads):
    B, L = in_exercise.shape
    pos_ids = jnp.arange(L)            # pos_encode(seq_len - 1)

    # TODO(synk): embedding gathers remain plain-JAX glue (tiny tables);
    # dropout layers are eval-mode identities.
    eb = params["exercise_block"]
    exercise = (jnp.take(eb["exercise_embed"], in_exercise, axis=0)
                + jnp.take(eb["position_embed"], pos_ids, axis=0)[None])

    ep = params["encoder"]
    interaction0 = (jnp.take(ep["category_embed"], in_category, axis=0)
                    + jnp.take(ep["exercise_embed"], in_exercise, axis=0)
                    + jnp.take(ep["elapsetime_embed"], in_etime, axis=0)
                    + jnp.take(ep["response_embed"], in_response, axis=0)
                    + jnp.take(ep["position_embed"], pos_ids, axis=0)[None])

    return ssakt_fused_call(exercise, interaction0,
                            eb["ln_g"], eb["ln_b"], eb["mha"], ep["mha"],
                            params["fc_w"], params["fc_b"],
                            dec_heads=dec_heads, enc_heads=enc_heads,
                            n_encoder=n_encoder)


# ----------------------------------------------------------------------------
# main
# ----------------------------------------------------------------------------
if __name__ == "__main__":
    n_encoder, n_decoder = 2, 1
    enc_heads, dec_heads = 4, 4
    total_ex, total_cat, total_responses = 50, 10, 2
    n_dims = 32
    seq_len = 9          # sequences fed to the model have length seq_len - 1 = 8
    max_time = 300 + 1
    B, L = 2, seq_len - 1

    key = jax.random.PRNGKey(0)
    pkey, k1, k2, k3, k4 = jax.random.split(key, 5)

    params = init_ssakt_params(pkey, n_dims=n_dims, total_ex=total_ex,
                               total_cat=total_cat, seq_len=seq_len,
                               max_time=max_time)

    in_exercise = jax.random.randint(k1, (B, L), 0, total_ex, dtype=jnp.int32)
    in_category = jax.random.randint(k2, (B, L), 0, total_cat, dtype=jnp.int32)
    in_response = jax.random.randint(k3, (B, L), 0, total_responses, dtype=jnp.int32)
    in_etime = jax.random.randint(k4, (B, L), 0, max_time, dtype=jnp.int32)

    out = ssakt_forward(params, in_exercise, in_category, in_response, in_etime,
                        n_encoder=n_encoder, enc_heads=enc_heads,
                        dec_heads=dec_heads)
    out = jax.block_until_ready(out)

    assert out.shape == (B, L, 1)
    assert bool(jnp.all(jnp.isfinite(out)))
    assert bool(jnp.all((out >= 0.0) & (out <= 1.0)))
    print("KERNEL_OK")
</pallas_src>

<mosaic_0001>
module attributes {stable_mosaic.version = 11 : i64} {
  func.func @ssakt_kernel(%arg0: i32, %arg1: memref<1x8x32xf32, #tpu.memory_space<vmem>>, %arg2: memref<1x8x32xf32, #tpu.memory_space<vmem>>, %arg3: memref<1x32xf32, #tpu.memory_space<vmem>>, %arg4: memref<1x32xf32, #tpu.memory_space<vmem>>, %arg5: memref<32x32xbf16, #tpu.memory_space<vmem>>, %arg6: memref<1x32xf32, #tpu.memory_space<vmem>>, %arg7: memref<32x64xbf16, #tpu.memory_space<vmem>>, %arg8: memref<1x64xf32, #tpu.memory_space<vmem>>, %arg9: memref<32x32xbf16, #tpu.memory_space<vmem>>, %arg10: memref<1x32xf32, #tpu.memory_space<vmem>>, %arg11: memref<1x32xf32, #tpu.memory_space<vmem>>, %arg12: memref<1x32xf32, #tpu.memory_space<vmem>>, %arg13: memref<32x32xbf16, #tpu.memory_space<vmem>>, %arg14: memref<1x32xf32, #tpu.memory_space<vmem>>, %arg15: memref<32x32xbf16, #tpu.memory_space<vmem>>, %arg16: memref<1x32xf32, #tpu.memory_space<vmem>>, %arg17: memref<1x32xf32, #tpu.memory_space<vmem>>, %arg18: memref<1x32xf32, #tpu.memory_space<vmem>>, %arg19: memref<32x32xbf16, #tpu.memory_space<vmem>>, %arg20: memref<1x32xf32, #tpu.memory_space<vmem>>, %arg21: memref<32x64xbf16, #tpu.memory_space<vmem>>, %arg22: memref<1x64xf32, #tpu.memory_space<vmem>>, %arg23: memref<32x32xbf16, #tpu.memory_space<vmem>>, %arg24: memref<1x32xf32, #tpu.memory_space<vmem>>, %arg25: memref<1x32xf32, #tpu.memory_space<vmem>>, %arg26: memref<1x32xf32, #tpu.memory_space<vmem>>, %arg27: memref<32x32xbf16, #tpu.memory_space<vmem>>, %arg28: memref<1x32xf32, #tpu.memory_space<vmem>>, %arg29: memref<32x32xbf16, #tpu.memory_space<vmem>>, %arg30: memref<1x32xf32, #tpu.memory_space<vmem>>, %arg31: memref<1x32xf32, #tpu.memory_space<vmem>>, %arg32: memref<1x32xf32, #tpu.memory_space<vmem>>, %arg33: memref<1x32xf32, #tpu.memory_space<vmem>>, %arg34: memref<1xf32, #tpu.memory_space<smem>>, %arg35: memref<1x8x1xf32, #tpu.memory_space<vmem>>) attributes {dimension_semantics = [#tpu.dimension_semantics<parallel>], iteration_bounds = array<i64: 2>, scalar_prefetch = 0 : i64, scratch_operands = 0 : i64, tpu.core_type = #tpu.core_type<tc>, window_params = [{transform_indices = @transform_0, window_bounds = array<i64: 1, 8, 32>}, {transform_indices = @transform_1, window_bounds = array<i64: 1, 8, 32>}, {pipeline_mode = #tpu.pipeline_mode<synchronous>, transform_indices = @transform_2, window_bounds = array<i64: 1, 32>}, {pipeline_mode = #tpu.pipeline_mode<synchronous>, transform_indices = @transform_3, window_bounds = array<i64: 1, 32>}, {pipeline_mode = #tpu.pipeline_mode<synchronous>, transform_indices = @transform_4, window_bounds = array<i64: 32, 32>}, {pipeline_mode = #tpu.pipeline_mode<synchronous>, transform_indices = @transform_5, window_bounds = array<i64: 1, 32>}, {pipeline_mode = #tpu.pipeline_mode<synchronous>, transform_indices = @transform_6, window_bounds = array<i64: 32, 64>}, {pipeline_mode = #tpu.pipeline_mode<synchronous>, transform_indices = @transform_7, window_bounds = array<i64: 1, 64>}, {pipeline_mode = #tpu.pipeline_mode<synchronous>, transform_indices = @transform_8, window_bounds = array<i64: 32, 32>}, {pipeline_mode = #tpu.pipeline_mode<synchronous>, transform_indices = @transform_9, window_bounds = array<i64: 1, 32>}, {pipeline_mode = #tpu.pipeline_mode<synchronous>, transform_indices = @transform_10, window_bounds = array<i64: 1, 32>}, {pipeline_mode = #tpu.pipeline_mode<synchronous>, transform_indices = @transform_11, window_bounds = array<i64: 1, 32>}, {pipeline_mode = #tpu.pipeline_mode<synchronous>, transform_indices = @transform_12, window_bounds = array<i64: 32, 32>}, {pipeline_mode = #tpu.pipeline_mode<synchronous>, transform_indices = @transform_13, window_bounds = array<i64: 1, 32>}, {pipeline_mode = #tpu.pipeline_mode<synchronous>, transform_indices = @transform_14, window_bounds = array<i64: 32, 32>}, {pipeline_mode = #tpu.pipeline_mode<synchronous>, transform_indices = @transform_15, window_bounds = array<i64: 1, 32>}, {pipeline_mode = #tpu.pipeline_mode<synchronous>, transform_indices = @transform_16, window_bounds = array<i64: 1, 32>}, {pipeline_mode = #tpu.pipeline_mode<synchronous>, transform_indices = @transform_17, window_bounds = array<i64: 1, 32>}, {pipeline_mode = #tpu.pipeline_mode<synchronous>, transform_indices = @transform_18, window_bounds = array<i64: 32, 32>}, {pipeline_mode = #tpu.pipeline_mode<synchronous>, transform_indices = @transform_19, window_bounds = array<i64: 1, 32>}, {pipeline_mode = #tpu.pipeline_mode<synchronous>, transform_indices = @transform_20, window_bounds = array<i64: 32, 64>}, {pipeline_mode = #tpu.pipeline_mode<synchronous>, transform_indices = @transform_21, window_bounds = array<i64: 1, 64>}, {pipeline_mode = #tpu.pipeline_mode<synchronous>, transform_indices = @transform_22, window_bounds = array<i64: 32, 32>}, {pipeline_mode = #tpu.pipeline_mode<synchronous>, transform_indices = @transform_23, window_bounds = array<i64: 1, 32>}, {pipeline_mode = #tpu.pipeline_mode<synchronous>, transform_indices = @transform_24, window_bounds = array<i64: 1, 32>}, {pipeline_mode = #tpu.pipeline_mode<synchronous>, transform_indices = @transform_25, window_bounds = array<i64: 1, 32>}, {pipeline_mode = #tpu.pipeline_mode<synchronous>, transform_indices = @transform_26, window_bounds = array<i64: 32, 32>}, {pipeline_mode = #tpu.pipeline_mode<synchronous>, transform_indices = @transform_27, window_bounds = array<i64: 1, 32>}, {pipeline_mode = #tpu.pipeline_mode<synchronous>, transform_indices = @transform_28, window_bounds = array<i64: 32, 32>}, {pipeline_mode = #tpu.pipeline_mode<synchronous>, transform_indices = @transform_29, window_bounds = array<i64: 1, 32>}, {pipeline_mode = #tpu.pipeline_mode<synchronous>, transform_indices = @transform_30, window_bounds = array<i64: 1, 32>}, {pipeline_mode = #tpu.pipeline_mode<synchronous>, transform_indices = @transform_31, window_bounds = array<i64: 1, 32>}, {pipeline_mode = #tpu.pipeline_mode<synchronous>, transform_indices = @transform_32, window_bounds = array<i64: 1, 32>}, {transform_indices = @transform_33, window_bounds = array<i64: 1>}, {transform_indices = @transform_34, window_bounds = array<i64: 1, 8, 1>}]} {
    %c0 = arith.constant 0 : index
    %c0_0 = arith.constant 0 : index
    %c0_1 = arith.constant 0 : index
    %0 = vector.load %arg1[%c0, %c0_0, %c0_1] : memref<1x8x32xf32, #tpu.memory_space<vmem>>, vector<1x8x32xf32>
    %1 = vector.shape_cast %0 : vector<1x8x32xf32> to vector<8x32xf32>
    %c0_2 = arith.constant 0 : index
    %c0_3 = arith.constant 0 : index
    %c0_4 = arith.constant 0 : index
    %2 = vector.load %arg2[%c0_2, %c0_3, %c0_4] : memref<1x8x32xf32, #tpu.memory_space<vmem>>, vector<1x8x32xf32>
    %3 = vector.shape_cast %2 : vector<1x8x32xf32> to vector<8x32xf32>
    %4 = tpu.iota {dimensions = array<i32: 0>} : vector<8x8xi32>
    %5 = tpu.iota {dimensions = array<i32: 1>} : vector<8x8xi32>
    %6 = arith.cmpi sgt, %5, %4 : vector<8x8xi32>
    %cst = arith.constant -1.000000e+30 : f32
    %cst_5 = arith.constant 0.000000e+00 : f32
    %7 = vector.broadcast %cst : f32 to vector<8x8xf32>
    %8 = vector.broadcast %cst_5 : f32 to vector<8x8xf32>
    %9 = arith.select %6, %7, %8 : vector<8x8xi1>, vector<8x8xf32>
    %c0_6 = arith.constant 0 : index
    %c0_7 = arith.constant 0 : index
    %10 = vector.load %arg3[%c0_6, %c0_7] : memref<1x32xf32, #tpu.memory_space<vmem>>, vector<1x32xf32>
    %c0_8 = arith.constant 0 : index
    %c0_9 = arith.constant 0 : index
    %11 = vector.load %arg4[%c0_8, %c0_9] : memref<1x32xf32, #tpu.memory_space<vmem>>, vector<1x32xf32>
    %cst_10 = arith.constant dense<0.000000e+00> : vector<8xf32>
    %12 = vector.multi_reduction <add>, %1, %cst_10 [1] : vector<8x32xf32> to vector<8xf32>
    %13 = vector.shape_cast %12 : vector<8xf32> to vector<8x1xf32>
    %cst_11 = arith.constant 3.200000e+01 : f32
    %14 = vector.broadcast %cst_11 : f32 to vector<8x1xf32>
    %15 = arith.divf %13, %14 : vector<8x1xf32>
    %16 = vector.broadcast %15 : vector<8x1xf32> to vector<8x32xf32>
    %17 = arith.subf %1, %16 : vector<8x32xf32>
    %18 = arith.mulf %17, %17 : vector<8x32xf32>
    %cst_12 = arith.constant dense<0.000000e+00> : vector<8xf32>
    %19 = vector.multi_reduction <add>, %18, %cst_12 [1] : vector<8x32xf32> to vector<8xf32>
    %20 = vector.shape_cast %19 : vector<8xf32> to vector<8x1xf32>
    %cst_13 = arith.constant 3.200000e+01 : f32
    %21 = vector.broadcast %cst_13 : f32 to vector<8x1xf32>
    %22 = arith.divf %20, %21 : vector<8x1xf32>
    %23 = vector.broadcast %15 : vector<8x1xf32> to vector<8x32xf32>
    %24 = arith.subf %1, %23 : vector<8x32xf32>
    %cst_14 = arith.constant 9.99999974E-6 : f32
    %25 = vector.broadcast %cst_14 : f32 to vector<8x1xf32>
    %26 = arith.addf %22, %25 : vector<8x1xf32>
    %27 = math.rsqrt %26 : vector<8x1xf32>
    %28 = vector.broadcast %27 : vector<8x1xf32> to vector<8x32xf32>
    %29 = arith.mulf %24, %28 : vector<8x32xf32>
    %30 = vector.broadcast %10 : vector<1x32xf32> to vector<8x32xf32>
    %31 = arith.mulf %29, %30 : vector<8x32xf32>
    %32 = vector.broadcast %11 : vector<1x32xf32> to vector<8x32xf32>
    %33 = arith.addf %31, %32 : vector<8x32xf32>
    %34 = arith.truncf %1 : vector<8x32xf32> to vector<8x32xbf16>
    %35 = arith.truncf %1 : vector<8x32xf32> to vector<8x32xbf16>
    %c0_15 = arith.constant 0 : index
    %c0_16 = arith.constant 0 : index
    %36 = vector.load %arg5[%c0_15, %c0_16] : memref<32x32xbf16, #tpu.memory_space<vmem>>, vector<32x32xbf16>
    %cst_17 = arith.constant dense<0.000000e+00> : vector<8x32xf32>
    %37 = tpu.matmul %34, %36, %cst_17 {dimension_numbers = #tpu.dot_dimension_numbers<[1], [0], [0], [1], [0, 0, 1, 1], [], []>} : vector<8x32xbf16>, vector<32x32xbf16>, vector<8x32xf32> -> vector<8x32xf32>
    %c0_18 = arith.constant 0 : index
    %c0_19 = arith.constant 0 : index
    %38 = vector.load %arg6[%c0_18, %c0_19] : memref<1x32xf32, #tpu.memory_space<vmem>>, vector<1x32xf32>
    %39 = vector.broadcast %38 : vector<1x32xf32> to vector<8x32xf32>
    %40 = arith.addf %37, %39 : vector<8x32xf32>
    %c0_20 = arith.constant 0 : index
    %c0_21 = arith.constant 0 : index
    %41 = vector.load %arg7[%c0_20, %c0_21] : memref<32x64xbf16, #tpu.memory_space<vmem>>, vector<32x64xbf16>
    %cst_22 = arith.constant dense<0.000000e+00> : vector<8x64xf32>
    %42 = tpu.matmul %35, %41, %cst_22 {dimension_numbers = #tpu.dot_dimension_numbers<[1], [0], [0], [1], [0, 0, 1, 1], [], []>} : vector<8x32xbf16>, vector<32x64xbf16>, vector<8x64xf32> -> vector<8x64xf32>
    %c0_23 = arith.constant 0 : index
    %c0_24 = arith.constant 0 : index
    %43 = vector.load %arg8[%c0_23, %c0_24] : memref<1x64xf32, #tpu.memory_space<vmem>>, vector<1x64xf32>
    %44 = vector.broadcast %43 : vector<1x64xf32> to vector<8x64xf32>
    %45 = arith.addf %42, %44 : vector<8x64xf32>
    %46 = vector.extract_strided_slice %45 {offsets = [0, 0], sizes = [8, 32], strides = [1, 1]} : vector<8x64xf32> to vector<8x32xf32>
    %47 = vector.extract_strided_slice %45 {offsets = [0, 32], sizes = [8, 32], strides = [1, 1]} : vector<8x64xf32> to vector<8x32xf32>
    %48 = vector.shape_cast %40 : vector<8x32xf32> to vector<8x4x8xf32>
    %49 = tpu.transpose %48, [1, 0, 2] : vector<8x4x8xf32> -> vector<4x8x8xf32>
    %50 = arith.truncf %49 : vector<4x8x8xf32> to vector<4x8x8xbf16>
    %51 = vector.shape_cast %46 : vector<8x32xf32> to vector<8x4x8xf32>
    %52 = tpu.transpose %51, [1, 0, 2] : vector<8x4x8xf32> -> vector<4x8x8xf32>
    %53 = arith.truncf %52 : vector<4x8x8xf32> to vector<4x8x8xbf16>
    %54 = vector.shape_cast %47 : vector<8x32xf32> to vector<8x4x8xf32>
    %55 = tpu.transpose %54, [1, 0, 2] : vector<8x4x8xf32> -> vector<4x8x8xf32>
    %56 = arith.truncf %55 : vector<4x8x8xf32> to vector<4x8x8xbf16>
    "tpu.trace_start"() <{level = 10 : i32, message = "hqd,hkd->hqk"}> : () -> ()
    %cst_25 = arith.constant dense<0.000000e+00> : vector<4x8x8xf32>
    %57 = tpu.matmul %50, %53, %cst_25 {dimension_numbers = #tpu.dot_dimension_numbers<[2], [2], [1], [1], [0, 0, 0, 1, 1, 1], [0], [0]>} : vector<4x8x8xbf16>, vector<4x8x8xbf16>, vector<4x8x8xf32> -> vector<4x8x8xf32>
    "tpu.trace_stop"() : () -> ()
    %cst_26 = arith.constant 0.353553385 : f32
    %58 = vector.broadcast %cst_26 : f32 to vector<4x8x8xf32>
    %59 = arith.mulf %57, %58 : vector<4x8x8xf32>
    %60 = vector.shape_cast %9 : vector<8x8xf32> to vector<1x8x8xf32>
    %61 = vector.broadcast %60 : vector<1x8x8xf32> to vector<4x8x8xf32>
    %62 = arith.addf %59, %61 : vector<4x8x8xf32>
    %cst_27 = arith.constant dense<0xFF800000> : vector<4x8xf32>
    %63 = vector.multi_reduction <maximumf>, %62, %cst_27 [2] : vector<4x8x8xf32> to vector<4x8xf32>
    %64 = vector.shape_cast %63 : vector<4x8xf32> to vector<4x8x1xf32>
    %65 = vector.broadcast %64 : vector<4x8x1xf32> to vector<4x8x8xf32>
    %66 = arith.subf %62, %65 : vector<4x8x8xf32>
    %67 = math.exp %66 : vector<4x8x8xf32>
    %cst_28 = arith.constant dense<0.000000e+00> : vector<4x8xf32>
    %68 = vector.multi_reduction <add>, %67, %cst_28 [2] : vector<4x8x8xf32> to vector<4x8xf32>
    %69 = vector.shape_cast %68 : vector<4x8xf32> to vector<4x8x1xf32>
    %70 = tpu.reciprocal %69 {approx = true} : vector<4x8x1xf32> -> vector<4x8x1xf32>
    %71 = vector.broadcast %70 : vector<4x8x1xf32> to vector<4x8x8xf32>
    %72 = arith.mulf %67, %71 : vector<4x8x8xf32>
    %73 = arith.truncf %72 : vector<4x8x8xf32> to vector<4x8x8xbf16>
    "tpu.trace_start"() <{level = 10 : i32, message = "hqk,hkd->hqd"}> : () -> ()
    %cst_29 = arith.constant dense<0.000000e+00> : vector<4x8x8xf32>
    %74 = tpu.matmul %73, %56, %cst_29 {dimension_numbers = #tpu.dot_dimension_numbers<[2], [1], [1], [2], [0, 0, 0, 1, 1, 2], [0], [0]>} : vector<4x8x8xbf16>, vector<4x8x8xbf16>, vector<4x8x8xf32> -> vector<4x8x8xf32>
    "tpu.trace_stop"() : () -> ()
    %75 = tpu.transpose %74, [1, 0, 2] : vector<4x8x8xf32> -> vector<8x4x8xf32>
    %76 = vector.shape_cast %75 : vector<8x4x8xf32> to vector<8x32xf32>
    %77 = arith.truncf %76 : vector<8x32xf32> to vector<8x32xbf16>
    %c0_30 = arith.constant 0 : index
    %c0_31 = arith.constant 0 : index
    %78 = vector.load %arg9[%c0_30, %c0_31] : memref<32x32xbf16, #tpu.memory_space<vmem>>, vector<32x32xbf16>
    %cst_32 = arith.constant dense<0.000000e+00> : vector<8x32xf32>
    %79 = tpu.matmul %77, %78, %cst_32 {dimension_numbers = #tpu.dot_dimension_numbers<[1], [0], [0], [1], [0, 0, 1, 1], [], []>} : vector<8x32xbf16>, vector<32x32xbf16>, vector<8x32xf32> -> vector<8x32xf32>
    %c0_33 = arith.constant 0 : index
    %c0_34 = arith.constant 0 : index
    %80 = vector.load %arg10[%c0_33, %c0_34] : memref<1x32xf32, #tpu.memory_space<vmem>>, vector<1x32xf32>
    %81 = vector.broadcast %80 : vector<1x32xf32> to vector<8x32xf32>
    %82 = arith.addf %79, %81 : vector<8x32xf32>
    %83 = arith.addf %82, %1 : vector<8x32xf32>
    %c0_35 = arith.constant 0 : index
    %c0_36 = arith.constant 0 : index
    %84 = vector.load %arg11[%c0_35, %c0_36] : memref<1x32xf32, #tpu.memory_space<vmem>>, vector<1x32xf32>
    %c0_37 = arith.constant 0 : index
    %c0_38 = arith.constant 0 : index
    %85 = vector.load %arg12[%c0_37, %c0_38] : memref<1x32xf32, #tpu.memory_space<vmem>>, vector<1x32xf32>
    %cst_39 = arith.constant dense<0.000000e+00> : vector<8xf32>
    %86 = vector.multi_reduction <add>, %83, %cst_39 [1] : vector<8x32xf32> to vector<8xf32>
    %87 = vector.shape_cast %86 : vector<8xf32> to vector<8x1xf32>
    %cst_40 = arith.constant 3.200000e+01 : f32
    %88 = vector.broadcast %cst_40 : f32 to vector<8x1xf32>
    %89 = arith.divf %87, %88 : vector<8x1xf32>
    %90 = vector.broadcast %89 : vector<8x1xf32> to vector<8x32xf32>
    %91 = arith.subf %83, %90 : vector<8x32xf32>
    %92 = arith.mulf %91, %91 : vector<8x32xf32>
    %cst_41 = arith.constant dense<0.000000e+00> : vector<8xf32>
    %93 = vector.multi_reduction <add>, %92, %cst_41 [1] : vector<8x32xf32> to vector<8xf32>
    %94 = vector.shape_cast %93 : vector<8xf32> to vector<8x1xf32>
    %cst_42 = arith.constant 3.200000e+01 : f32
    %95 = vector.broadcast %cst_42 : f32 to vector<8x1xf32>
    %96 = arith.divf %94, %95 : vector<8x1xf32>
    %97 = vector.broadcast %89 : vector<8x1xf32> to vector<8x32xf32>
    %98 = arith.subf %83, %97 : vector<8x32xf32>
    %cst_43 = arith.constant 9.99999974E-6 : f32
    %99 = vector.broadcast %cst_43 : f32 to vector<8x1xf32>
    %100 = arith.addf %96, %99 : vector<8x1xf32>
    %101 = math.rsqrt %100 : vector<8x1xf32>
    %102 = vector.broadcast %101 : vector<8x1xf32> to vector<8x32xf32>
    %103 = arith.mulf %98, %102 : vector<8x32xf32>
    %104 = vector.broadcast %84 : vector<1x32xf32> to vector<8x32xf32>
    %105 = arith.mulf %103, %104 : vector<8x32xf32>
    %106 = vector.broadcast %85 : vector<1x32xf32> to vector<8x32xf32>
    %107 = arith.addf %105, %106 : vector<8x32xf32>
    %108 = arith.truncf %107 : vector<8x32xf32> to vector<8x32xbf16>
    %c0_44 = arith.constant 0 : index
    %c0_45 = arith.constant 0 : index
    %109 = vector.load %arg13[%c0_44, %c0_45] : memref<32x32xbf16, #tpu.memory_space<vmem>>, vector<32x32xbf16>
    %cst_46 = arith.constant dense<0.000000e+00> : vector<8x32xf32>
    %110 = tpu.matmul %108, %109, %cst_46 {dimension_numbers = #tpu.dot_dimension_numbers<[1], [0], [0], [1], [0, 0, 1, 1], [], []>} : vector<8x32xbf16>, vector<32x32xbf16>, vector<8x32xf32> -> vector<8x32xf32>
    %c0_47 = arith.constant 0 : index
    %c0_48 = arith.constant 0 : index
    %111 = vector.load %arg14[%c0_47, %c0_48] : memref<1x32xf32, #tpu.memory_space<vmem>>, vector<1x32xf32>
    %112 = vector.broadcast %111 : vector<1x32xf32> to vector<8x32xf32>
    %113 = arith.addf %110, %112 : vector<8x32xf32>
    %cst_49 = arith.constant 0.000000e+00 : f32
    %114 = vector.broadcast %cst_49 : f32 to vector<8x32xf32>
    %115 = arith.maximumf %113, %114 : vector<8x32xf32>
    %116 = arith.truncf %115 : vector<8x32xf32> to vector<8x32xbf16>
    %c0_50 = arith.constant 0 : index
    %c0_51 = arith.constant 0 : index
    %117 = vector.load %arg15[%c0_50, %c0_51] : memref<32x32xbf16, #tpu.memory_space<vmem>>, vector<32x32xbf16>
    %cst_52 = arith.constant dense<0.000000e+00> : vector<8x32xf32>
    %118 = tpu.matmul %116, %117, %cst_52 {dimension_numbers = #tpu.dot_dimension_numbers<[1], [0], [0], [1], [0, 0, 1, 1], [], []>} : vector<8x32xbf16>, vector<32x32xbf16>, vector<8x32xf32> -> vector<8x32xf32>
    %c0_53 = arith.constant 0 : index
    %c0_54 = arith.constant 0 : index
    %119 = vector.load %arg16[%c0_53, %c0_54] : memref<1x32xf32, #tpu.memory_space<vmem>>, vector<1x32xf32>
    %120 = vector.broadcast %119 : vector<1x32xf32> to vector<8x32xf32>
    %121 = arith.addf %118, %120 : vector<8x32xf32>
    %122 = arith.addf %121, %107 : vector<8x32xf32>
    %c0_55 = arith.constant 0 : index
    %c0_56 = arith.constant 0 : index
    %123 = vector.load %arg17[%c0_55, %c0_56] : memref<1x32xf32, #tpu.memory_space<vmem>>, vector<1x32xf32>
    %c0_57 = arith.constant 0 : index
    %c0_58 = arith.constant 0 : index
    %124 = vector.load %arg18[%c0_57, %c0_58] : memref<1x32xf32, #tpu.memory_space<vmem>>, vector<1x32xf32>
    %cst_59 = arith.constant dense<0.000000e+00> : vector<8xf32>
    %125 = vector.multi_reduction <add>, %122, %cst_59 [1] : vector<8x32xf32> to vector<8xf32>
    %126 = vector.shape_cast %125 : vector<8xf32> to vector<8x1xf32>
    %cst_60 = arith.constant 3.200000e+01 : f32
    %127 = vector.broadcast %cst_60 : f32 to vector<8x1xf32>
    %128 = arith.divf %126, %127 : vector<8x1xf32>
    %129 = vector.broadcast %128 : vector<8x1xf32> to vector<8x32xf32>
    %130 = arith.subf %122, %129 : vector<8x32xf32>
    %131 = arith.mulf %130, %130 : vector<8x32xf32>
    %cst_61 = arith.constant dense<0.000000e+00> : vector<8xf32>
    %132 = vector.multi_reduction <add>, %131, %cst_61 [1] : vector<8x32xf32> to vector<8xf32>
    %133 = vector.shape_cast %132 : vector<8xf32> to vector<8x1xf32>
    %cst_62 = arith.constant 3.200000e+01 : f32
    %134 = vector.broadcast %cst_62 : f32 to vector<8x1xf32>
    %135 = arith.divf %133, %134 : vector<8x1xf32>
    %136 = vector.broadcast %128 : vector<8x1xf32> to vector<8x32xf32>
    %137 = arith.subf %122, %136 : vector<8x32xf32>
    %cst_63 = arith.constant 9.99999974E-6 : f32
    %138 = vector.broadcast %cst_63 : f32 to vector<8x1xf32>
    %139 = arith.addf %135, %138 : vector<8x1xf32>
    %140 = math.rsqrt %139 : vector<8x1xf32>
    %141 = vector.broadcast %140 : vector<8x1xf32> to vector<8x32xf32>
    %142 = arith.mulf %137, %141 : vector<8x32xf32>
    %143 = vector.broadcast %123 : vector<1x32xf32> to vector<8x32xf32>
    %144 = arith.mulf %142, %143 : vector<8x32xf32>
    %145 = vector.broadcast %124 : vector<1x32xf32> to vector<8x32xf32>
    %146 = arith.addf %144, %145 : vector<8x32xf32>
    %147 = arith.addf %146, %33 : vector<8x32xf32>
    %148 = arith.truncf %147 : vector<8x32xf32> to vector<8x32xbf16>
    %149 = arith.truncf %3 : vector<8x32xf32> to vector<8x32xbf16>
    %c0_64 = arith.constant 0 : index
    %c0_65 = arith.constant 0 : index
    %150 = vector.load %arg19[%c0_64, %c0_65] : memref<32x32xbf16, #tpu.memory_space<vmem>>, vector<32x32xbf16>
    %cst_66 = arith.constant dense<0.000000e+00> : vector<8x32xf32>
    %151 = tpu.matmul %148, %150, %cst_66 {dimension_numbers = #tpu.dot_dimension_numbers<[1], [0], [0], [1], [0, 0, 1, 1], [], []>} : vector<8x32xbf16>, vector<32x32xbf16>, vector<8x32xf32> -> vector<8x32xf32>
    %c0_67 = arith.constant 0 : index
    %c0_68 = arith.constant 0 : index
    %152 = vector.load %arg20[%c0_67, %c0_68] : memref<1x32xf32, #tpu.memory_space<vmem>>, vector<1x32xf32>
    %153 = vector.broadcast %152 : vector<1x32xf32> to vector<8x32xf32>
    %154 = arith.addf %151, %153 : vector<8x32xf32>
    %c0_69 = arith.constant 0 : index
    %c0_70 = arith.constant 0 : index
    %155 = vector.load %arg21[%c0_69, %c0_70] : memref<32x64xbf16, #tpu.memory_space<vmem>>, vector<32x64xbf16>
    %cst_71 = arith.constant dense<0.000000e+00> : vector<8x64xf32>
    %156 = tpu.matmul %149, %155, %cst_71 {dimension_numbers = #tpu.dot_dimension_numbers<[1], [0], [0], [1], [0, 0, 1, 1], [], []>} : vector<8x32xbf16>, vector<32x64xbf16>, vector<8x64xf32> -> vector<8x64xf32>
    %c0_72 = arith.constant 0 : index
    %c0_73 = arith.constant 0 : index
    %157 = vector.load %arg22[%c0_72, %c0_73] : memref<1x64xf32, #tpu.memory_space<vmem>>, vector<1x64xf32>
    %158 = vector.broadcast %157 : vector<1x64xf32> to vector<8x64xf32>
    %159 = arith.addf %156, %158 : vector<8x64xf32>
    %160 = vector.extract_strided_slice %159 {offsets = [0, 0], sizes = [8, 32], strides = [1, 1]} : vector<8x64xf32> to vector<8x32xf32>
    %161 = vector.extract_strided_slice %159 {offsets = [0, 32], sizes = [8, 32], strides = [1, 1]} : vector<8x64xf32> to vector<8x32xf32>
    %162 = vector.shape_cast %154 : vector<8x32xf32> to vector<8x4x8xf32>
    %163 = tpu.transpose %162, [1, 0, 2] : vector<8x4x8xf32> -> vector<4x8x8xf32>
    %164 = arith.truncf %163 : vector<4x8x8xf32> to vector<4x8x8xbf16>
    %165 = vector.shape_cast %160 : vector<8x32xf32> to vector<8x4x8xf32>
    %166 = tpu.transpose %165, [1, 0, 2] : vector<8x4x8xf32> -> vector<4x8x8xf32>
    %167 = arith.truncf %166 : vector<4x8x8xf32> to vector<4x8x8xbf16>
    %168 = vector.shape_cast %161 : vector<8x32xf32> to vector<8x4x8xf32>
    %169 = tpu.transpose %168, [1, 0, 2] : vector<8x4x8xf32> -> vector<4x8x8xf32>
    %170 = arith.truncf %169 : vector<4x8x8xf32> to vector<4x8x8xbf16>
    "tpu.trace_start"() <{level = 10 : i32, message = "hqd,hkd->hqk"}> : () -> ()
    %cst_74 = arith.constant dense<0.000000e+00> : vector<4x8x8xf32>
    %171 = tpu.matmul %164, %167, %cst_74 {dimension_numbers = #tpu.dot_dimension_numbers<[2], [2], [1], [1], [0, 0, 0, 1, 1, 1], [0], [0]>} : vector<4x8x8xbf16>, vector<4x8x8xbf16>, vector<4x8x8xf32> -> vector<4x8x8xf32>
    "tpu.trace_stop"() : () -> ()
    %cst_75 = arith.constant 0.353553385 : f32
    %172 = vector.broadcast %cst_75 : f32 to vector<4x8x8xf32>
    %173 = arith.mulf %171, %172 : vector<4x8x8xf32>
    %174 = vector.shape_cast %9 : vector<8x8xf32> to vector<1x8x8xf32>
    %175 = vector.broadcast %174 : vector<1x8x8xf32> to vector<4x8x8xf32>
    %176 = arith.addf %173, %175 : vector<4x8x8xf32>
    %cst_76 = arith.constant dense<0xFF800000> : vector<4x8xf32>
    %177 = vector.multi_reduction <maximumf>, %176, %cst_76 [2] : vector<4x8x8xf32> to vector<4x8xf32>
    %178 = vector.shape_cast %177 : vector<4x8xf32> to vector<4x8x1xf32>
    %179 = vector.broadcast %178 : vector<4x8x1xf32> to vector<4x8x8xf32>
    %180 = arith.subf %176, %179 : vector<4x8x8xf32>
    %181 = math.exp %180 : vector<4x8x8xf32>
    %cst_77 = arith.constant dense<0.000000e+00> : vector<4x8xf32>
    %182 = vector.multi_reduction <add>, %181, %cst_77 [2] : vector<4x8x8xf32> to vector<4x8xf32>
    %183 = vector.shape_cast %182 : vector<4x8xf32> to vector<4x8x1xf32>
    %184 = tpu.reciprocal %183 {approx = true} : vector<4x8x1xf32> -> vector<4x8x1xf32>
    %185 = vector.broadcast %184 : vector<4x8x1xf32> to vector<4x8x8xf32>
    %186 = arith.mulf %181, %185 : vector<4x8x8xf32>
    %187 = arith.truncf %186 : vector<4x8x8xf32> to vector<4x8x8xbf16>
    "tpu.trace_start"() <{level = 10 : i32, message = "hqk,hkd->hqd"}> : () -> ()
    %cst_78 = arith.constant dense<0.000000e+00> : vector<4x8x8xf32>
    %188 = tpu.matmul %187, %170, %cst_78 {dimension_numbers = #tpu.dot_dimension_numbers<[2], [1], [1], [2], [0, 0, 0, 1, 1, 2], [0], [0]>} : vector<4x8x8xbf16>, vector<4x8x8xbf16>, vector<4x8x8xf32> -> vector<4x8x8xf32>
    "tpu.trace_stop"() : () -> ()
    %189 = tpu.transpose %188, [1, 0, 2] : vector<4x8x8xf32> -> vector<8x4x8xf32>
    %190 = vector.shape_cast %189 : vector<8x4x8xf32> to vector<8x32xf32>
    %191 = arith.truncf %190 : vector<8x32xf32> to vector<8x32xbf16>
    %c0_79 = arith.constant 0 : index
    %c0_80 = arith.constant 0 : index
    %192 = vector.load %arg23[%c0_79, %c0_80] : memref<32x32xbf16, #tpu.memory_space<vmem>>, vector<32x32xbf16>
    %cst_81 = arith.constant dense<0.000000e+00> : vector<8x32xf32>
    %193 = tpu.matmul %191, %192, %cst_81 {dimension_numbers = #tpu.dot_dimension_numbers<[1], [0], [0], [1], [0, 0, 1, 1], [], []>} : vector<8x32xbf16>, vector<32x32xbf16>, vector<8x32xf32> -> vector<8x32xf32>
    %c0_82 = arith.constant 0 : index
    %c0_83 = arith.constant 0 : index
    %194 = vector.load %arg24[%c0_82, %c0_83] : memref<1x32xf32, #tpu.memory_space<vmem>>, vector<1x32xf32>
    %195 = vector.broadcast %194 : vector<1x32xf32> to vector<8x32xf32>
    %196 = arith.addf %193, %195 : vector<8x32xf32>
    %197 = arith.addf %196, %147 : vector<8x32xf32>
    %c0_84 = arith.constant 0 : index
    %c0_85 = arith.constant 0 : index
    %198 = vector.load %arg25[%c0_84, %c0_85] : memref<1x32xf32, #tpu.memory_space<vmem>>, vector<1x32xf32>
    %c0_86 = arith.constant 0 : index
    %c0_87 = arith.constant 0 : index
    %199 = vector.load %arg26[%c0_86, %c0_87] : memref<1x32xf32, #tpu.memory_space<vmem>>, vector<1x32xf32>
    %cst_88 = arith.constant dense<0.000000e+00> : vector<8xf32>
    %200 = vector.multi_reduction <add>, %197, %cst_88 [1] : vector<8x32xf32> to vector<8xf32>
    %201 = vector.shape_cast %200 : vector<8xf32> to vector<8x1xf32>
    %cst_89 = arith.constant 3.200000e+01 : f32
    %202 = vector.broadcast %cst_89 : f32 to vector<8x1xf32>
    %203 = arith.divf %201, %202 : vector<8x1xf32>
    %204 = vector.broadcast %203 : vector<8x1xf32> to vector<8x32xf32>
    %205 = arith.subf %197, %204 : vector<8x32xf32>
    %206 = arith.mulf %205, %205 : vector<8x32xf32>
    %cst_90 = arith.constant dense<0.000000e+00> : vector<8xf32>
    %207 = vector.multi_reduction <add>, %206, %cst_90 [1] : vector<8x32xf32> to vector<8xf32>
    %208 = vector.shape_cast %207 : vector<8xf32> to vector<8x1xf32>
    %cst_91 = arith.constant 3.200000e+01 : f32
    %209 = vector.broadcast %cst_91 : f32 to vector<8x1xf32>
    %210 = arith.divf %208, %209 : vector<8x1xf32>
    %211 = vector.broadcast %203 : vector<8x1xf32> to vector<8x32xf32>
    %212 = arith.subf %197, %211 : vector<8x32xf32>
    %cst_92 = arith.constant 9.99999974E-6 : f32
    %213 = vector.broadcast %cst_92 : f32 to vector<8x1xf32>
    %214 = arith.addf %210, %213 : vector<8x1xf32>
    %215 = math.rsqrt %214 : vector<8x1xf32>
    %216 = vector.broadcast %215 : vector<8x1xf32> to vector<8x32xf32>
    %217 = arith.mulf %212, %216 : vector<8x32xf32>
    %218 = vector.broadcast %198 : vector<1x32xf32> to vector<8x32xf32>
    %219 = arith.mulf %217, %218 : vector<8x32xf32>
    %220 = vector.broadcast %199 : vector<1x32xf32> to vector<8x32xf32>
    %221 = arith.addf %219, %220 : vector<8x32xf32>
    %222 = arith.truncf %221 : vector<8x32xf32> to vector<8x32xbf16>
    %c0_93 = arith.constant 0 : index
    %c0_94 = arith.constant 0 : index
    %223 = vector.load %arg27[%c0_93, %c0_94] : memref<32x32xbf16, #tpu.memory_space<vmem>>, vector<32x32xbf16>
    %cst_95 = arith.constant dense<0.000000e+00> : vector<8x32xf32>
    %224 = tpu.matmul %222, %223, %cst_95 {dimension_numbers = #tpu.dot_dimension_numbers<[1], [0], [0], [1], [0, 0, 1, 1], [], []>} : vector<8x32xbf16>, vector<32x32xbf16>, vector<8x32xf32> -> vector<8x32xf32>
    %c0_96 = arith.constant 0 : index
    %c0_97 = arith.constant 0 : index
    %225 = vector.load %arg28[%c0_96, %c0_97] : memref<1x32xf32, #tpu.memory_space<vmem>>, vector<1x32xf32>
    %226 = vector.broadcast %225 : vector<1x32xf32> to vector<8x32xf32>
    %227 = arith.addf %224, %226 : vector<8x32xf32>
    %cst_98 = arith.constant 0.000000e+00 : f32
    %228 = vector.broadcast %cst_98 : f32 to vector<8x32xf32>
    %229 = arith.maximumf %227, %228 : vector<8x32xf32>
    %230 = arith.truncf %229 : vector<8x32xf32> to vector<8x32xbf16>
    %c0_99 = arith.constant 0 : index
    %c0_100 = arith.constant 0 : index
    %231 = vector.load %arg29[%c0_99, %c0_100] : memref<32x32xbf16, #tpu.memory_space<vmem>>, vector<32x32xbf16>
    %cst_101 = arith.constant dense<0.000000e+00> : vector<8x32xf32>
    %232 = tpu.matmul %230, %231, %cst_101 {dimension_numbers = #tpu.dot_dimension_numbers<[1], [0], [0], [1], [0, 0, 1, 1], [], []>} : vector<8x32xbf16>, vector<32x32xbf16>, vector<8x32xf32> -> vector<8x32xf32>
    %c0_102 = arith.constant 0 : index
    %c0_103 = arith.constant 0 : index
    %233 = vector.load %arg30[%c0_102, %c0_103] : memref<1x32xf32, #tpu.memory_space<vmem>>, vector<1x32xf32>
    %234 = vector.broadcast %233 : vector<1x32xf32> to vector<8x32xf32>
    %235 = arith.addf %232, %234 : vector<8x32xf32>
    %236 = arith.addf %235, %221 : vector<8x32xf32>
    %c0_104 = arith.constant 0 : index
    %c0_105 = arith.constant 0 : index
    %237 = vector.load %arg31[%c0_104, %c0_105] : memref<1x32xf32, #tpu.memory_space<vmem>>, vector<1x32xf32>
    %c0_106 = arith.constant 0 : index
    %c0_107 = arith.constant 0 : index
    %238 = vector.load %arg32[%c0_106, %c0_107] : memref<1x32xf32, #tpu.memory_space<vmem>>, vector<1x32xf32>
    %cst_108 = arith.constant dense<0.000000e+00> : vector<8xf32>
    %239 = vector.multi_reduction <add>, %236, %cst_108 [1] : vector<8x32xf32> to vector<8xf32>
    %240 = vector.shape_cast %239 : vector<8xf32> to vector<8x1xf32>
    %cst_109 = arith.constant 3.200000e+01 : f32
    %241 = vector.broadcast %cst_109 : f32 to vector<8x1xf32>
    %242 = arith.divf %240, %241 : vector<8x1xf32>
    %243 = vector.broadcast %242 : vector<8x1xf32> to vector<8x32xf32>
    %244 = arith.subf %236, %243 : vector<8x32xf32>
    %245 = arith.mulf %244, %244 : vector<8x32xf32>
    %cst_110 = arith.constant dense<0.000000e+00> : vector<8xf32>
    %246 = vector.multi_reduction <add>, %245, %cst_110 [1] : vector<8x32xf32> to vector<8xf32>
    %247 = vector.shape_cast %246 : vector<8xf32> to vector<8x1xf32>
    %cst_111 = arith.constant 3.200000e+01 : f32
    %248 = vector.broadcast %cst_111 : f32 to vector<8x1xf32>
    %249 = arith.divf %247, %248 : vector<8x1xf32>
    %250 = vector.broadcast %242 : vector<8x1xf32> to vector<8x32xf32>
    %251 = arith.subf %236, %250 : vector<8x32xf32>
    %cst_112 = arith.constant 9.99999974E-6 : f32
    %252 = vector.broadcast %cst_112 : f32 to vector<8x1xf32>
    %253 = arith.addf %249, %252 : vector<8x1xf32>
    %254 = math.rsqrt %253 : vector<8x1xf32>
    %255 = vector.broadcast %254 : vector<8x1xf32> to vector<8x32xf32>
    %256 = arith.mulf %251, %255 : vector<8x32xf32>
    %257 = vector.broadcast %237 : vector<1x32xf32> to vector<8x32xf32>
    %258 = arith.mulf %256, %257 : vector<8x32xf32>
    %259 = vector.broadcast %238 : vector<1x32xf32> to vector<8x32xf32>
    %260 = arith.addf %258, %259 : vector<8x32xf32>
    %261 = arith.truncf %147 : vector<8x32xf32> to vector<8x32xbf16>
    %262 = arith.truncf %260 : vector<8x32xf32> to vector<8x32xbf16>
    %c0_113 = arith.constant 0 : index
    %c0_114 = arith.constant 0 : index
    %263 = vector.load %arg19[%c0_113, %c0_114] : memref<32x32xbf16, #tpu.memory_space<vmem>>, vector<32x32xbf16>
    %cst_115 = arith.constant dense<0.000000e+00> : vector<8x32xf32>
    %264 = tpu.matmul %261, %263, %cst_115 {dimension_numbers = #tpu.dot_dimension_numbers<[1], [0], [0], [1], [0, 0, 1, 1], [], []>} : vector<8x32xbf16>, vector<32x32xbf16>, vector<8x32xf32> -> vector<8x32xf32>
    %c0_116 = arith.constant 0 : index
    %c0_117 = arith.constant 0 : index
    %265 = vector.load %arg20[%c0_116, %c0_117] : memref<1x32xf32, #tpu.memory_space<vmem>>, vector<1x32xf32>
    %266 = vector.broadcast %265 : vector<1x32xf32> to vector<8x32xf32>
    %267 = arith.addf %264, %266 : vector<8x32xf32>
    %c0_118 = arith.constant 0 : index
    %c0_119 = arith.constant 0 : index
    %268 = vector.load %arg21[%c0_118, %c0_119] : memref<32x64xbf16, #tpu.memory_space<vmem>>, vector<32x64xbf16>
    %cst_120 = arith.constant dense<0.000000e+00> : vector<8x64xf32>
    %269 = tpu.matmul %262, %268, %cst_120 {dimension_numbers = #tpu.dot_dimension_numbers<[1], [0], [0], [1], [0, 0, 1, 1], [], []>} : vector<8x32xbf16>, vector<32x64xbf16>, vector<8x64xf32> -> vector<8x64xf32>
    %c0_121 = arith.constant 0 : index
    %c0_122 = arith.constant 0 : index
    %270 = vector.load %arg22[%c0_121, %c0_122] : memref<1x64xf32, #tpu.memory_space<vmem>>, vector<1x64xf32>
    %271 = vector.broadcast %270 : vector<1x64xf32> to vector<8x64xf32>
    %272 = arith.addf %269, %271 : vector<8x64xf32>
    %273 = vector.extract_strided_slice %272 {offsets = [0, 0], sizes = [8, 32], strides = [1, 1]} : vector<8x64xf32> to vector<8x32xf32>
    %274 = vector.extract_strided_slice %272 {offsets = [0, 32], sizes = [8, 32], strides = [1, 1]} : vector<8x64xf32> to vector<8x32xf32>
    %275 = vector.shape_cast %267 : vector<8x32xf32> to vector<8x4x8xf32>
    %276 = tpu.transpose %275, [1, 0, 2] : vector<8x4x8xf32> -> vector<4x8x8xf32>
    %277 = arith.truncf %276 : vector<4x8x8xf32> to vector<4x8x8xbf16>
    %278 = vector.shape_cast %273 : vector<8x32xf32> to vector<8x4x8xf32>
    %279 = tpu.transpose %278, [1, 0, 2] : vector<8x4x8xf32> -> vector<4x8x8xf32>
    %280 = arith.truncf %279 : vector<4x8x8xf32> to vector<4x8x8xbf16>
    %281 = vector.shape_cast %274 : vector<8x32xf32> to vector<8x4x8xf32>
    %282 = tpu.transpose %281, [1, 0, 2] : vector<8x4x8xf32> -> vector<4x8x8xf32>
    %283 = arith.truncf %282 : vector<4x8x8xf32> to vector<4x8x8xbf16>
    "tpu.trace_start"() <{level = 10 : i32, message = "hqd,hkd->hqk"}> : () -> ()
    %cst_123 = arith.constant dense<0.000000e+00> : vector<4x8x8xf32>
    %284 = tpu.matmul %277, %280, %cst_123 {dimension_numbers = #tpu.dot_dimension_numbers<[2], [2], [1], [1], [0, 0, 0, 1, 1, 1], [0], [0]>} : vector<4x8x8xbf16>, vector<4x8x8xbf16>, vector<4x8x8xf32> -> vector<4x8x8xf32>
    "tpu.trace_stop"() : () -> ()
    %cst_124 = arith.constant 0.353553385 : f32
    %285 = vector.broadcast %cst_124 : f32 to vector<4x8x8xf32>
    %286 = arith.mulf %284, %285 : vector<4x8x8xf32>
    %287 = vector.shape_cast %9 : vector<8x8xf32> to vector<1x8x8xf32>
    %288 = vector.broadcast %287 : vector<1x8x8xf32> to vector<4x8x8xf32>
    %289 = arith.addf %286, %288 : vector<4x8x8xf32>
    %cst_125 = arith.constant dense<0xFF800000> : vector<4x8xf32>
    %290 = vector.multi_reduction <maximumf>, %289, %cst_125 [2] : vector<4x8x8xf32> to vector<4x8xf32>
    %291 = vector.shape_cast %290 : vector<4x8xf32> to vector<4x8x1xf32>
    %292 = vector.broadcast %291 : vector<4x8x1xf32> to vector<4x8x8xf32>
    %293 = arith.subf %289, %292 : vector<4x8x8xf32>
    %294 = math.exp %293 : vector<4x8x8xf32>
    %cst_126 = arith.constant dense<0.000000e+00> : vector<4x8xf32>
    %295 = vector.multi_reduction <add>, %294, %cst_126 [2] : vector<4x8x8xf32> to vector<4x8xf32>
    %296 = vector.shape_cast %295 : vector<4x8xf32> to vector<4x8x1xf32>
    %297 = tpu.reciprocal %296 {approx = true} : vector<4x8x1xf32> -> vector<4x8x1xf32>
    %298 = vector.broadcast %297 : vector<4x8x1xf32> to vector<4x8x8xf32>
    %299 = arith.mulf %294, %298 : vector<4x8x8xf32>
    %300 = arith.truncf %299 : vector<4x8x8xf32> to vector<4x8x8xbf16>
    "tpu.trace_start"() <{level = 10 : i32, message = "hqk,hkd->hqd"}> : () -> ()
    %cst_127 = arith.constant dense<0.000000e+00> : vector<4x8x8xf32>
    %301 = tpu.matmul %300, %283, %cst_127 {dimension_numbers = #tpu.dot_dimension_numbers<[2], [1], [1], [2], [0, 0, 0, 1, 1, 2], [0], [0]>} : vector<4x8x8xbf16>, vector<4x8x8xbf16>, vector<4x8x8xf32> -> vector<4x8x8xf32>
    "tpu.trace_stop"() : () -> ()
    %302 = tpu.transpose %301, [1, 0, 2] : vector<4x8x8xf32> -> vector<8x4x8xf32>
    %303 = vector.shape_cast %302 : vector<8x4x8xf32> to vector<8x32xf32>
    %304 = arith.truncf %303 : vector<8x32xf32> to vector<8x32xbf16>
    %c0_128 = arith.constant 0 : index
    %c0_129 = arith.constant 0 : index
    %305 = vector.load %arg23[%c0_128, %c0_129] : memref<32x32xbf16, #tpu.memory_space<vmem>>, vector<32x32xbf16>
    %cst_130 = arith.constant dense<0.000000e+00> : vector<8x32xf32>
    %306 = tpu.matmul %304, %305, %cst_130 {dimension_numbers = #tpu.dot_dimension_numbers<[1], [0], [0], [1], [0, 0, 1, 1], [], []>} : vector<8x32xbf16>, vector<32x32xbf16>, vector<8x32xf32> -> vector<8x32xf32>
    %c0_131 = arith.constant 0 : index
    %c0_132 = arith.constant 0 : index
    %307 = vector.load %arg24[%c0_131, %c0_132] : memref<1x32xf32, #tpu.memory_space<vmem>>, vector<1x32xf32>
    %308 = vector.broadcast %307 : vector<1x32xf32> to vector<8x32xf32>
    %309 = arith.addf %306, %308 : vector<8x32xf32>
    %310 = arith.addf %309, %147 : vector<8x32xf32>
    %c0_133 = arith.constant 0 : index
    %c0_134 = arith.constant 0 : index
    %311 = vector.load %arg25[%c0_133, %c0_134] : memref<1x32xf32, #tpu.memory_space<vmem>>, vector<1x32xf32>
    %c0_135 = arith.constant 0 : index
    %c0_136 = arith.constant 0 : index
    %312 = vector.load %arg26[%c0_135, %c0_136] : memref<1x32xf32, #tpu.memory_space<vmem>>, vector<1x32xf32>
    %cst_137 = arith.constant dense<0.000000e+00> : vector<8xf32>
    %313 = vector.multi_reduction <add>, %310, %cst_137 [1] : vector<8x32xf32> to vector<8xf32>
    %314 = vector.shape_cast %313 : vector<8xf32> to vector<8x1xf32>
    %cst_138 = arith.constant 3.200000e+01 : f32
    %315 = vector.broadcast %cst_138 : f32 to vector<8x1xf32>
    %316 = arith.divf %314, %315 : vector<8x1xf32>
    %317 = vector.broadcast %316 : vector<8x1xf32> to vector<8x32xf32>
    %318 = arith.subf %310, %317 : vector<8x32xf32>
    %319 = arith.mulf %318, %318 : vector<8x32xf32>
    %cst_139 = arith.constant dense<0.000000e+00> : vector<8xf32>
    %320 = vector.multi_reduction <add>, %319, %cst_139 [1] : vector<8x32xf32> to vector<8xf32>
    %321 = vector.shape_cast %320 : vector<8xf32> to vector<8x1xf32>
    %cst_140 = arith.constant 3.200000e+01 : f32
    %322 = vector.broadcast %cst_140 : f32 to vector<8x1xf32>
    %323 = arith.divf %321, %322 : vector<8x1xf32>
    %324 = vector.broadcast %316 : vector<8x1xf32> to vector<8x32xf32>
    %325 = arith.subf %310, %324 : vector<8x32xf32>
    %cst_141 = arith.constant 9.99999974E-6 : f32
    %326 = vector.broadcast %cst_141 : f32 to vector<8x1xf32>
    %327 = arith.addf %323, %326 : vector<8x1xf32>
    %328 = math.rsqrt %327 : vector<8x1xf32>
    %329 = vector.broadcast %328 : vector<8x1xf32> to vector<8x32xf32>
    %330 = arith.mulf %325, %329 : vector<8x32xf32>
    %331 = vector.broadcast %311 : vector<1x32xf32> to vector<8x32xf32>
    %332 = arith.mulf %330, %331 : vector<8x32xf32>
    %333 = vector.broadcast %312 : vector<1x32xf32> to vector<8x32xf32>
    %334 = arith.addf %332, %333 : vector<8x32xf32>
    %335 = arith.truncf %334 : vector<8x32xf32> to vector<8x32xbf16>
    %c0_142 = arith.constant 0 : index
    %c0_143 = arith.constant 0 : index
    %336 = vector.load %arg27[%c0_142, %c0_143] : memref<32x32xbf16, #tpu.memory_space<vmem>>, vector<32x32xbf16>
    %cst_144 = arith.constant dense<0.000000e+00> : vector<8x32xf32>
    %337 = tpu.matmul %335, %336, %cst_144 {dimension_numbers = #tpu.dot_dimension_numbers<[1], [0], [0], [1], [0, 0, 1, 1], [], []>} : vector<8x32xbf16>, vector<32x32xbf16>, vector<8x32xf32> -> vector<8x32xf32>
    %c0_145 = arith.constant 0 : index
    %c0_146 = arith.constant 0 : index
    %338 = vector.load %arg28[%c0_145, %c0_146] : memref<1x32xf32, #tpu.memory_space<vmem>>, vector<1x32xf32>
    %339 = vector.broadcast %338 : vector<1x32xf32> to vector<8x32xf32>
    %340 = arith.addf %337, %339 : vector<8x32xf32>
    %cst_147 = arith.constant 0.000000e+00 : f32
    %341 = vector.broadcast %cst_147 : f32 to vector<8x32xf32>
    %342 = arith.maximumf %340, %341 : vector<8x32xf32>
    %343 = arith.truncf %342 : vector<8x32xf32> to vector<8x32xbf16>
    %c0_148 = arith.constant 0 : index
    %c0_149 = arith.constant 0 : index
    %344 = vector.load %arg29[%c0_148, %c0_149] : memref<32x32xbf16, #tpu.memory_space<vmem>>, vector<32x32xbf16>
    %cst_150 = arith.constant dense<0.000000e+00> : vector<8x32xf32>
    %345 = tpu.matmul %343, %344, %cst_150 {dimension_numbers = #tpu.dot_dimension_numbers<[1], [0], [0], [1], [0, 0, 1, 1], [], []>} : vector<8x32xbf16>, vector<32x32xbf16>, vector<8x32xf32> -> vector<8x32xf32>
    %c0_151 = arith.constant 0 : index
    %c0_152 = arith.constant 0 : index
    %346 = vector.load %arg30[%c0_151, %c0_152] : memref<1x32xf32, #tpu.memory_space<vmem>>, vector<1x32xf32>
    %347 = vector.broadcast %346 : vector<1x32xf32> to vector<8x32xf32>
    %348 = arith.addf %345, %347 : vector<8x32xf32>
    %349 = arith.addf %348, %334 : vector<8x32xf32>
    %c0_153 = arith.constant 0 : index
    %c0_154 = arith.constant 0 : index
    %350 = vector.load %arg31[%c0_153, %c0_154] : memref<1x32xf32, #tpu.memory_space<vmem>>, vector<1x32xf32>
    %c0_155 = arith.constant 0 : index
    %c0_156 = arith.constant 0 : index
    %351 = vector.load %arg32[%c0_155, %c0_156] : memref<1x32xf32, #tpu.memory_space<vmem>>, vector<1x32xf32>
    %cst_157 = arith.constant dense<0.000000e+00> : vector<8xf32>
    %352 = vector.multi_reduction <add>, %349, %cst_157 [1] : vector<8x32xf32> to vector<8xf32>
    %353 = vector.shape_cast %352 : vector<8xf32> to vector<8x1xf32>
    %cst_158 = arith.constant 3.200000e+01 : f32
    %354 = vector.broadcast %cst_158 : f32 to vector<8x1xf32>
    %355 = arith.divf %353, %354 : vector<8x1xf32>
    %356 = vector.broadcast %355 : vector<8x1xf32> to vector<8x32xf32>
    %357 = arith.subf %349, %356 : vector<8x32xf32>
    %358 = arith.mulf %357, %357 : vector<8x32xf32>
    %cst_159 = arith.constant dense<0.000000e+00> : vector<8xf32>
    %359 = vector.multi_reduction <add>, %358, %cst_159 [1] : vector<8x32xf32> to vector<8xf32>
    %360 = vector.shape_cast %359 : vector<8xf32> to vector<8x1xf32>
    %cst_160 = arith.constant 3.200000e+01 : f32
    %361 = vector.broadcast %cst_160 : f32 to vector<8x1xf32>
    %362 = arith.divf %360, %361 : vector<8x1xf32>
    %363 = vector.broadcast %355 : vector<8x1xf32> to vector<8x32xf32>
    %364 = arith.subf %349, %363 : vector<8x32xf32>
    %cst_161 = arith.constant 9.99999974E-6 : f32
    %365 = vector.broadcast %cst_161 : f32 to vector<8x1xf32>
    %366 = arith.addf %362, %365 : vector<8x1xf32>
    %367 = math.rsqrt %366 : vector<8x1xf32>
    %368 = vector.broadcast %367 : vector<8x1xf32> to vector<8x32xf32>
    %369 = arith.mulf %364, %368 : vector<8x32xf32>
    %370 = vector.broadcast %350 : vector<1x32xf32> to vector<8x32xf32>
    %371 = arith.mulf %369, %370 : vector<8x32xf32>
    %372 = vector.broadcast %351 : vector<1x32xf32> to vector<8x32xf32>
    %373 = arith.addf %371, %372 : vector<8x32xf32>
    %c0_162 = arith.constant 0 : index
    %c0_163 = arith.constant 0 : index
    %374 = vector.load %arg33[%c0_162, %c0_163] : memref<1x32xf32, #tpu.memory_space<vmem>>, vector<1x32xf32>
    %375 = vector.broadcast %374 : vector<1x32xf32> to vector<8x32xf32>
    %376 = arith.mulf %373, %375 : vector<8x32xf32>
    %cst_164 = arith.constant dense<0.000000e+00> : vector<8xf32>
    %377 = vector.multi_reduction <add>, %376, %cst_164 [1] : vector<8x32xf32> to vector<8xf32>
    %378 = vector.shape_cast %377 : vector<8xf32> to vector<8x1xf32>
    %c0_165 = arith.constant 0 : index
    %379 = memref.load %arg34[%c0_165] : memref<1xf32, #tpu.memory_space<smem>>
    %380 = vector.broadcast %379 : f32 to vector<8x1xf32>
    %381 = arith.addf %378, %380 : vector<8x1xf32>
    %382 = arith.negf %381 : vector<8x1xf32>
    %383 = math.exp %382 : vector<8x1xf32>
    %cst_166 = arith.constant 1.000000e+00 : f32
    %384 = vector.broadcast %cst_166 : f32 to vector<8x1xf32>
    %385 = arith.addf %384, %383 : vector<8x1xf32>
    %386 = arith.divf %384, %385 : vector<8x1xf32>
    %c0_167 = arith.constant 0 : index
    %c0_168 = arith.constant 0 : index
    %c0_169 = arith.constant 0 : index
    %387 = vector.load %arg35[%c0_167, %c0_168, %c0_169] : memref<1x8x1xf32, #tpu.memory_space<vmem>>, vector<1x8x1xf32>
    %388 = vector.shape_cast %387 : vector<1x8x1xf32> to vector<8x1xf32>
    %389 = vector.shape_cast %386 : vector<8x1xf32> to vector<1x8x1xf32>
    tpu.vector_store %arg35[%c0_167, %c0_168, %c0_169], %389 {strides = array<i32>} : memref<1x8x1xf32, #tpu.memory_space<vmem>>, vector<1x8x1xf32>,
    return
  }
  func.func @transform_0(%arg0: i32) -> (i32, i32, i32) {
    %c0_i32 = arith.constant 0 : i32
    %c0_i32_0 = arith.constant 0 : i32
    %c0_i32_1 = arith.constant 0 : i32
    return %arg0, %c0_i32, %c0_i32_0 : i32, i32, i32
  }
  func.func @transform_1(%arg0: i32) -> (i32, i32, i32) {
    %c0_i32 = arith.constant 0 : i32
    %c0_i32_0 = arith.constant 0 : i32
    %c0_i32_1 = arith.constant 0 : i32
    return %arg0, %c0_i32, %c0_i32_0 : i32, i32, i32
  }
  func.func @transform_2(%arg0: i32) -> (i32, i32) {
    %c0_i32 = arith.constant 0 : i32
    %c0_i32_0 = arith.constant 0 : i32
    %c0_i32_1 = arith.constant 0 : i32
    return %c0_i32, %c0_i32_0 : i32, i32
  }
  func.func @transform_3(%arg0: i32) -> (i32, i32) {
    %c0_i32 = arith.constant 0 : i32
    %c0_i32_0 = arith.constant 0 : i32
    %c0_i32_1 = arith.constant 0 : i32
    return %c0_i32, %c0_i32_0 : i32, i32
  }
  func.func @transform_4(%arg0: i32) -> (i32, i32) {
    %c0_i32 = arith.constant 0 : i32
    %c0_i32_0 = arith.constant 0 : i32
    %c0_i32_1 = arith.constant 0 : i32
    return %c0_i32, %c0_i32_0 : i32, i32
  }
  func.func @transform_5(%arg0: i32) -> (i32, i32) {
    %c0_i32 = arith.constant 0 : i32
    %c0_i32_0 = arith.constant 0 : i32
    %c0_i32_1 = arith.constant 0 : i32
    return %c0_i32, %c0_i32_0 : i32, i32
  }
  func.func @transform_6(%arg0: i32) -> (i32, i32) {
    %c0_i32 = arith.constant 0 : i32
    %c0_i32_0 = arith.constant 0 : i32
    %c0_i32_1 = arith.constant 0 : i32
    return %c0_i32, %c0_i32_0 : i32, i32
  }
  func.func @transform_7(%arg0: i32) -> (i32, i32) {
    %c0_i32 = arith.constant 0 : i32
    %c0_i32_0 = arith.constant 0 : i32
    %c0_i32_1 = arith.constant 0 : i32
    return %c0_i32, %c0_i32_0 : i32, i32
  }
  func.func @transform_8(%arg0: i32) -> (i32, i32) {
    %c0_i32 = arith.constant 0 : i32
    %c0_i32_0 = arith.constant 0 : i32
    %c0_i32_1 = arith.constant 0 : i32
    return %c0_i32, %c0_i32_0 : i32, i32
  }
  func.func @transform_9(%arg0: i32) -> (i32, i32) {
    %c0_i32 = arith.constant 0 : i32
    %c0_i32_0 = arith.constant 0 : i32
    %c0_i32_1 = arith.constant 0 : i32
    return %c0_i32, %c0_i32_0 : i32, i32
  }
  func.func @transform_10(%arg0: i32) -> (i32, i32) {
    %c0_i32 = arith.constant 0 : i32
    %c0_i32_0 = arith.constant 0 : i32
    %c0_i32_1 = arith.constant 0 : i32
    return %c0_i32, %c0_i32_0 : i32, i32
  }
  func.func @transform_11(%arg0: i32) -> (i32, i32) {
    %c0_i32 = arith.constant 0 : i32
    %c0_i32_0 = arith.constant 0 : i32
    %c0_i32_1 = arith.constant 0 : i32
    return %c0_i32, %c0_i32_0 : i32, i32
  }
  func.func @transform_12(%arg0: i32) -> (i32, i32) {
    %c0_i32 = arith.constant 0 : i32
    %c0_i32_0 = arith.constant 0 : i32
    %c0_i32_1 = arith.constant 0 : i32
    return %c0_i32, %c0_i32_0 : i32, i32
  }
  func.func @transform_13(%arg0: i32) -> (i32, i32) {
    %c0_i32 = arith.constant 0 : i32
    %c0_i32_0 = arith.constant 0 : i32
    %c0_i32_1 = arith.constant 0 : i32
    return %c0_i32, %c0_i32_0 : i32, i32
  }
  func.func @transform_14(%arg0: i32) -> (i32, i32) {
    %c0_i32 = arith.constant 0 : i32
    %c0_i32_0 = arith.constant 0 : i32
    %c0_i32_1 = arith.constant 0 : i32
    return %c0_i32, %c0_i32_0 : i32, i32
  }
  func.func @transform_15(%arg0: i32) -> (i32, i32) {
    %c0_i32 = arith.constant 0 : i32
    %c0_i32_0 = arith.constant 0 : i32
    %c0_i32_1 = arith.constant 0 : i32
    return %c0_i32, %c0_i32_0 : i32, i32
  }
  func.func @transform_16(%arg0: i32) -> (i32, i32) {
    %c0_i32 = arith.constant 0 : i32
    %c0_i32_0 = arith.constant 0 : i32
    %c0_i32_1 = arith.constant 0 : i32
    return %c0_i32, %c0_i32_0 : i32, i32
  }
  func.func @transform_17(%arg0: i32) -> (i32, i32) {
    %c0_i32 = arith.constant 0 : i32
    %c0_i32_0 = arith.constant 0 : i32
    %c0_i32_1 = arith.constant 0 : i32
    return %c0_i32, %c0_i32_0 : i32, i32
  }
  func.func @transform_18(%arg0: i32) -> (i32, i32) {
    %c0_i32 = arith.constant 0 : i32
    %c0_i32_0 = arith.constant 0 : i32
    %c0_i32_1 = arith.constant 0 : i32
    return %c0_i32, %c0_i32_0 : i32, i32
  }
  func.func @transform_19(%arg0: i32) -> (i32, i32) {
    %c0_i32 = arith.constant 0 : i32
    %c0_i32_0 = arith.constant 0 : i32
    %c0_i32_1 = arith.constant 0 : i32
    return %c0_i32, %c0_i32_0 : i32, i32
  }
  func.func @transform_20(%arg0: i32) -> (i32, i32) {
    %c0_i32 = arith.constant 0 : i32
    %c0_i32_0 = arith.constant 0 : i32
    %c0_i32_1 = arith.constant 0 : i32
    return %c0_i32, %c0_i32_0 : i32, i32
  }
  func.func @transform_21(%arg0: i32) -> (i32, i32) {
    %c0_i32 = arith.constant 0 : i32
    %c0_i32_0 = arith.constant 0 : i32
    %c0_i32_1 = arith.constant 0 : i32
    return %c0_i32, %c0_i32_0 : i32, i32
  }
  func.func @transform_22(%arg0: i32) -> (i32, i32) {
    %c0_i32 = arith.constant 0 : i32
    %c0_i32_0 = arith.constant 0 : i32
    %c0_i32_1 = arith.constant 0 : i32
    return %c0_i32, %c0_i32_0 : i32, i32
  }
  func.func @transform_23(%arg0: i32) -> (i32, i32) {
    %c0_i32 = arith.constant 0 : i32
    %c0_i32_0 = arith.constant 0 : i32
    %c0_i32_1 = arith.constant 0 : i32
    return %c0_i32, %c0_i32_0 : i32, i32
  }
  func.func @transform_24(%arg0: i32) -> (i32, i32) {
    %c0_i32 = arith.constant 0 : i32
    %c0_i32_0 = arith.constant 0 : i32
    %c0_i32_1 = arith.constant 0 : i32
    return %c0_i32, %c0_i32_0 : i32, i32
  }
  func.func @transform_25(%arg0: i32) -> (i32, i32) {
    %c0_i32 = arith.constant 0 : i32
    %c0_i32_0 = arith.constant 0 : i32
    %c0_i32_1 = arith.constant 0 : i32
    return %c0_i32, %c0_i32_0 : i32, i32
  }
  func.func @transform_26(%arg0: i32) -> (i32, i32) {
    %c0_i32 = arith.constant 0 : i32
    %c0_i32_0 = arith.constant 0 : i32
    %c0_i32_1 = arith.constant 0 : i32
    return %c0_i32, %c0_i32_0 : i32, i32
  }
  func.func @transform_27(%arg0: i32) -> (i32, i32) {
    %c0_i32 = arith.constant 0 : i32
    %c0_i32_0 = arith.constant 0 : i32
    %c0_i32_1 = arith.constant 0 : i32
    return %c0_i32, %c0_i32_0 : i32, i32
  }
  func.func @transform_28(%arg0: i32) -> (i32, i32) {
    %c0_i32 = arith.constant 0 : i32
    %c0_i32_0 = arith.constant 0 : i32
    %c0_i32_1 = arith.constant 0 : i32
    return %c0_i32, %c0_i32_0 : i32, i32
  }
  func.func @transform_29(%arg0: i32) -> (i32, i32) {
    %c0_i32 = arith.constant 0 : i32
    %c0_i32_0 = arith.constant 0 : i32
    %c0_i32_1 = arith.constant 0 : i32
    return %c0_i32, %c0_i32_0 : i32, i32
  }
  func.func @transform_30(%arg0: i32) -> (i32, i32) {
    %c0_i32 = arith.constant 0 : i32
    %c0_i32_0 = arith.constant 0 : i32
    %c0_i32_1 = arith.constant 0 : i32
    return %c0_i32, %c0_i32_0 : i32, i32
  }
  func.func @transform_31(%arg0: i32) -> (i32, i32) {
    %c0_i32 = arith.constant 0 : i32
    %c0_i32_0 = arith.constant 0 : i32
    %c0_i32_1 = arith.constant 0 : i32
    return %c0_i32, %c0_i32_0 : i32, i32
  }
  func.func @transform_32(%arg0: i32) -> (i32, i32) {
    %c0_i32 = arith.constant 0 : i32
    %c0_i32_0 = arith.constant 0 : i32
    %c0_i32_1 = arith.constant 0 : i32
    return %c0_i32, %c0_i32_0 : i32, i32
  }
  func.func @transform_33(%arg0: i32) -> i32 {
    %c0_i32 = arith.constant 0 : i32
    %c0_i32_0 = arith.constant 0 : i32
    return %c0_i32 : i32
  }
  func.func @transform_34(%arg0: i32) -> (i32, i32, i32) {
    %c0_i32 = arith.constant 0 : i32
    %c0_i32_0 = arith.constant 0 : i32
    %c0_i32_1 = arith.constant 0 : i32
    return %arg0, %c0_i32, %c0_i32_0 : i32, i32, i32
  }
}

</mosaic_0001>

<bundles_post_ra>
// kernel: ssakt_forward.1
= control target key start
LH: loop header
LB: loop body
LE: loop exit
PB: predicated region body
PF: predicated region fallthrough
CT: control target
= control target key end

     0   :  { %s6131_s6 = smov 1   ;;  %s6132_s10 = smov 2   ;;  %s7102_s0 = inlined_call_operand.smem [shape: u32[35], index: -1, kind: input, shape index: {}] }
   0x1   :  { %s6184_s5 = sld [smem:[%s7102_s0]]   ;;  %s6133_s14 = smov 3  }
   0x2   :  { %s6189_s9 = sld [smem:[%s7102_s0 + %s6131_s6]]   ;;  %s6134_s18 = smov 4  }
   0x3   :  { %s6194_s13 = sld [smem:[%s7102_s0 + %s6132_s10]]   ;;  %s6135_s22 = smov 5  }
   0x4   :  { %s6199_s17 = sld [smem:[%s7102_s0 + %s6133_s14]]   ;;  %s6136_s26 = smov 6  }
   0x5   :  { %s6204_s21 = sld [smem:[%s7102_s0 + %s6134_s18]]   ;;  %s6137_s30 = smov 7  }
   0x6   :  { %s6209_s25 = sld [smem:[%s7102_s0 + %s6135_s22]]   ;;  %s6138_s4 = smov 8  }
   0x7   :  { %s6214_s29 = sld [smem:[%s7102_s0 + %s6136_s26]]   ;;  %s6139_s10 = smov 9  }
   0x8   :  { %7109 = sst [smem:[#allocation3_spill]] %s6189_s9  ;;  %s6140_s15 = smov 10  }
   0x9   :  { %7110 = sst [smem:[#allocation4_spill]] %s6194_s13  ;;  %s6141_s20 = smov 11  }
   0xa   :  { %7111 = sst [smem:[#allocation5_spill]] %s6199_s17  ;;  %s6142_s26 = smov 12  }
   0xb   :  { %s6219_s3 = sld [smem:[%s7102_s0 + %s6137_s30]]   ;;  %s6143_s1 = smov 13  }
   0xc   :  { %s6224_s8 = sld [smem:[%s7102_s0 + %s6138_s4]]   ;;  %s6144_s7 = smov 14  }
   0xd   :  { %s6229_s14 = sld [smem:[%s7102_s0 + %s6139_s10]]   ;;  %s6146_s22 = smov 16  }
   0xe   :  { %s6234_s19 = sld [smem:[%s7102_s0 + %s6140_s15]]   ;;  %s6145_s15 = smov 15  }
   0xf   :  { %s6239_s24 = sld [smem:[%s7102_s0 + %s6141_s20]]   ;;  %s6147_s28 = smov 17  }
  0x10   :  { %s6244_s30 = sld [smem:[%s7102_s0 + %s6142_s26]]   ;;  %s6164_s10 = smov 34  }
  0x11   :  { %s6249_s6 = sld [smem:[%s7102_s0 + %s6143_s1]]  }
  0x12   :  { %s6254_s12 = sld [smem:[%s7102_s0 + %s6144_s7]]   ;;  %s6148_s7 = smov 18  }
  0x13   :  { %s6259_s20 = sld [smem:[%s7102_s0 + %s6145_s15]]   ;;  %s6149_s15 = smov 19  }
  0x14   :  { %s6264_s27 = sld [smem:[%s7102_s0 + %s6146_s22]]   ;;  %s6150_s22 = smov 20  }
  0x15   :  { %s6269_s4 = sld [smem:[%s7102_s0 + %s6147_s28]]   ;;  %s6151_s28 = smov 21  }
  0x16   :  { %s6274_s17 = sld [smem:[%s7102_s0 + %s6148_s7]]   ;;  %s6152_s7 = smov 22  }
  0x17   :  { %s6279_s13 = sld [smem:[%s7102_s0 + %s6149_s15]]   ;;  %s6153_s15 = smov 23  }
  0x1a   :  { %7112 = sst [smem:[#allocation6_spill]] %s6264_s27 }
  0x1b   :  { %7113 = sst [smem:[#allocation7_spill]] %s6269_s4 }
  0x1c   :  { %7114 = sst [smem:[#allocation8_spill]] %s6274_s17 }
  0x1d   :  { %7115 = sst [smem:[#allocation9_spill]] %s6279_s13 }
  0x1e   :  { %s6284_s27 = sld [smem:[%s7102_s0 + %s6150_s22]]   ;;  %s6154_s22 = smov 24  }
  0x1f   :  { %s6289_s4 = sld [smem:[%s7102_s0 + %s6151_s28]]   ;;  %s6155_s28 = smov 25  }
  0x20   :  { %s6294_s17 = sld [smem:[%s7102_s0 + %s6152_s7]]   ;;  %s6156_s7 = smov 26  }
  0x21   :  { %s6299_s13 = sld [smem:[%s7102_s0 + %s6153_s15]]   ;;  %s6157_s15 = smov 27  }
  0x22   :  { %s6304_s9 = sld [smem:[%s7102_s0 + %s6154_s22]]   ;;  %s6158_s22 = smov 28  }
  0x25   :  { %7116 = sst [smem:[#allocation10_spill]] %s6289_s4 }
  0x26   :  { %7117 = sst [smem:[#allocation11_spill]] %s6294_s17 }
  0x27   :  { %7118 = sst [smem:[#allocation12_spill]] %s6299_s13 }
  0x28   :  { %7119 = sst [smem:[#allocation13_spill]] %s6304_s9 }
  0x29   :  { %s6309_s4 = sld [smem:[%s7102_s0 + %s6155_s28]]   ;;  %s6159_s28 = smov 29  }
  0x2a   :  { %s6314_s17 = sld [smem:[%s7102_s0 + %s6156_s7]]   ;;  %s6160_s7 = smov 30  }
  0x2b   :  { %s6319_s13 = sld [smem:[%s7102_s0 + %s6157_s15]]   ;;  %s6161_s15 = smov 31  }
  0x2c   :  { %s6324_s9 = sld [smem:[%s7102_s0 + %s6158_s22]]   ;;  %s6162_s22 = smov 32  }
  0x2f   :  { %7120 = sst [smem:[#allocation14_spill]] %s6309_s4 }
  0x30   :  { %7121 = sst [smem:[#allocation15_spill]] %s6314_s17 }
  0x31   :  { %7122 = sst [smem:[#allocation16_spill]] %s6319_s13 }
  0x32   :  { %7123 = sst [smem:[#allocation17_spill]] %s6324_s9 }
  0x33   :  { %s6329_s4 = sld [smem:[%s7102_s0 + %s6159_s28]]   ;;  %s6163_s28 = smov 33  }
  0x34   :  { %s6334_s17 = sld [smem:[%s7102_s0 + %s6160_s7]]  }
  0x35   :  { %s6339_s13 = sld [smem:[%s7102_s0 + %s6161_s15]]   ;;  %s6354_s15 = smov 0  }
  0x36   :  { %s6344_s9 = sld [smem:[%s7102_s0 + %s6162_s22]]  }
  0x39   :  { %7124 = sst [smem:[#allocation18_spill]] %s6329_s4 }
  0x3a   :  { %7125 = sst [smem:[#allocation19_spill]] %s6334_s17 }
  0x3b   :  { %s5481_s4 = sld [smem:[%s7102_s0 + %s6163_s28]]  }
  0x3c   :  { %s6352_s17 = sld [smem:[%s7102_s0 + %s6164_s10]]  }
  0x41   :  { %74 = sst [smem:[#allocation2]] %s5481_s4 }
  0x42 LB: > { %s5483_s16 = sadd.s32 4294967295, %s6129_s15   ;;  %p5487_p0 = scmp.ge.s32.totalorder %s6129_s15, 1  ;;  %s6129_s15 = sphi %s6354_s15, %s80_s15  }
  0x43   : > { %p956_p1 = scmp.lt.s32.totalorder %s6129_s15, 3 }
  0x45   : > { %p957_p2 = pnand %p5487_p0, %p956_p1 }
  0x46   : > { %p1044_p3 = scmp.lt.s32.totalorder (!%p957_p2), %s5483_s16, 1  ;;  %s6167_s18 = smov (!%p957_p2), 104  }
  0x47   : > { %960 = sbr.rel (%p957_p2) target bundleno = 7620 (0x1dc4), region = 156  ;;  %s6168_s22 = smov (!%p957_p2), 120  }
  0x48   : > { %s6169_s23 = smov (!%p957_p2), 112   ;;  %s6172_s26 = smov (!%p957_p2), 96  }
  0x49   : > { %s6173_s28 = smov (!%p957_p2), 16   ;;  %s7108_s1 = smov (!%p957_p2), 8  }
  0x4a   : > { %s7107_s2 = smov (!%p957_p2), 24   ;;  %s7126_s10 = sld [smem:[#allocation3_spill]] (!%p957_p2) }
  0x4b   : > { %s7127_s11 = sld [smem:[#allocation8_spill]] (!%p957_p2) }
  0x4c   : > { %v6027_v0 = vld [vmem:[%s6214_s29 + $0x8] sm:$0xff]   ;;  %v6165_v1 = vmov 0.0   ;;  %v6029_v3 = vld [vmem:[%s6214_s29] sm:$0xff]   ;;  %vm6166_vm0 = vmmov 0   ;;  %s7146_s16 = smov (!%p1044_p3, %s5483_s16), 1  ;;  %vm1067_vm1 = vcmask 261120   ;;  %v1059_v19 = vlaneseq }
  0x4d   : > { %5718 = vmatprep.subr.bf16.mxu1 %v6165_v1  ;;  %5710 = vmatprep.subr.bf16.mxu0 %v6165_v1  ;;  %v6028_v2 = vld [vmem:[%s6204_s21 + $0x8] sm:$0xff]   ;;  %v6030_v4 = vld [vmem:[%s6204_s21] sm:$0xff]   ;;  %s6374_s0 = sshll.u32 %s7146_s16, 3  ;;  %v6170_v20 = vmov 1983009808   ;;  %vm1678_vm2 = vcmask 64512  }
  0x4e   : > { %5719 = vmatpush3.bf16.msra.mxu1 %v6027_v0  ;;  %5722 = vmatprep.mubr.msk.bf16.mxu1 %vm6166_vm0, %v6165_v1  ;;  %s1047_s4 = scalar_lea.vmem %s6184_s5, %s6374_s0  ;;  %v5497_v7 = vld [vmem:[%s6219_s3] ss:$0 sm:$0xff]  ;;  %v1239_v21 = vunpack.c.l.s4 %v6170_v20  ;;  %v6171_v22 = vmov 1934713408   ;;  %v6404_v24 = vshrl.u32 %v1059_v19, 7  ;;  %vm1922_vm4 = vcmask 1043456  }
  0x4f   : > { %5711 = vmatpush3.bf16.msra.mxu0 %v6028_v2  ;;  %5720 = vmatprep.subr.bf16.mxu1 %v6165_v1  ;;  %v6379_v5 = vld [vmem:[%s1047_s4] sm:$0xff]  ;;  %v1271_v23 = vunpack.c.l.s4 %v6171_v22  ;;  %vm2253_vm5 = vcmask 130048   ;;  %vm2255_vm6 = vcmask 195584   ;;  %s7128_s16 = sld [smem:[#allocation10_spill]]  ;;  %vm5382_vm7 = vcmask 7168  }
  0x50   : > { %5712 = vmatprep.subr.bf16.mxu0 %v6165_v1  ;;  %5714 = vmatprep.mubr.msk.bf16.mxu0 %vm6166_vm0, %v6165_v1  ;;  %v1096_v6 = vpack.c.bf16 %v6379_v5, %v6379_v5  ;;  %v5493_v9 = vld [vmem:[%s6209_s25] ss:$0 sm:$0xff]  ;;  %v1240_v25 = vunpack.c.0.s8 %v1239_v21  ;;  %s1051_s7 = scalar_lea.vmem %s7126_s10, %s6374_s0  ;;  %s7129_s4 = sld [smem:[#allocation4_spill]] }
  0x51   : > { %v1272_v28 = vunpack.c.0.s8 %v1271_v23  ;;  %s7130_s10 = sld [smem:[#allocation6_spill]] }
  0x52   : > { %5721 = vmatpush3.bf16.msra.mxu1 %v6029_v3  ;;  %v6411_v29 = vsub.s32 %v1240_v25, %v6404_v24 }
  0x53   : > { %5713 = vmatpush3.bf16.msra.mxu0 %v6030_v4  ;;  %5732 = vmatprep.subr.bf16.mxu1 %v6165_v1  ;;  %v6424_v36 = vsub.s32 %v1272_v28, %v6404_v24 }
  0x54   : > { %5726 = vmatprep.subr.bf16.mxu0 %v6165_v1 }
  0x55   : > { %5723 = vmatmul.mubr.msk.bf16.vlgmr.msra.gmra.mxu1 %vm1067_vm1, %v1096_v6 }
  0x56   : > { %5715 = vmatmul.mubr.msk.bf16.vlgmr.msra.gmra.mxu0 %vm1067_vm1, %v1096_v6  ;;  %5734 = vmatprep.mubr.msk.bf16.mxu1 %vm6166_vm0, %v6165_v1 }
  0x57   : > { %5728 = vmatprep.mubr.msk.bf16.mxu0 %vm6166_vm0, %v6165_v1 }
 0x115   : > { %v1220_v8 = vpop.f32.mrf.mxu1 }
 0x116   : > { %v1157_v10 = vpop.f32.mrf.mxu0  ;;  %v6392_v11 = vadd.f32 %v5497_v7, %v1220_v8 }
 0x117   : > { %v5724_v12 = vpop.f32.mrf.mxu1  ;;  %v1158_v14 = vadd.f32 %v5493_v9, %v1157_v10 }
 0x118   : > { %v5716_v13 = vpop.f32.mrf.mxu0  ;;  %1383 = vrot.lane.b32.xlu1 %v6392_v11, %s6167_s18  ;;  %1377 = vrot.lane.b32.xlu0 %v6392_v11, %s6168_s22 }
 0x119   : > { %v1223_v15 = vpop.f32.mrf.mxu1 }
 0x11a   : > { %v1160_v16 = vpop.f32.mrf.mxu0 }
 0x11b   : > { %v5725_v17 = vpop.f32.mrf.mxu1 }
 0x11c   : > { %v5717_v18 = vpop.f32.mrf.mxu0  ;;  %1380 = vrot.lane.b32.xlu0 %v6392_v11, %s6169_s23  ;;  %1227 = vrot.lane.b32.xlu1 %v1158_v14, %s6168_s22 }
 0x120   : > { %1230 = vrot.lane.b32.xlu0 %v1158_v14, %s6169_s23  ;;  %1233 = vrot.lane.b32.xlu1 %v1158_v14, %s6167_s18 }
 0x18a   : > { %v6406_v26 = vpop.permute.xlu1 %1383  ;;  %v6408_v27 = vpop.permute.xlu0 %1377 }
 0x18b   : > { %v1402_v30 = vcombine.low %v6408_v27, %v6406_v26  ;;  %v1403_v31 = vcombine.high %v6408_v27, %v6406_v26 }
 0x18d   : > { %v1410_v37 = vrot.slane %v1402_v30, %v6411_v29  ;;  %v1417_v38 = vrot.slane %v1403_v31, %v6411_v29 }
 0x18e   : > { %v6417_v32 = vpop.permute.xlu0 %1380  ;;  %v1228_v33 = vpop.permute.xlu1 %1227 }
 0x18f   : > { %v1386_v34 = vcombine.low %v6392_v11, %v6417_v32  ;;  %v1387_v35 = vcombine.high %v6392_v11, %v6417_v32 }
 0x191   : > { %v1394_v39 = vrot.slane %v1386_v34, %v6411_v29  ;;  %v1401_v40 = vrot.slane %v1387_v35, %v6411_v29 }
 0x192   : > { %v1231_v41 = vpop.permute.xlu0 %1230  ;;  %v1234_v42 = vpop.permute.xlu1 %1233 }
 0x193   : > { %v1418_v43 = vcombine.low %v1394_v39, %v1410_v37  ;;  %v1419_v44 = vcombine.high %v1394_v39, %v1410_v37  ;;  %v1434_v45 = vcombine.low %v1401_v40, %v1417_v38  ;;  %v1435_v46 = vcombine.high %v1401_v40, %v1417_v38 }
 0x194   : > { %v1236_v47 = vcombine.low %v1158_v14, %v1231_v41  ;;  %v1237_v48 = vcombine.high %v1158_v14, %v1231_v41  ;;  %v1252_v49 = vcombine.low %v1228_v33, %v1234_v42  ;;  %v1253_v50 = vcombine.high %v1228_v33, %v1234_v42 }
 0x195   : > { %v1426_v51 = vrot.slane %v1418_v43, %v6424_v36  ;;  %v1433_v52 = vrot.slane %v1419_v44, %v6424_v36  ;;  %v1442_v53 = vrot.slane %v1434_v45, %v6424_v36  ;;  %v1449_v54 = vrot.slane %v1435_v46, %v6424_v36 }
 0x196   : > { %v1244_v55 = vrot.slane %v1236_v47, %v6411_v29  ;;  %v1251_v56 = vrot.slane %v1237_v48, %v6411_v29  ;;  %v1260_v57 = vrot.slane %v1252_v49, %v6411_v29  ;;  %v1267_v58 = vrot.slane %v1253_v50, %v6411_v29 }
 0x197   : > { %v1454_v59 = vcombine.low %v1426_v51, %v1433_v52  ;;  %v5503_v60 = vcombine.high %v1426_v51, %v1433_v52  ;;  %v1470_v61 = vcombine.low %v1442_v53, %v1449_v54  ;;  %v5504_v62 = vcombine.high %v1442_v53, %v1449_v54 }
 0x198   : > { %v1268_v63 = vcombine.low %v1244_v55, %v1260_v57  ;;  %v1269_v0 = vcombine.high %v1244_v55, %v1260_v57  ;;  %v1284_v2 = vcombine.low %v1251_v56, %v1267_v58  ;;  %v1285_v3 = vcombine.high %v1251_v56, %v1267_v58 }
 0x199   : > { %v1461_v4 = vrot.slane %v1454_v59, %v6411_v29  ;;  %v1469_v6 = vrot.slane %v5503_v60, %v6411_v29  ;;  %v1477_v7 = vrot.slane %v1470_v61, %v6411_v29  ;;  %v1485_v8 = vrot.slane %v5504_v62, %v6411_v29 }
 0x19a   : > { %v1276_v9 = vrot.slane %v1268_v63, %v6424_v36  ;;  %v1283_v10 = vrot.slane %v1269_v0, %v6424_v36  ;;  %v1292_v12 = vrot.slane %v1284_v2, %v6424_v36  ;;  %v1299_v13 = vrot.slane %v1285_v3, %v6424_v36 }
 0x19b   : > { %v1486_v14 = vcombine.low %v1461_v4, %v1469_v6  ;;  %v1502_v15 = vcombine.low %v1477_v7, %v1485_v8  ;;  %v1487_v16 = vcombine.high %v1461_v4, %v1469_v6  ;;  %v1503_v17 = vcombine.high %v1477_v7, %v1485_v8 }
 0x19c   : > { %v1304_v18 = vcombine.low %v1276_v9, %v1283_v10  ;;  %v5501_v20 = vcombine.high %v1276_v9, %v1283_v10  ;;  %v1320_v21 = vcombine.low %v1292_v12, %v1299_v13  ;;  %v5502_v22 = vcombine.high %v1292_v12, %v1299_v13 }
 0x19d   : > { %v1494_v23 = vrot.slane %v1486_v14, %v6424_v36  ;;  %v1510_v25 = vrot.slane %v1502_v15, %v6424_v36  ;;  %v1501_v37 = vrot.slane %v1487_v16, %v6424_v36  ;;  %v1517_v38 = vrot.slane %v1503_v17, %v6424_v36 }
 0x19e   : > { %v1311_v28 = vrot.slane %v1304_v18, %v6411_v29  ;;  %v1319_v30 = vrot.slane %v5501_v20, %v6411_v29  ;;  %v1327_v31 = vrot.slane %v1320_v21, %v6411_v29  ;;  %v1335_v33 = vrot.slane %v5502_v22, %v6411_v29 }
 0x19f   : > { %v1518_v34 = vcombine.low %v1494_v23, %v1510_v25  ;;  %v1519_v35 = vcombine.high %v1494_v23, %v1510_v25  ;;  %v1520_v47 = vcombine.low %v1501_v37, %v1517_v38  ;;  %v1521_v48 = vcombine.high %v1501_v37, %v1517_v38 }
 0x1a0   : > { %v1336_v39 = vcombine.low %v1311_v28, %v1319_v30  ;;  %v1352_v40 = vcombine.low %v1327_v31, %v1335_v33  ;;  %v1337_v49 = vcombine.high %v1311_v28, %v1319_v30  ;;  %v1353_v50 = vcombine.high %v1327_v31, %v1335_v33 }
 0x1a1   : > { %v1522_v41 = vpack.c.bf16 %v1518_v34, %v1518_v34  ;;  %v1523_v42 = vpack.c.bf16 %v1519_v35, %v1519_v35  ;;  %v1524_v53 = vpack.c.bf16 %v1520_v47, %v1520_v47  ;;  %v1525_v54 = vpack.c.bf16 %v1521_v48, %v1521_v48 }
 0x1a2   : > { %v1344_v43 = vrot.slane %v1336_v39, %v6424_v36  ;;  %v1360_v44 = vrot.slane %v1352_v40, %v6424_v36  ;;  %v1351_v57 = vrot.slane %v1337_v49, %v6424_v36  ;;  %v1367_v58 = vrot.slane %v1353_v50, %v6424_v36 }
 0x1a3   : > { %v1683_v45 = vsel %vm1678_vm2, %v1522_v41, 0  ;;  %v1729_v46 = vsel %vm1678_vm2, %v1523_v42, 0  ;;  %v1775_v59 = vsel %vm1678_vm2, %v1524_v53, 0  ;;  %v1821_v60 = vsel %vm1678_vm2, %v1525_v54, 0 }
 0x1a4   : > { %5727 = vmatpush3.bf16.xpose.msra.mxu0 %v1683_v45  ;;  %5733 = vmatpush3.bf16.xpose.msra.mxu1 %v1729_v46  ;;  %v1368_v51 = vcombine.low %v1344_v43, %v1360_v44  ;;  %v1369_v52 = vcombine.high %v1344_v43, %v1360_v44  ;;  %v1370_v61 = vcombine.low %v1351_v57, %v1367_v58  ;;  %v1062_v2 = vand.u32 127, %v1059_v19 }
 0x1a5   : > { %5738 = vmatprep.subr.bf16.mxu0 %v6165_v1  ;;  %5744 = vmatprep.subr.bf16.mxu1 %v6165_v1  ;;  %v1371_v62 = vcombine.high %v1351_v57, %v1367_v58 }
 0x1a6   : > { %v1372_v55 = vpack.c.bf16 %v1368_v51, %v1368_v51  ;;  %v1373_v56 = vpack.c.bf16 %v1369_v52, %v1369_v52  ;;  %v1374_v63 = vpack.c.bf16 %v1370_v61, %v1370_v61  ;;  %vm1063_vm3 = vcmp.gt.s32.totalorder %v1062_v2, %v6404_v24 }
 0x1a7   : > { %v1375_v0 = vpack.c.bf16 %v1371_v62, %v1371_v62  ;;  %v6481_v6 = vsel %vm1063_vm3, -1e+30, %v6165_v1 }
 0x1ab   : > { %5729 = vmatmul.mubr.msk.bf16.vlgmr.msra.gmra.mxu0 %vm1678_vm2, %v1372_v55  ;;  %5735 = vmatmul.mubr.msk.bf16.vlgmr.msra.gmra.mxu1 %vm1678_vm2, %v1373_v56 }
 0x1ac   : > { %5739 = vmatpush3.bf16.xpose.msra.mxu0 %v1775_v59  ;;  %5745 = vmatpush3.bf16.xpose.msra.mxu1 %v1821_v60 }
 0x1ad   : > { %5740 = vmatprep.mubr.msk.bf16.mxu0 %vm6166_vm0, %v6165_v1  ;;  %5746 = vmatprep.mubr.msk.bf16.mxu1 %vm6166_vm0, %v6165_v1 }
 0x1ae   : > { %5750 = vmatprep.subr.bf16.mxu0 %v6165_v1  ;;  %5756 = vmatprep.subr.bf16.mxu1 %v6165_v1 }
 0x1b3   : > { %5741 = vmatmul.mubr.msk.bf16.vlgmr.msra.gmra.mxu0 %vm1678_vm2, %v1374_v63  ;;  %5747 = vmatmul.mubr.msk.bf16.vlgmr.msra.gmra.mxu1 %vm1678_vm2, %v1375_v0 }
 0x1b4   : > { %5752 = vmatprep.mubr.msk.bf16.mxu0 %vm6166_vm0, %v6165_v1  ;;  %5758 = vmatprep.mubr.msk.bf16.mxu1 %vm6166_vm0, %v6165_v1 }
 0x26b   : > { %v1719_v3 = vpop.f32.mrf.mxu0  ;;  %v1765_v4 = vpop.f32.mrf.mxu1 }
 0x26c   : > { %v1863_v7 = vmul.f32 0.35355338, %v1719_v3  ;;  %v1864_v8 = vmul.f32 0.35355338, %v1765_v4 }
 0x26d   : > { %v5730_v9 = vpop.f32.mrf.mxu0  ;;  %v5736_v10 = vpop.f32.mrf.mxu1 }
 0x26e   : > { %v1868_v12 = vadd.f32 %v1864_v8, %v6481_v6  ;;  %v1867_v13 = vadd.f32 %v1863_v7, %v6481_v6 }
 0x26f   : > { %v1722_v14 = vpop.f32.mrf.mxu0  ;;  %v1768_v15 = vpop.f32.mrf.mxu1 }
 0x270   : > { %v1874_v16 = vsel %vm1678_vm2, %v1868_v12, -inf  ;;  %v1871_v19 = vsel %vm1678_vm2, %v1867_v13, -inf }
 0x271   : > { %1875 = vmax.xlane.f32.xlu1 %v1874_v16  ;;  %v5737_v24 = vpop.f32.mrf.mxu1  ;;  %1872 = vmax.xlane.f32.xlu0 %v1871_v19  ;;  %v5731_v17 = vpop.f32.mrf.mxu0 }
 0x273   : > { %v1811_v18 = vpop.f32.mrf.mxu0  ;;  %v1857_v20 = vpop.f32.mrf.mxu1 }
 0x274   : > { %v1865_v21 = vmul.f32 0.35355338, %v1811_v18  ;;  %v1866_v22 = vmul.f32 0.35355338, %v1857_v20 }
 0x275   : > { %v5742_v23 = vpop.f32.mrf.mxu0  ;;  %v5748_v25 = vpop.f32.mrf.mxu1 }
 0x276   : > { %v1869_v28 = vadd.f32 %v1865_v21, %v6481_v6  ;;  %v1870_v34 = vadd.f32 %v1866_v22, %v6481_v6 }
 0x277   : > { %v1814_v30 = vpop.f32.mrf.mxu0  ;;  %v1860_v31 = vpop.f32.mrf.mxu1 }
 0x278   : > { %v1877_v33 = vsel %vm1678_vm2, %v1869_v28, -inf  ;;  %v1880_v38 = vsel %vm1678_vm2, %v1870_v34, -inf }
 0x279   : > { %v5749_v35 = vpop.f32.mrf.mxu1  ;;  %1878 = vmax.xlane.f32.xlu0 %v1877_v33  ;;  %v5743_v37 = vpop.f32.mrf.mxu0 }
 0x27d   : > { %1881 = vmax.xlane.f32.xlu0 %v1880_v38 }
 0x282   : > { %1526 = vrot.lane.b32.xlu1 %v6392_v11, %s6172_s26 }
 0x2fa   : > { %v1876_v39 = vpop.xlane.xlu1 %1875  ;;  %v1873_v40 = vpop.xlane.xlu0 %1872 }
 0x2fb   : > { %v1884_v41 = vsub.f32 %v1868_v12, %v1876_v39  ;;  %v1883_v42 = vsub.f32 %v1867_v13, %v1873_v40 }
 0x2fd   : > { %v1889_v43 = vmul.f32 1.442695, %v1884_v41  ;;  %v1887_v44 = vmul.f32 1.442695, %v1883_v42 }
 0x2ff   : > { %6057 = vpow2.f32 %v1889_v43 }
 0x300   : > { %6059 = vpow2.f32 %v1887_v44 }
 0x302   : > { %v1879_v11 = vpop.xlane.xlu0 %1878 }
 0x303   : > { %v1885_v49 = vsub.f32 %v1869_v28, %v1879_v11 }
 0x305   : > { %v1891_v51 = vmul.f32 1.442695, %v1885_v49 }
 0x306   : > { %v1882_v50 = vpop.xlane.xlu0 %1881 }
 0x307   : > { %v1886_v52 = vsub.f32 %v1870_v34, %v1882_v50  ;;  %6061 = vpow2.f32 %v1891_v51 }
 0x309   : > { %v1893_v53 = vmul.f32 1.442695, %v1886_v52 }
 0x30b   : > { %6063 = vpow2.f32 %v1893_v53 }
 0x30c   : > { %v6493_v45 = vpop.eup %6057 }
 0x30d   : > { %v6495_v46 = vpop.eup %6059  ;;  %v1898_v47 = vsel %vm1678_vm2, %v6493_v45, 0.0 }
 0x30e   : > { %v1895_v48 = vsel %vm1678_vm2, %v6495_v46, 0.0  ;;  %1899 = vadd.xlane.f32.xlu0 %v1898_v47 }
 0x30f   : > { %1896 = vadd.xlane.f32.xlu1 %v1895_v48 }
 0x314   : > { %v6507_v54 = vpop.eup %6061 }
 0x315   : > { %v1901_v55 = vsel %vm1678_vm2, %v6507_v54, 0.0 }
 0x320   : > { %1530 = vrot.lane.b32.xlu1 %v6417_v32, %s6172_s26  ;;  %v6511_v32 = vpop.eup %6063 }
 0x324   : > { %1532 = vrot.lane.b32.xlu1 %v6406_v26, %s6172_s26  ;;  %1528 = vrot.lane.b32.xlu0 %v6408_v27, %s6172_s26  ;;  %v1904_v26 = vsel %vm1678_vm2, %v6511_v32, 0.0  ;;  %v1527_v27 = vpop.permute.xlu1 %1526 }
 0x343   : > { %1902 = vadd.xlane.f32.xlu0 %v1901_v55 }
 0x348   : > { %1905 = vadd.xlane.f32.xlu1 %v1904_v26 }
 0x397   : > { %v1900_v57 = vpop.xlane.xlu0 %1899 }
 0x398   : > { %v1897_v56 = vpop.xlane.xlu1 %1896  ;;  %6065 = vrcp.f32 %v1900_v57 }
 0x399   : > { %6067 = vrcp.f32 %v1897_v56 }
 0x39b   : > { %v1529_v61 = vpop.permute.xlu0 %1528 }
 0x39c   : > { %v1531_v58 = vpop.permute.xlu1 %1530 }
 0x39d   : > { %v1538_v59 = vcombine.low %v1527_v27, %v1531_v58  ;;  %v1539_v60 = vcombine.high %v1527_v27, %v1531_v58 }
 0x39f   : > { %v1546_v2 = vrot.slane %v1538_v59, %v6411_v29  ;;  %v1553_v3 = vrot.slane %v1539_v60, %v6411_v29 }
 0x3a0   : > { %v1533_v62 = vpop.permute.xlu1 %1532 }
 0x3a1   : > { %v1554_v63 = vcombine.low %v1529_v61, %v1533_v62  ;;  %v1555_v0 = vcombine.high %v1529_v61, %v1533_v62 }
 0x3a3   : > { %v1562_v4 = vrot.slane %v1554_v63, %v6411_v29  ;;  %v1569_v7 = vrot.slane %v1555_v0, %v6411_v29 }
 0x3a5   : > { %v1570_v8 = vcombine.low %v1546_v2, %v1562_v4  ;;  %v1571_v9 = vcombine.high %v1546_v2, %v1562_v4  ;;  %v1586_v10 = vcombine.low %v1553_v3, %v1569_v7  ;;  %v1587_v12 = vcombine.high %v1553_v3, %v1569_v7  ;;  %v6066_v33 = vpop.eup %6065 }
 0x3a6   : > { %v6068_v34 = vpop.eup %6067  ;;  %v1912_v11 = vmul.f32 %v6066_v33, %v6493_v45 }
 0x3a7   : > { %v1578_v13 = vrot.slane %v1570_v8, %v6424_v36  ;;  %v1585_v14 = vrot.slane %v1571_v9, %v6424_v36  ;;  %v1594_v15 = vrot.slane %v1586_v10, %v6424_v36  ;;  %v1601_v16 = vrot.slane %v1587_v12, %v6424_v36 }
 0x3a8   : > { %v1911_v48 = vmul.f32 %v6068_v34, %v6495_v46  ;;  %v1916_v55 = vpack.c.bf16 %v1912_v11, %v1912_v11 }
 0x3a9   : > { %v1606_v19 = vcombine.low %v1578_v13, %v1585_v14  ;;  %v5505_v24 = vcombine.high %v1578_v13, %v1585_v14  ;;  %v1622_v17 = vcombine.low %v1594_v15, %v1601_v16  ;;  %v5506_v18 = vcombine.high %v1594_v15, %v1601_v16 }
 0x3aa   : > { %v1915_v53 = vpack.c.bf16 %v1911_v48, %v1911_v48 }
 0x3ab   : > { %v1613_v20 = vrot.slane %v1606_v19, %v6411_v29  ;;  %v1621_v21 = vrot.slane %v5505_v24, %v6411_v29  ;;  %v1629_v22 = vrot.slane %v1622_v17, %v6411_v29  ;;  %v1637_v23 = vrot.slane %v5506_v18, %v6411_v29 }
 0x3ad   : > { %v1638_v25 = vcombine.low %v1613_v20, %v1621_v21  ;;  %v1654_v28 = vcombine.low %v1629_v22, %v1637_v23  ;;  %v1639_v30 = vcombine.high %v1613_v20, %v1621_v21  ;;  %v1655_v31 = vcombine.high %v1629_v22, %v1637_v23 }
 0x3af   : > { %v1646_v35 = vrot.slane %v1638_v25, %v6424_v36  ;;  %v1662_v37 = vrot.slane %v1654_v28, %v6424_v36  ;;  %v1653_v38 = vrot.slane %v1639_v30, %v6424_v36  ;;  %v1669_v39 = vrot.slane %v1655_v31, %v6424_v36  ;;  %v6031_v30 = vld [vmem:[%s6224_s8 + $0x8] sm:$0xff]  }
 0x3b1   : > { %v1670_v40 = vcombine.low %v1646_v35, %v1662_v37  ;;  %v1671_v41 = vcombine.high %v1646_v35, %v1662_v37  ;;  %v1672_v42 = vcombine.low %v1653_v38, %v1669_v39  ;;  %v1673_v43 = vcombine.high %v1653_v38, %v1669_v39 }
 0x3b3   : > { %v1674_v44 = vpack.c.bf16 %v1670_v40, %v1670_v40  ;;  %v1675_v47 = vpack.c.bf16 %v1671_v41, %v1671_v41  ;;  %v1676_v51 = vpack.c.bf16 %v1672_v42, %v1672_v42  ;;  %v1677_v52 = vpack.c.bf16 %v1673_v43, %v1673_v43  ;;  %v6032_v42 = vld [vmem:[%s6224_s8] sm:$0xff]  }
 0x3b5   : > { %v1924_v49 = vsel %vm1922_vm4, %v1674_v44, 0  ;;  %v1970_v50 = vsel %vm1922_vm4, %v1675_v47, 0  ;;  %v2016_v45 = vsel %vm1922_vm4, %v1676_v51, 0  ;;  %v2062_v46 = vsel %vm1922_vm4, %v1677_v52, 0 }
 0x3b6   : > { %5751 = vmatpush3.bf16.msra.mxu0 %v1924_v49  ;;  %5757 = vmatpush3.bf16.msra.mxu1 %v1970_v50 }
 0x3b7   : > { %5762 = vmatprep.subr.bf16.mxu0 %v6165_v1  ;;  %5768 = vmatprep.subr.bf16.mxu1 %v6165_v1 }
 0x3b9   : > { %5753 = vmatmul.mubr.msk.bf16.vlgmr.msra.gmra.mxu0 %vm1678_vm2, %v1915_v53  ;;  %5759 = vmatmul.mubr.msk.bf16.vlgmr.msra.gmra.mxu1 %vm1678_vm2, %v1916_v55 }
 0x3ba   : > { %5763 = vmatpush3.bf16.msra.mxu0 %v2016_v45  ;;  %5769 = vmatpush3.bf16.msra.mxu1 %v2062_v46 }
 0x3bb   : > { %5764 = vmatprep.mubr.msk.bf16.mxu0 %vm6166_vm0, %v6165_v1  ;;  %5770 = vmatprep.mubr.msk.bf16.mxu1 %vm6166_vm0, %v6165_v1 }
 0x3bc   : > { %5774 = vmatprep.subr.bf16.mxu0 %v6165_v1  ;;  %5782 = vmatprep.subr.bf16.mxu1 %v6165_v1 }
 0x3cc   : > { %v1903_v26 = vpop.xlane.xlu0 %1902 }
 0x3cd   : > { %6069 = vrcp.f32 %v1903_v26 }
 0x3d1   : > { %v1906_v27 = vpop.xlane.xlu1 %1905 }
 0x3d2   : > { %6071 = vrcp.f32 %v1906_v27 }
 0x3da   : > { %v6070_v56 = vpop.eup %6069 }
 0x3db   : > { %v1913_v57 = vmul.f32 %v6070_v56, %v6507_v54 }
 0x3dd   : > { %v1917_v58 = vpack.c.bf16 %v1913_v57, %v1913_v57 }
 0x3df   : > { %v6072_v59 = vpop.eup %6071  ;;  %5765 = vmatmul.mubr.msk.bf16.vlgmr.msra.gmra.mxu0 %vm1678_vm2, %v1917_v58 }
 0x3e0   : > { %v1914_v60 = vmul.f32 %v6072_v59, %v6511_v32  ;;  %5778 = vmatprep.mubr.msk.bf16.mxu0 %vm6166_vm0, %v6165_v1  ;;  %5775 = vmatpush3.bf16.msra.mxu0 %v6031_v30  ;;  %v6035_v30 = vld [vmem:[%s6254_s12 + $0x8] sm:$0xff]  }
 0x3e1   : > { %5776 = vmatprep.subr.bf16.mxu0 %v6165_v1 }
 0x3e2   : > { %v1918_v61 = vpack.c.bf16 %v1914_v60, %v1914_v60 }
 0x3e4   : > { %5771 = vmatmul.mubr.msk.bf16.vlgmr.msra.gmra.mxu1 %vm1678_vm2, %v1918_v61  ;;  %5777 = vmatpush3.bf16.msra.mxu0 %v6032_v42 }
 0x3e5   : > { %5786 = vmatprep.mubr.msk.bf16.mxu1 %vm6166_vm0, %v6165_v1  ;;  %5790 = vmatprep.subr.bf16.mxu0 %v6165_v1 }
 0x479   : > { %v1960_v62 = vpop.f32.mrf.mxu0  ;;  %v2006_v63 = vpop.f32.mrf.mxu1 }
 0x47b   : > { %v5754_v0 = vpop.f32.mrf.mxu0  ;;  %v5760_v2 = vpop.f32.mrf.mxu1 }
 0x47c   : > { %v5517_v0 = vld [vmem:[%s6229_s14] ss:$0 sm:$0xff] }
 0x47d   : > { %v1963_v54 = vpop.f32.mrf.mxu0  ;;  %v2009_v3 = vpop.f32.mrf.mxu1 }
 0x47f   : > { %v5755_v4 = vpop.f32.mrf.mxu0  ;;  %v5761_v7 = vpop.f32.mrf.mxu1 }
 0x49f   : > { %v2052_v8 = vpop.f32.mrf.mxu0 }
 0x4a0   : > { %v2104_v32 = vcombine.low %v1960_v62, %v2052_v8  ;;  %v2105_v10 = vcombine.high %v1960_v62, %v2052_v8 }
 0x4a1   : > { %v5766_v9 = vpop.f32.mrf.mxu0 }
 0x4a2   : > { %v2112_v24 = vrot.slane %v2104_v32, %v6411_v29  ;;  %v2119_v17 = vrot.slane %v2105_v10, %v6411_v29 }
 0x4a3   : > { %v2055_v12 = vpop.f32.mrf.mxu0 }
 0x4a4   : > { %v2098_v13 = vpop.f32.mrf.mxu1 }
 0x4a5   : > { %v2120_v14 = vcombine.low %v2006_v63, %v2098_v13  ;;  %v2121_v15 = vcombine.high %v2006_v63, %v2098_v13  ;;  %v5767_v16 = vpop.f32.mrf.mxu0 }
 0x4a6   : > { %v5772_v19 = vpop.f32.mrf.mxu1  ;;  %v6034_v16 = vld [vmem:[%s6244_s30] sm:$0xff]  }
 0x4a7   : > { %v2128_v18 = vrot.slane %v2120_v14, %v6411_v29  ;;  %v2135_v20 = vrot.slane %v2121_v15, %v6411_v29  ;;  %v6033_v15 = vld [vmem:[%s6244_s30 + $0x8] sm:$0xff]  }
 0x4a8   : > { %v2101_v21 = vpop.f32.mrf.mxu1  ;;  %5783 = vmatpush3.bf16.msra.mxu1 %v6033_v15 }
 0x4a9   : > { %v2136_v22 = vcombine.low %v2112_v24, %v2128_v18  ;;  %v2137_v23 = vcombine.high %v2112_v24, %v2128_v18  ;;  %v2152_v25 = vcombine.low %v2119_v17, %v2135_v20  ;;  %v2153_v28 = vcombine.high %v2119_v17, %v2135_v20  ;;  %5784 = vmatprep.subr.bf16.mxu1 %v6165_v1  ;;  %v5521_v20 = vld [vmem:[%s6234_s19] ss:$0 sm:$0xff] }
 0x4aa   : > { %v5773_v31 = vpop.f32.mrf.mxu1 }
 0x4ab   : > { %v2144_v33 = vrot.slane %v2136_v22, %v6424_v36  ;;  %v2151_v34 = vrot.slane %v2137_v23, %v6424_v36  ;;  %v2160_v35 = vrot.slane %v2152_v25, %v6424_v36  ;;  %v2167_v37 = vrot.slane %v2153_v28, %v6424_v36  ;;  %v5522_v22 = vld [vmem:[%s6239_s24] ss:$0 sm:$0xff] }
 0x4ac   : > { %5785 = vmatpush3.bf16.msra.mxu1 %v6034_v16  ;;  %v6036_v31 = vld [vmem:[%s6254_s12] sm:$0xff]  }
 0x4ad   : > { %v2172_v38 = vcombine.low %v2144_v33, %v2151_v34  ;;  %v5515_v39 = vcombine.high %v2144_v33, %v2151_v34  ;;  %v2188_v40 = vcombine.low %v2160_v35, %v2167_v37  ;;  %v5516_v41 = vcombine.high %v2160_v35, %v2167_v37  ;;  %5798 = vmatprep.subr.bf16.mxu1 %v6165_v1  ;;  %v5523_v34 = vld [vmem:[%s6249_s6] ss:$0 sm:$0xff] }
 0x4ae   : > { %v1068_v33 = vsel %vm1067_vm1, %v6379_v5, 0.0  ;;  %v5491_v16 = vld [vmem:[%s7129_s4] ss:$0 sm:$0xff]  ;;  %s7133_s4 = sld [smem:[#allocation9_spill]] }
 0x4af   : > { %v2179_v43 = vrot.slane %v2172_v38, %v6411_v29  ;;  %v2187_v44 = vrot.slane %v5515_v39, %v6411_v29  ;;  %v2195_v47 = vrot.slane %v2188_v40, %v6411_v29  ;;  %v2203_v48 = vrot.slane %v5516_v41, %v6411_v29 }
 0x4b1   : > { %v2205_v11 = vcombine.high %v2179_v43, %v2187_v44  ;;  %v2221_v49 = vcombine.high %v2195_v47, %v2203_v48  ;;  %v2204_v50 = vcombine.low %v2179_v43, %v2187_v44  ;;  %v2220_v51 = vcombine.low %v2195_v47, %v2203_v48 }
 0x4b3   : > { %v2219_v52 = vrot.slane %v2205_v11, %v6424_v36  ;;  %v2235_v53 = vrot.slane %v2221_v49, %v6424_v36  ;;  %v2212_v55 = vrot.slane %v2204_v50, %v6424_v36  ;;  %v2228_v45 = vrot.slane %v2220_v51, %v6424_v36  ;;  %v5527_v49 = vld [vmem:[%s6259_s20] ss:$0 sm:$0xff] }
 0x4b5   : > { %v2238_v46 = vcombine.low %v2219_v52, %v2235_v53  ;;  %v2237_v26 = vcombine.high %v2212_v55, %v2228_v45  ;;  %v2236_v27 = vcombine.low %v2212_v55, %v2228_v45  ;;  %v2239_v56 = vcombine.high %v2219_v52, %v2235_v53 }
 0x4b7   : > { %2245 = vrot.lane.b32.xlu1 %v2238_v46, %s6173_s28  ;;  %2241 = vrot.lane.b32.xlu0 %v2237_v26, %s7108_s1  ;;  %v6037_v26 = vld [vmem:[%s6284_s27 + $0x8] sm:$0xff]  }
 0x4bb   : > { %2249 = vrot.lane.b32.xlu0 %v2239_v56, %s7107_s2 }
 0x529   : > { %v2242_v57 = vpop.permute.xlu0 %2241  ;;  %v2246_v58 = vpop.permute.xlu1 %2245 }
 0x52a   : > { %v2252_v59 = vsel %vm1678_vm2, %v2236_v27, %v2242_v57  ;;  %v1058_v27 = vld [vmem:[%s1051_s7] sm:$0xff]  ;;  %s7131_s7 = sld [smem:[#allocation5_spill]] }
 0x52b   : > { %v2254_v61 = vsel %vm2253_vm5, %v2252_v59, %v2246_v58  ;;  %v2521_v56 = vpack.c.bf16 %v1058_v27, %v1058_v27 }
 0x52d   : > { %v2250_v60 = vpop.permute.xlu0 %2249 }
 0x52e   : > { %v2256_v62 = vsel %vm2255_vm6, %v2254_v61, %v2250_v60 }
 0x52f   : > { %v2257_v63 = vpack.c.bf16 %v2256_v62, %v2256_v62  ;;  %v6039_v62 = vld [vmem:[%s7127_s11 + $0x8] sm:$0xff]  }
 0x531   : > { %5779 = vmatmul.mubr.msk.bf16.vlgmr.msra.gmra.mxu0 %vm1067_vm1, %v2257_v63  ;;  %v6040_v63 = vld [vmem:[%s7127_s11] sm:$0xff]  }
 0x532   : > { %5794 = vmatprep.mubr.msk.bf16.mxu0 %vm6166_vm0, %v6165_v1  ;;  %5791 = vmatpush3.bf16.msra.mxu0 %v6035_v30 }
 0x533   : > { %5792 = vmatprep.subr.bf16.mxu0 %v6165_v1 }
 0x536   : > { %5793 = vmatpush3.bf16.msra.mxu0 %v6036_v31 }
 0x537   : > { %5806 = vmatprep.subr.bf16.mxu0 %v6165_v1 }
 0x5f1   : > { %v2318_v2 = vpop.f32.mrf.mxu0 }
 0x5f2   : > { %v2319_v54 = vadd.f32 %v5517_v0, %v2318_v2  ;;  %v6626_v0 = vld [vmem:[%s7128_s16] ss:$0 sm:$0xff]  ;;  %s7132_s16 = sld [smem:[#allocation7_spill]] }
 0x5f3   : > { %v5780_v3 = vpop.f32.mrf.mxu0 }
 0x5f4   : > { %v2324_v4 = vadd.f32 %v2319_v54, %v6379_v5 }
 0x5f5   : > { %v2321_v7 = vpop.f32.mrf.mxu0 }
 0x5f6   : > { %v2327_v8 = vsel %vm1067_vm1, %v2324_v4, 0.0 }
 0x5f7   : > { %2328 = vadd.xlane.f32.xlu1 %v2327_v8  ;;  %v5781_v9 = vpop.f32.mrf.mxu0 }
 0x680   : > { %v2329_v32 = vpop.xlane.xlu1 %2328 }
 0x681   : > { %v2330_v10 = vmul.f32 0.03125, %v2329_v32 }
 0x683   : > { %v2331_v12 = vsub.f32 %v2324_v4, %v2330_v10 }
 0x685   : > { %v2332_v13 = vmul.f32 %v2331_v12, %v2331_v12 }
 0x687   : > { %v2333_v14 = vsel %vm1067_vm1, %v2332_v13, 0.0 }
 0x688   : > { %2334 = vadd.xlane.f32.xlu0 %v2333_v14 }
 0x68c   : > { %1069 = vadd.xlane.f32.xlu0 %v1068_v33 }
 0x711   : > { %v2335_v19 = vpop.xlane.xlu0 %2334 }
 0x712   : > { %v2336_v24 = vmul.f32 0.03125, %v2335_v19 }
 0x714   : > { %v2337_v17 = vadd.f32 1e-05, %v2336_v24  ;;  %v5531_v24 = vld [vmem:[%s7130_s10] ss:$0 sm:$0xff]  ;;  %s7134_s10 = sld [smem:[#allocation11_spill]] }
 0x715   : > { %v1070_v43 = vpop.xlane.xlu0 %1069 }
 0x716   : > { %6073 = vrsqrt.f32 %v2337_v17  ;;  %v1072_v44 = vmul.f32 0.03125, %v1070_v43 }
 0x718   : > { %v1073_v47 = vsub.f32 %v6379_v5, %v1072_v44  ;;  %v6038_v5 = vld [vmem:[%s6284_s27] sm:$0xff]  }
 0x71a   : > { %v1074_v48 = vmul.f32 %v1073_v47, %v1073_v47 }
 0x71c   : > { %v1075_v11 = vsel %vm1067_vm1, %v1074_v48, 0.0 }
 0x71d   : > { %1076 = vadd.xlane.f32.xlu0 %v1075_v11 }
 0x723   : > { %v6074_v18 = vpop.eup %6073 }
 0x724   : > { %v2339_v21 = vmul.f32 %v6074_v18, %v2331_v12 }
 0x726   : > { %v2346_v23 = vmul.f32 %v5521_v20, %v2339_v21  ;;  %v5492_v20 = vld [vmem:[%s7131_s7] ss:$0 sm:$0xff]  ;;  %s7135_s7 = sld [smem:[#allocation12_spill]] }
 0x727   : > { %v5532_v21 = vld [vmem:[%s7132_s16] ss:$0 sm:$0xff]  ;;  %s7136_s16 = sld [smem:[#allocation15_spill]] }
 0x728   : > { %v2353_v25 = vadd.f32 %v5522_v22, %v2346_v23 }
 0x72a   : > { %v2354_v28 = vpack.c.bf16 %v2353_v25, %v2353_v25 }
 0x72c   : > { %5787 = vmatmul.mubr.msk.bf16.vlgmr.msra.gmra.mxu1 %vm1067_vm1, %v2354_v28 }
 0x72d   : > { %5802 = vmatprep.mubr.msk.bf16.mxu1 %vm6166_vm0, %v6165_v1  ;;  %5799 = vmatpush3.bf16.msra.mxu1 %v6039_v62 }
 0x72e   : > { %5800 = vmatprep.subr.bf16.mxu1 %v6165_v1 }
 0x731   : > { %5801 = vmatpush3.bf16.msra.mxu1 %v6040_v63 }
 0x732   : > { %5814 = vmatprep.subr.bf16.mxu1 %v6165_v1 }
 0x7a6   : > { %v1077_v8 = vpop.xlane.xlu0 %1076 }
 0x7a7   : > { %v1078_v9 = vmul.f32 0.03125, %v1077_v8 }
 0x7a9   : > { %v1079_v32 = vadd.f32 1e-05, %v1078_v9 }
 0x7ab   : > { %6075 = vrsqrt.f32 %v1079_v32 }
 0x7b8   : > { %v6076_v14 = vpop.eup %6075 }
 0x7b9   : > { %v1081_v15 = vmul.f32 %v6076_v14, %v1073_v47 }
 0x7bb   : > { %v1088_v17 = vmul.f32 %v5491_v16, %v1081_v15 }
 0x7bd   : > { %v1095_v23 = vadd.f32 %v5492_v20, %v1088_v17 }
 0x7ec   : > { %v2415_v35 = vpop.f32.mrf.mxu1 }
 0x7ed   : > { %v2416_v37 = vadd.f32 %v5523_v34, %v2415_v35 }
 0x7ee   : > { %v5788_v38 = vpop.f32.mrf.mxu1 }
 0x7ef   : > { %v2421_v39 = vmax.f32 %v2416_v37, 0.0 }
 0x7f0   : > { %v2418_v40 = vpop.f32.mrf.mxu1 }
 0x7f1   : > { %v2422_v41 = vpack.c.bf16 %v2421_v39, %v2421_v39 }
 0x7f2   : > { %v5789_v42 = vpop.f32.mrf.mxu1 }
 0x7f3   : > { %5795 = vmatmul.mubr.msk.bf16.vlgmr.msra.gmra.mxu0 %vm1067_vm1, %v2422_v41 }
 0x7f4   : > { %5810 = vmatprep.mubr.msk.bf16.mxu0 %vm6166_vm0, %v6165_v1  ;;  %5807 = vmatpush3.bf16.msra.mxu0 %v6037_v26 }
 0x7f5   : > { %5808 = vmatprep.subr.bf16.mxu0 %v6165_v1 }
 0x7f8   : > { %5809 = vmatpush3.bf16.msra.mxu0 %v6038_v5 }
 0x7f9   : > { %5820 = vmatprep.subr.bf16.mxu0 %v6165_v1 }
 0x7fb   : > { %5811 = vmatmul.mubr.msk.bf16.vlgmr.msra.gmra.mxu0 %vm1067_vm1, %v2521_v56 }
 0x7fc   : > { %5822 = vmatprep.mubr.msk.bf16.mxu0 %vm6166_vm0, %v6165_v1 }
 0x8b3   : > { %v2483_v50 = vpop.f32.mrf.mxu0 }
 0x8b4   : > { %v2484_v51 = vadd.f32 %v5527_v49, %v2483_v50 }
 0x8b5   : > { %v5796_v52 = vpop.f32.mrf.mxu0 }
 0x8b6   : > { %v2489_v53 = vadd.f32 %v2484_v51, %v2353_v25 }
 0x8b7   : > { %v2486_v55 = vpop.f32.mrf.mxu0 }
 0x8b8   : > { %v2492_v45 = vsel %vm1067_vm1, %v2489_v53, 0.0 }
 0x8b9   : > { %2493 = vadd.xlane.f32.xlu1 %v2492_v45  ;;  %v5797_v46 = vpop.f32.mrf.mxu0 }
 0x8bb   : > { %v2648_v2 = vpop.f32.mrf.mxu0 }
 0x8bc   : > { %v6629_v54 = vadd.f32 %v6626_v0, %v2648_v2 }
 0x8bd   : > { %v5812_v3 = vpop.f32.mrf.mxu0 }
 0x8be   : > { %2805 = vrot.lane.b32.xlu0 %v6629_v54, %s6168_s22 }
 0x8bf   : > { %v2651_v4 = vpop.f32.mrf.mxu0 }
 0x8c1   : > { %v5813_v7 = vpop.f32.mrf.mxu0 }
 0x930   : > { %v6655_v34 = vpop.permute.xlu0 %2805 }
 0x942   : > { %v2494_v57 = vpop.xlane.xlu1 %2493 }
 0x943   : > { %v2495_v58 = vmul.f32 0.03125, %v2494_v57 }
 0x945   : > { %v2496_v59 = vsub.f32 %v2489_v53, %v2495_v58 }
 0x947   : > { %v2497_v60 = vmul.f32 %v2496_v59, %v2496_v59 }
 0x949   : > { %v2498_v61 = vsel %vm1067_vm1, %v2497_v60, 0.0 }
 0x94a   : > { %2499 = vadd.xlane.f32.xlu1 %v2498_v61 }
 0x95b   : > { %2808 = vrot.lane.b32.xlu1 %v6629_v54, %s6169_s23 }
 0x95f   : > { %2811 = vrot.lane.b32.xlu1 %v6629_v54, %s6167_s18 }
 0x9d3   : > { %v2500_v10 = vpop.xlane.xlu1 %2499 }
 0x9d4   : > { %v2501_v12 = vmul.f32 0.03125, %v2500_v10 }
 0x9d6   : > { %v2502_v13 = vadd.f32 1e-05, %v2501_v12 }
 0x9d7   : > { %v6651_v31 = vpop.permute.xlu1 %2808 }
 0x9d8   : > { %6077 = vrsqrt.f32 %v2502_v13  ;;  %v2814_v35 = vcombine.low %v6629_v54, %v6651_v31  ;;  %v2815_v37 = vcombine.high %v6629_v54, %v6651_v31  ;;  %v6690_v13 = vld [vmem:[%s7133_s4] ss:$0 sm:$0xff]  ;;  %s7137_s4 = sld [smem:[#allocation13_spill]] }
 0x9da   : > { %v2822_v40 = vrot.slane %v2814_v35, %v6411_v29  ;;  %v2829_v41 = vrot.slane %v2815_v37, %v6411_v29 }
 0x9db   : > { %v6653_v33 = vpop.permute.xlu1 %2811 }
 0x9dc   : > { %v2830_v38 = vcombine.low %v6655_v34, %v6653_v33  ;;  %v2831_v39 = vcombine.high %v6655_v34, %v6653_v33 }
 0x9de   : > { %v2838_v42 = vrot.slane %v2830_v38, %v6411_v29  ;;  %v2845_v43 = vrot.slane %v2831_v39, %v6411_v29 }
 0x9e0   : > { %v2846_v44 = vcombine.low %v2822_v40, %v2838_v42  ;;  %v2847_v47 = vcombine.high %v2822_v40, %v2838_v42  ;;  %v2862_v48 = vcombine.low %v2829_v41, %v2845_v43  ;;  %v2863_v11 = vcombine.high %v2829_v41, %v2845_v43 }
 0x9e2   : > { %v2854_v49 = vrot.slane %v2846_v44, %v6424_v36  ;;  %v2861_v50 = vrot.slane %v2847_v47, %v6424_v36  ;;  %v2870_v51 = vrot.slane %v2862_v48, %v6424_v36  ;;  %v2877_v52 = vrot.slane %v2863_v11, %v6424_v36 }
 0x9e4   : > { %v2882_v53 = vcombine.low %v2854_v49, %v2861_v50  ;;  %v5543_v55 = vcombine.high %v2854_v49, %v2861_v50  ;;  %v2898_v45 = vcombine.low %v2870_v51, %v2877_v52  ;;  %v5544_v46 = vcombine.high %v2870_v51, %v2877_v52 }
 0x9e5   : > { %v6078_v19 = vpop.eup %6077 }
 0x9e6   : > { %v2504_v18 = vmul.f32 %v6078_v19, %v2496_v59  ;;  %v2889_v26 = vrot.slane %v2882_v53, %v6411_v29  ;;  %v2897_v5 = vrot.slane %v5543_v55, %v6411_v29  ;;  %v2905_v27 = vrot.slane %v2898_v45, %v6411_v29 }
 0x9e7   : > { %v2913_v56 = vrot.slane %v5544_v46, %v6411_v29 }
 0x9e8   : > { %v2511_v22 = vmul.f32 %v5531_v24, %v2504_v18  ;;  %v2914_v57 = vcombine.low %v2889_v26, %v2897_v5  ;;  %v2915_v59 = vcombine.high %v2889_v26, %v2897_v5 }
 0x9e9   : > { %v2930_v58 = vcombine.low %v2905_v27, %v2913_v56  ;;  %v2931_v60 = vcombine.high %v2905_v27, %v2913_v56 }
 0x9ea   : > { %v2518_v25 = vadd.f32 %v5532_v21, %v2511_v22  ;;  %v2922_v61 = vrot.slane %v2914_v57, %v6424_v36  ;;  %v2929_v63 = vrot.slane %v2915_v59, %v6424_v36 }
 0x9eb   : > { %v2938_v62 = vrot.slane %v2930_v58, %v6424_v36  ;;  %v2945_v2 = vrot.slane %v2931_v60, %v6424_v36 }
 0x9ec   : > { %v6641_v28 = vadd.f32 %v2518_v25, %v1095_v23 }
 0x9ed   : > { %v2946_v3 = vcombine.low %v2922_v61, %v2938_v62  ;;  %v2947_v4 = vcombine.high %v2922_v61, %v2938_v62  ;;  %v6681_v7 = vcombine.low %v2929_v63, %v2945_v2  ;;  %v6683_v8 = vcombine.high %v2929_v63, %v2945_v2 }
 0x9ee   : > { %v6645_v30 = vpack.c.bf16 %v6641_v28, %v6641_v28 }
 0x9ef   : > { %v2950_v9 = vpack.c.bf16 %v2946_v3, %v2946_v3  ;;  %v2951_v32 = vpack.c.bf16 %v2947_v4, %v2947_v4  ;;  %v2952_v61 = vpack.c.bf16 %v6681_v7, %v6681_v7  ;;  %v2953_v62 = vpack.c.bf16 %v6683_v8, %v6683_v8 }
 0x9f0   : > { %5803 = vmatmul.mubr.msk.bf16.vlgmr.msra.gmra.mxu1 %vm1067_vm1, %v6645_v30 }
 0x9f1   : > { %5816 = vmatprep.mubr.msk.bf16.mxu1 %vm6166_vm0, %v6165_v1  ;;  %v3110_v10 = vsel %vm1678_vm2, %v2950_v9, 0  ;;  %v3156_v12 = vsel %vm1678_vm2, %v2951_v32, 0  ;;  %v3202_v9 = vsel %vm1678_vm2, %v2952_v61, 0  ;;  %v3248_v32 = vsel %vm1678_vm2, %v2953_v62, 0 }
 0x9f2   : > { %5815 = vmatpush3.bf16.xpose.msra.mxu1 %v3110_v10  ;;  %5821 = vmatpush3.bf16.xpose.msra.mxu0 %v3156_v12 }
 0x9f3   : > { %5826 = vmatprep.subr.bf16.mxu1 %v6165_v1  ;;  %5832 = vmatprep.subr.bf16.mxu0 %v6165_v1 }
 0xab0   : > { %v2582_v14 = vpop.f32.mrf.mxu1 }
 0xab1   : > { %v2583_v15 = vadd.f32 %v6690_v13, %v2582_v14 }
 0xab2   : > { %v5804_v16 = vpop.f32.mrf.mxu1 }
 0xab3   : > { %2658 = vrot.lane.b32.xlu1 %v2583_v15, %s6169_s23  ;;  %2655 = vrot.lane.b32.xlu0 %v2583_v15, %s6168_s22 }
 0xab4   : > { %v2585_v19 = vpop.f32.mrf.mxu1 }
 0xab6   : > { %v5805_v24 = vpop.f32.mrf.mxu1 }
 0xab7   : > { %2661 = vrot.lane.b32.xlu0 %v2583_v15, %s6167_s18 }
 0xb25   : > { %v2659_v17 = vpop.permute.xlu1 %2658  ;;  %v2656_v18 = vpop.permute.xlu0 %2655 }
 0xb26   : > { %v2664_v20 = vcombine.low %v2583_v15, %v2659_v17  ;;  %v2665_v21 = vcombine.high %v2583_v15, %v2659_v17 }
 0xb28   : > { %v2672_v35 = vrot.slane %v2664_v20, %v6411_v29  ;;  %v2679_v37 = vrot.slane %v2665_v21, %v6411_v29 }
 0xb29   : > { %v2662_v22 = vpop.permute.xlu0 %2661 }
 0xb2a   : > { %v2680_v23 = vcombine.low %v2656_v18, %v2662_v22  ;;  %v2681_v25 = vcombine.high %v2656_v18, %v2662_v22 }
 0xb2c   : > { %v2688_v38 = vrot.slane %v2680_v23, %v6411_v29  ;;  %v2695_v39 = vrot.slane %v2681_v25, %v6411_v29 }
 0xb2e   : > { %v2696_v40 = vcombine.low %v2672_v35, %v2688_v38  ;;  %v2697_v41 = vcombine.high %v2672_v35, %v2688_v38  ;;  %v2712_v42 = vcombine.low %v2679_v37, %v2695_v39  ;;  %v2713_v43 = vcombine.high %v2679_v37, %v2695_v39 }
 0xb30   : > { %v2704_v44 = vrot.slane %v2696_v40, %v6424_v36  ;;  %v2711_v47 = vrot.slane %v2697_v41, %v6424_v36  ;;  %v2720_v48 = vrot.slane %v2712_v42, %v6424_v36  ;;  %v2727_v11 = vrot.slane %v2713_v43, %v6424_v36 }
 0xb32   : > { %v2732_v49 = vcombine.low %v2704_v44, %v2711_v47  ;;  %v5541_v50 = vcombine.high %v2704_v44, %v2711_v47  ;;  %v2748_v51 = vcombine.low %v2720_v48, %v2727_v11  ;;  %v5542_v52 = vcombine.high %v2720_v48, %v2727_v11 }
 0xb34   : > { %v2739_v53 = vrot.slane %v2732_v49, %v6411_v29  ;;  %v2747_v55 = vrot.slane %v5541_v50, %v6411_v29  ;;  %v2755_v45 = vrot.slane %v2748_v51, %v6411_v29  ;;  %v2763_v46 = vrot.slane %v5542_v52, %v6411_v29 }
 0xb36   : > { %v2764_v26 = vcombine.low %v2739_v53, %v2747_v55  ;;  %v2780_v5 = vcombine.low %v2755_v45, %v2763_v46  ;;  %v2765_v27 = vcombine.high %v2739_v53, %v2747_v55  ;;  %v2781_v56 = vcombine.high %v2755_v45, %v2763_v46 }
 0xb38   : > { %v2772_v57 = vrot.slane %v2764_v26, %v6424_v36  ;;  %v2788_v58 = vrot.slane %v2780_v5, %v6424_v36  ;;  %v2779_v3 = vrot.slane %v2765_v27, %v6424_v36  ;;  %v2795_v4 = vrot.slane %v2781_v56, %v6424_v36 }
 0xb3a   : > { %v2796_v59 = vcombine.low %v2772_v57, %v2788_v58  ;;  %v2797_v60 = vcombine.high %v2772_v57, %v2788_v58  ;;  %v2798_v7 = vcombine.low %v2779_v3, %v2795_v4  ;;  %v2799_v8 = vcombine.high %v2779_v3, %v2795_v4 }
 0xb3c   : > { %v2800_v63 = vpack.c.bf16 %v2796_v59, %v2796_v59  ;;  %v2801_v2 = vpack.c.bf16 %v2797_v60, %v2797_v60  ;;  %v2802_v10 = vpack.c.bf16 %v2798_v7, %v2798_v7  ;;  %v2803_v12 = vpack.c.bf16 %v2799_v8, %v2799_v8 }
 0xb3e   : > { %5817 = vmatmul.mubr.msk.bf16.vlgmr.msra.gmra.mxu1 %vm1678_vm2, %v2800_v63  ;;  %5823 = vmatmul.mubr.msk.bf16.vlgmr.msra.gmra.mxu0 %vm1678_vm2, %v2801_v2 }
 0xb3f   : > { %5827 = vmatpush3.bf16.xpose.msra.mxu1 %v3202_v9  ;;  %5833 = vmatpush3.bf16.xpose.msra.mxu0 %v3248_v32 }
 0xb40   : > { %5828 = vmatprep.mubr.msk.bf16.mxu1 %vm6166_vm0, %v6165_v1  ;;  %5834 = vmatprep.mubr.msk.bf16.mxu0 %vm6166_vm0, %v6165_v1 }
 0xb41   : > { %5838 = vmatprep.subr.bf16.mxu1 %v6165_v1  ;;  %5844 = vmatprep.subr.bf16.mxu0 %v6165_v1 }
 0xb46   : > { %5829 = vmatmul.mubr.msk.bf16.vlgmr.msra.gmra.mxu1 %vm1678_vm2, %v2802_v10  ;;  %5835 = vmatmul.mubr.msk.bf16.vlgmr.msra.gmra.mxu0 %vm1678_vm2, %v2803_v12 }
 0xb47   : > { %5840 = vmatprep.mubr.msk.bf16.mxu1 %vm6166_vm0, %v6165_v1  ;;  %5846 = vmatprep.mubr.msk.bf16.mxu0 %vm6166_vm0, %v6165_v1 }
 0xbfe   : > { %v3146_v14 = vpop.f32.mrf.mxu1  ;;  %v3192_v15 = vpop.f32.mrf.mxu0 }
 0xbff   : > { %v3290_v16 = vmul.f32 0.35355338, %v3146_v14  ;;  %v3291_v19 = vmul.f32 0.35355338, %v3192_v15 }
 0xc00   : > { %v5818_v24 = vpop.f32.mrf.mxu1  ;;  %v5824_v17 = vpop.f32.mrf.mxu0 }
 0xc01   : > { %v3295_v18 = vadd.f32 %v3291_v19, %v6481_v6  ;;  %v3294_v20 = vadd.f32 %v3290_v16, %v6481_v6 }
 0xc02   : > { %v3149_v21 = vpop.f32.mrf.mxu1  ;;  %v3195_v22 = vpop.f32.mrf.mxu0 }
 0xc03   : > { %v3301_v23 = vsel %vm1678_vm2, %v3295_v18, -inf  ;;  %v3298_v25 = vsel %vm1678_vm2, %v3294_v20, -inf }
 0xc04   : > { %3302 = vmax.xlane.f32.xlu0 %v3301_v23  ;;  %v5825_v35 = vpop.f32.mrf.mxu0  ;;  %3299 = vmax.xlane.f32.xlu1 %v3298_v25  ;;  %v5819_v37 = vpop.f32.mrf.mxu1 }
 0xc06   : > { %v3238_v38 = vpop.f32.mrf.mxu1  ;;  %v3284_v39 = vpop.f32.mrf.mxu0 }
 0xc07   : > { %v3292_v40 = vmul.f32 0.35355338, %v3238_v38  ;;  %v3293_v41 = vmul.f32 0.35355338, %v3284_v39 }
 0xc08   : > { %v5830_v42 = vpop.f32.mrf.mxu1  ;;  %v5836_v43 = vpop.f32.mrf.mxu0 }
 0xc09   : > { %v3297_v44 = vadd.f32 %v3293_v41, %v6481_v6  ;;  %v3296_v47 = vadd.f32 %v3292_v40, %v6481_v6 }
 0xc0a   : > { %v3241_v48 = vpop.f32.mrf.mxu1  ;;  %v3287_v11 = vpop.f32.mrf.mxu0 }
 0xc0b   : > { %v3307_v49 = vsel %vm1678_vm2, %v3297_v44, -inf  ;;  %v3304_v50 = vsel %vm1678_vm2, %v3296_v47, -inf }
 0xc0c   : > { %v5837_v51 = vpop.f32.mrf.mxu0  ;;  %3308 = vmax.xlane.f32.xlu1 %v3307_v49  ;;  %3305 = vmax.xlane.f32.xlu0 %v3304_v50  ;;  %v5831_v52 = vpop.f32.mrf.mxu1 }
 0xc1d   : > { %2956 = vrot.lane.b32.xlu1 %v6655_v34, %s6172_s26 }
 0xc22   : > { %2954 = vrot.lane.b32.xlu0 %v6629_v54, %s6172_s26 }
 0xc8d   : > { %v3303_v53 = vpop.xlane.xlu0 %3302  ;;  %v3300_v55 = vpop.xlane.xlu1 %3299 }
 0xc8e   : > { %v3311_v45 = vsub.f32 %v3295_v18, %v3303_v53  ;;  %v3310_v46 = vsub.f32 %v3294_v20, %v3300_v55 }
 0xc90   : > { %v3316_v26 = vmul.f32 1.442695, %v3311_v45  ;;  %v3314_v5 = vmul.f32 1.442695, %v3310_v46 }
 0xc92   : > { %6079 = vpow2.f32 %v3316_v26 }
 0xc93   : > { %6081 = vpow2.f32 %v3314_v5 }
 0xc95   : > { %v3306_v54 = vpop.xlane.xlu0 %3305  ;;  %v3309_v58 = vpop.xlane.xlu1 %3308 }
 0xc96   : > { %v3312_v59 = vsub.f32 %v3296_v47, %v3306_v54  ;;  %v3313_v60 = vsub.f32 %v3297_v44, %v3309_v58 }
 0xc98   : > { %v3318_v61 = vmul.f32 1.442695, %v3312_v59  ;;  %v3320_v62 = vmul.f32 1.442695, %v3313_v60 }
 0xc99   : > { %v2955_v4 = vpop.permute.xlu0 %2954 }
 0xc9a   : > { %6083 = vpow2.f32 %v3318_v61 }
 0xc9b   : > { %6085 = vpow2.f32 %v3320_v62 }
 0xc9f   : > { %v6744_v27 = vpop.eup %6079 }
 0xca0   : > { %v6746_v56 = vpop.eup %6081  ;;  %v3325_v57 = vsel %vm1678_vm2, %v6744_v27, 0.0 }
 0xca1   : > { %3326 = vadd.xlane.f32.xlu1 %v3325_v57  ;;  %v3322_v34 = vsel %vm1678_vm2, %v6746_v56, 0.0 }
 0xca2   : > { %3323 = vadd.xlane.f32.xlu0 %v3322_v34 }
 0xca7   : > { %v6756_v63 = vpop.eup %6083 }
 0xca8   : > { %v6758_v2 = vpop.eup %6085  ;;  %v3328_v3 = vsel %vm1678_vm2, %v6756_v63, 0.0 }
 0xcb2   : > { %2958 = vrot.lane.b32.xlu1 %v6651_v31, %s6172_s26  ;;  %v3331_v31 = vsel %vm1678_vm2, %v6758_v2, 0.0 }
 0xcb8   : > { %2960 = vrot.lane.b32.xlu0 %v6653_v33, %s6172_s26  ;;  %v2957_v33 = vpop.permute.xlu1 %2956 }
 0xcd6   : > { %3329 = vadd.xlane.f32.xlu1 %v3328_v3 }
 0xcd7   : > { %3332 = vadd.xlane.f32.xlu0 %v3331_v31 }
 0xd2a   : > { %v3327_v9 = vpop.xlane.xlu1 %3326 }
 0xd2b   : > { %v3324_v32 = vpop.xlane.xlu0 %3323  ;;  %6087 = vrcp.f32 %v3327_v9 }
 0xd2c   : > { %6089 = vrcp.f32 %v3324_v32 }
 0xd2e   : > { %v2959_v7 = vpop.permute.xlu1 %2958 }
 0xd2f   : > { %v2966_v8 = vcombine.low %v2955_v4, %v2959_v7  ;;  %v2967_v10 = vcombine.high %v2955_v4, %v2959_v7  ;;  %v2961_v12 = vpop.permute.xlu0 %2960 }
 0xd30   : > { %v2982_v14 = vcombine.low %v2957_v33, %v2961_v12  ;;  %v2983_v15 = vcombine.high %v2957_v33, %v2961_v12 }
 0xd31   : > { %v2974_v16 = vrot.slane %v2966_v8, %v6411_v29  ;;  %v2981_v19 = vrot.slane %v2967_v10, %v6411_v29 }
 0xd32   : > { %v2990_v24 = vrot.slane %v2982_v14, %v6411_v29  ;;  %v2997_v17 = vrot.slane %v2983_v15, %v6411_v29 }
 0xd34   : > { %v2998_v18 = vcombine.low %v2974_v16, %v2990_v24  ;;  %v2999_v20 = vcombine.high %v2974_v16, %v2990_v24  ;;  %v3014_v21 = vcombine.low %v2981_v19, %v2997_v17  ;;  %v3015_v22 = vcombine.high %v2981_v19, %v2997_v17 }
 0xd36   : > { %v3006_v23 = vrot.slane %v2998_v18, %v6424_v36  ;;  %v3013_v25 = vrot.slane %v2999_v20, %v6424_v36  ;;  %v3022_v35 = vrot.slane %v3014_v21, %v6424_v36  ;;  %v3029_v37 = vrot.slane %v3015_v22, %v6424_v36 }
 0xd38   : > { %v3034_v38 = vcombine.low %v3006_v23, %v3013_v25  ;;  %v5545_v39 = vcombine.high %v3006_v23, %v3013_v25  ;;  %v3050_v40 = vcombine.low %v3022_v35, %v3029_v37  ;;  %v5546_v41 = vcombine.high %v3022_v35, %v3029_v37  ;;  %v6088_v51 = vpop.eup %6087 }
 0xd39   : > { %v6090_v46 = vpop.eup %6089  ;;  %v3339_v60 = vmul.f32 %v6088_v51, %v6744_v27 }
 0xd3a   : > { %v3041_v42 = vrot.slane %v3034_v38, %v6411_v29  ;;  %v3049_v43 = vrot.slane %v5545_v39, %v6411_v29  ;;  %v3057_v44 = vrot.slane %v3050_v40, %v6411_v29  ;;  %v3065_v47 = vrot.slane %v5546_v41, %v6411_v29 }
 0xd3b   : > { %v3338_v59 = vmul.f32 %v6090_v46, %v6746_v56  ;;  %v3343_v4 = vpack.c.bf16 %v3339_v60, %v3339_v60 }
 0xd3c   : > { %v3066_v48 = vcombine.low %v3041_v42, %v3049_v43  ;;  %v3082_v11 = vcombine.low %v3057_v44, %v3065_v47  ;;  %v3067_v49 = vcombine.high %v3041_v42, %v3049_v43  ;;  %v3083_v50 = vcombine.high %v3057_v44, %v3065_v47 }
 0xd3d   : > { %v3342_v33 = vpack.c.bf16 %v3338_v59, %v3338_v59 }
 0xd3e   : > { %v3074_v52 = vrot.slane %v3066_v48, %v6424_v36  ;;  %v3090_v53 = vrot.slane %v3082_v11, %v6424_v36  ;;  %v3081_v55 = vrot.slane %v3067_v49, %v6424_v36  ;;  %v3097_v45 = vrot.slane %v3083_v50, %v6424_v36 }
 0xd40   : > { %v3098_v26 = vcombine.low %v3074_v52, %v3090_v53  ;;  %v3099_v5 = vcombine.high %v3074_v52, %v3090_v53  ;;  %v3100_v57 = vcombine.low %v3081_v55, %v3097_v45  ;;  %v3101_v34 = vcombine.high %v3081_v55, %v3097_v45  ;;  %v6041_v52 = vld [vmem:[%s7134_s10 + $0x8] sm:$0xff]  }
 0xd42   : > { %v3102_v54 = vpack.c.bf16 %v3098_v26, %v3098_v26  ;;  %v3103_v58 = vpack.c.bf16 %v3099_v5, %v3099_v5  ;;  %v3104_v3 = vpack.c.bf16 %v3100_v57, %v3100_v57  ;;  %v3105_v31 = vpack.c.bf16 %v3101_v34, %v3101_v34 }
 0xd44   : > { %v3350_v61 = vsel %vm1922_vm4, %v3102_v54, 0  ;;  %v3396_v62 = vsel %vm1922_vm4, %v3103_v58, 0  ;;  %v3442_v27 = vsel %vm1922_vm4, %v3104_v3, 0  ;;  %v3488_v56 = vsel %vm1922_vm4, %v3105_v31, 0  ;;  %v6042_v58 = vld [vmem:[%s7134_s10] sm:$0xff]  }
 0xd45   : > { %5839 = vmatpush3.bf16.msra.mxu1 %v3350_v61  ;;  %5845 = vmatpush3.bf16.msra.mxu0 %v3396_v62 }
 0xd46   : > { %5850 = vmatprep.subr.bf16.mxu1 %v6165_v1  ;;  %5856 = vmatprep.subr.bf16.mxu0 %v6165_v1 }
 0xd48   : > { %5841 = vmatmul.mubr.msk.bf16.vlgmr.msra.gmra.mxu1 %vm1678_vm2, %v3342_v33  ;;  %5847 = vmatmul.mubr.msk.bf16.vlgmr.msra.gmra.mxu0 %vm1678_vm2, %v3343_v4 }
 0xd49   : > { %5851 = vmatpush3.bf16.msra.mxu1 %v3442_v27  ;;  %5857 = vmatpush3.bf16.msra.mxu0 %v3488_v56 }
 0xd4a   : > { %5852 = vmatprep.mubr.msk.bf16.mxu1 %vm6166_vm0, %v6165_v1  ;;  %5858 = vmatprep.mubr.msk.bf16.mxu0 %vm6166_vm0, %v6165_v1 }
 0xd4b   : > { %5862 = vmatprep.subr.bf16.mxu1 %v6165_v1  ;;  %5870 = vmatprep.subr.bf16.mxu0 %v6165_v1 }
 0xd5f   : > { %v3330_v9 = vpop.xlane.xlu1 %3329 }
 0xd60   : > { %6091 = vrcp.f32 %v3330_v9  ;;  %v3333_v32 = vpop.xlane.xlu0 %3332 }
 0xd61   : > { %6093 = vrcp.f32 %v3333_v32 }
 0xd6d   : > { %v6092_v7 = vpop.eup %6091 }
 0xd6e   : > { %v6094_v8 = vpop.eup %6093  ;;  %v3340_v10 = vmul.f32 %v6092_v7, %v6756_v63 }
 0xd6f   : > { %v3341_v12 = vmul.f32 %v6094_v8, %v6758_v2 }
 0xd70   : > { %v3344_v14 = vpack.c.bf16 %v3340_v10, %v3340_v10 }
 0xd71   : > { %v3345_v15 = vpack.c.bf16 %v3341_v12, %v3341_v12 }
 0xd72   : > { %5853 = vmatmul.mubr.msk.bf16.vlgmr.msra.gmra.mxu1 %vm1678_vm2, %v3344_v14 }
 0xd73   : > { %5859 = vmatmul.mubr.msk.bf16.vlgmr.msra.gmra.mxu0 %vm1678_vm2, %v3345_v15  ;;  %5866 = vmatprep.mubr.msk.bf16.mxu1 %vm6166_vm0, %v6165_v1 }
 0xd74   : > { %5874 = vmatprep.mubr.msk.bf16.mxu0 %vm6166_vm0, %v6165_v1  ;;  %5863 = vmatpush3.bf16.msra.mxu1 %v6041_v52 }
 0xd75   : > { %5864 = vmatprep.subr.bf16.mxu1 %v6165_v1 }
 0xd78   : > { %5865 = vmatpush3.bf16.msra.mxu1 %v6042_v58 }
 0xd79   : > { %5878 = vmatprep.subr.bf16.mxu1 %v6165_v1 }
 0xe08   : > { %v3386_v16 = vpop.f32.mrf.mxu1  ;;  %v3432_v19 = vpop.f32.mrf.mxu0 }
 0xe0a   : > { %v5842_v24 = vpop.f32.mrf.mxu1  ;;  %v5848_v17 = vpop.f32.mrf.mxu0 }
 0xe0c   : > { %v3389_v18 = vpop.f32.mrf.mxu1  ;;  %v3435_v63 = vpop.f32.mrf.mxu0 }
 0xe0d   : > { %v6834_v63 = vld [vmem:[%s7135_s7] ss:$0 sm:$0xff]  ;;  %s7138_s7 = sld [smem:[#allocation14_spill]] }
 0xe0e   : > { %v5843_v20 = vpop.f32.mrf.mxu1  ;;  %v5849_v2 = vpop.f32.mrf.mxu0 }
 0xe32   : > { %v3478_v21 = vpop.f32.mrf.mxu1 }
 0xe33   : > { %v3530_v22 = vcombine.low %v3386_v16, %v3478_v21  ;;  %v3531_v23 = vcombine.high %v3386_v16, %v3478_v21  ;;  %v3524_v25 = vpop.f32.mrf.mxu0 }
 0xe34   : > { %v3546_v35 = vcombine.low %v3432_v19, %v3524_v25  ;;  %v3547_v37 = vcombine.high %v3432_v19, %v3524_v25  ;;  %v5854_v38 = vpop.f32.mrf.mxu1 }
 0xe35   : > { %v3538_v39 = vrot.slane %v3530_v22, %v6411_v29  ;;  %v3545_v40 = vrot.slane %v3531_v23, %v6411_v29  ;;  %v5860_v41 = vpop.f32.mrf.mxu0 }
 0xe36   : > { %v3554_v42 = vrot.slane %v3546_v35, %v6411_v29  ;;  %v3561_v43 = vrot.slane %v3547_v37, %v6411_v29  ;;  %v3481_v44 = vpop.f32.mrf.mxu1 }
 0xe37   : > { %v3527_v47 = vpop.f32.mrf.mxu0 }
 0xe38   : > { %v3562_v48 = vcombine.low %v3538_v39, %v3554_v42  ;;  %v3563_v11 = vcombine.high %v3538_v39, %v3554_v42  ;;  %v3578_v49 = vcombine.low %v3545_v40, %v3561_v43  ;;  %v3579_v50 = vcombine.high %v3545_v40, %v3561_v43  ;;  %v5855_v51 = vpop.f32.mrf.mxu1  ;;  %v6043_v42 = vld [vmem:[%s7136_s16 + $0x8] sm:$0xff]   ;;  %v6044_v43 = vld [vmem:[%s7136_s16] sm:$0xff]  }
 0xe39   : > { %v5861_v53 = vpop.f32.mrf.mxu0  ;;  %5871 = vmatpush3.bf16.msra.mxu0 %v6043_v42  ;;  %v6848_v51 = vld [vmem:[%s7138_s7] ss:$0 sm:$0xff] }
 0xe3a   : > { %v3570_v55 = vrot.slane %v3562_v48, %v6424_v36  ;;  %v3577_v45 = vrot.slane %v3563_v11, %v6424_v36  ;;  %v3586_v46 = vrot.slane %v3578_v49, %v6424_v36  ;;  %v3593_v26 = vrot.slane %v3579_v50, %v6424_v36  ;;  %5872 = vmatprep.subr.bf16.mxu0 %v6165_v1  ;;  %v6845_v49 = vld [vmem:[%s7137_s4] ss:$0 sm:$0xff]  ;;  %s7141_s4 = sld [smem:[#allocation18_spill]] }
 0xe3c   : > { %v3598_v5 = vcombine.low %v3570_v55, %v3577_v45  ;;  %v5555_v57 = vcombine.high %v3570_v55, %v3577_v45  ;;  %v3614_v34 = vcombine.low %v3586_v46, %v3593_v26  ;;  %v5556_v54 = vcombine.high %v3586_v46, %v3593_v26  ;;  %v6045_v55 = vld [vmem:[%s7127_s11 + $0x8] sm:$0xff]   ;;  %v6046_v46 = vld [vmem:[%s7127_s11] sm:$0xff]  }
 0xe3d   : > { %5873 = vmatpush3.bf16.msra.mxu0 %v6044_v43 }
 0xe3e   : > { %v3605_v59 = vrot.slane %v3598_v5, %v6411_v29  ;;  %v3613_v60 = vrot.slane %v5555_v57, %v6411_v29  ;;  %v3621_v61 = vrot.slane %v3614_v34, %v6411_v29  ;;  %v3629_v62 = vrot.slane %v5556_v54, %v6411_v29  ;;  %5886 = vmatprep.subr.bf16.mxu0 %v6165_v1 }
 0xe40   : > { %v3631_v3 = vcombine.high %v3605_v59, %v3613_v60  ;;  %v3647_v31 = vcombine.high %v3621_v61, %v3629_v62  ;;  %v3630_v33 = vcombine.low %v3605_v59, %v3613_v60  ;;  %v3646_v4 = vcombine.low %v3621_v61, %v3629_v62 }
 0xe42   : > { %v3645_v27 = vrot.slane %v3631_v3, %v6424_v36  ;;  %v3661_v56 = vrot.slane %v3647_v31, %v6424_v36  ;;  %v3638_v9 = vrot.slane %v3630_v33, %v6424_v36  ;;  %v3654_v32 = vrot.slane %v3646_v4, %v6424_v36  ;;  %v6875_v4 = vld [vmem:[%s7141_s4] ss:$0 sm:$0xff] }
 0xe44   : > { %v3664_v7 = vcombine.low %v3645_v27, %v3661_v56  ;;  %v3663_v8 = vcombine.high %v3638_v9, %v3654_v32  ;;  %v3662_v10 = vcombine.low %v3638_v9, %v3654_v32  ;;  %v3665_v12 = vcombine.high %v3645_v27, %v3661_v56 }
 0xe46   : > { %3671 = vrot.lane.b32.xlu1 %v3664_v7, %s6173_s28  ;;  %3667 = vrot.lane.b32.xlu0 %v3663_v8, %s7108_s1  ;;  %s7140_s1 = sld [smem:[#allocation16_spill]] }
 0xe4a   : > { %3675 = vrot.lane.b32.xlu1 %v3665_v12, %s7107_s2  ;;  %s7139_s2 = sld [smem:[#allocation17_spill]] }
 0xe4c   : > { %v6868_v57 = vld [vmem:[%s7140_s1] ss:$0 sm:$0xff]  ;;  %s7142_s1 = sld [smem:[#allocation19_spill]] }
 0xe50   : > { %v6047_v26 = vld [vmem:[%s7139_s2 + $0x8] sm:$0xff]   ;;  %v6048_v5 = vld [vmem:[%s7139_s2] sm:$0xff]  }
 0xeb8   : > { %v3672_v14 = vpop.permute.xlu1 %3671  ;;  %v3668_v15 = vpop.permute.xlu0 %3667 }
 0xeb9   : > { %v3678_v16 = vsel %vm1678_vm2, %v3662_v10, %v3668_v15 }
 0xeba   : > { %v3679_v24 = vsel %vm2253_vm5, %v3678_v16, %v3672_v14 }
 0xebc   : > { %v3676_v19 = vpop.permute.xlu1 %3675 }
 0xebd   : > { %v3680_v17 = vsel %vm2255_vm6, %v3679_v24, %v3676_v19  ;;  %v6049_v24 = vld [vmem:[%s6284_s27 + $0x8] sm:$0xff]  }
 0xebe   : > { %v3681_v18 = vpack.c.bf16 %v3680_v17, %v3680_v17  ;;  %v6050_v17 = vld [vmem:[%s6284_s27] sm:$0xff]  }
 0xec0   : > { %5867 = vmatmul.mubr.msk.bf16.vlgmr.msra.gmra.mxu1 %vm1067_vm1, %v3681_v18 }
 0xec1   : > { %5882 = vmatprep.mubr.msk.bf16.mxu1 %vm6166_vm0, %v6165_v1  ;;  %5879 = vmatpush3.bf16.msra.mxu1 %v6047_v26 }
 0xec2   : > { %5880 = vmatprep.subr.bf16.mxu1 %v6165_v1 }
 0xec5   : > { %5881 = vmatpush3.bf16.msra.mxu1 %v6048_v5 }
 0xec6   : > { %5894 = vmatprep.subr.bf16.mxu1 %v6165_v1 }
 0xf80   : > { %v3742_v20 = vpop.f32.mrf.mxu1 }
 0xf81   : > { %v3743_v2 = vadd.f32 %v6834_v63, %v3742_v20 }
 0xf82   : > { %v5868_v21 = vpop.f32.mrf.mxu1 }
 0xf83   : > { %v3748_v22 = vadd.f32 %v3743_v2, %v6641_v28 }
 0xf84   : > { %v3745_v23 = vpop.f32.mrf.mxu1 }
 0xf85   : > { %v3751_v25 = vsel %vm1067_vm1, %v3748_v22, 0.0 }
 0xf86   : > { %3752 = vadd.xlane.f32.xlu0 %v3751_v25  ;;  %v5869_v35 = vpop.f32.mrf.mxu1  ;;  %v6888_v25 = vld [vmem:[%s6339_s13] ss:$0 sm:$0xff] }
0x100f   : > { %v3753_v37 = vpop.xlane.xlu0 %3752 }
0x1010   : > { %v3754_v38 = vmul.f32 0.03125, %v3753_v37 }
0x1012   : > { %v3755_v39 = vsub.f32 %v3748_v22, %v3754_v38  ;;  %v6885_v22 = vld [vmem:[%s7142_s1] ss:$0 sm:$0xff] }
0x1014   : > { %v3756_v40 = vmul.f32 %v3755_v39, %v3755_v39 }
0x1016   : > { %v3757_v41 = vsel %vm1067_vm1, %v3756_v40, 0.0 }
0x1017   : > { %3758 = vadd.xlane.f32.xlu1 %v3757_v41 }
0x10a0   : > { %v3759_v44 = vpop.xlane.xlu1 %3758 }
0x10a1   : > { %v3760_v47 = vmul.f32 0.03125, %v3759_v44 }
0x10a3   : > { %v3761_v48 = vadd.f32 1e-05, %v3760_v47 }
0x10a5   : > { %6095 = vrsqrt.f32 %v3761_v48 }
0x10b2   : > { %v6096_v11 = vpop.eup %6095 }
0x10b3   : > { %v3763_v50 = vmul.f32 %v6096_v11, %v3755_v39 }
0x10b5   : > { %v3770_v52 = vmul.f32 %v6845_v49, %v3763_v50 }
0x10b7   : > { %v3777_v53 = vadd.f32 %v6848_v51, %v3770_v52 }
0x10b9   : > { %v3778_v45 = vpack.c.bf16 %v3777_v53, %v3777_v53 }
0x10bb   : > { %5875 = vmatmul.mubr.msk.bf16.vlgmr.msra.gmra.mxu0 %vm1067_vm1, %v3778_v45 }
0x10bc   : > { %5887 = vmatpush3.bf16.msra.mxu0 %v6045_v55  ;;  %5890 = vmatprep.mubr.msk.bf16.mxu0 %vm6166_vm0, %v6165_v1 }
0x10bd   : > { %5888 = vmatprep.subr.bf16.mxu0 %v6165_v1 }
0x10c0   : > { %5889 = vmatpush3.bf16.msra.mxu0 %v6046_v46 }
0x10c1   : > { %5902 = vmatprep.subr.bf16.mxu0 %v6165_v1 }
0x10c3   : > { %5891 = vmatmul.mubr.msk.bf16.vlgmr.msra.gmra.mxu0 %vm1067_vm1, %v6645_v30 }
0x10c4   : > { %5904 = vmatprep.mubr.msk.bf16.mxu0 %vm6166_vm0, %v6165_v1 }
0x117b   : > { %v3839_v34 = vpop.f32.mrf.mxu0 }
0x117c   : > { %v3840_v54 = vadd.f32 %v6868_v57, %v3839_v34 }
0x117d   : > { %v5876_v58 = vpop.f32.mrf.mxu0 }
0x117e   : > { %v3845_v59 = vmax.f32 %v3840_v54, 0.0 }
0x117f   : > { %v3842_v30 = vpop.f32.mrf.mxu0 }
0x1180   : > { %v3846_v60 = vpack.c.bf16 %v3845_v59, %v3845_v59 }
0x1181   : > { %v5877_v61 = vpop.f32.mrf.mxu0 }
0x1182   : > { %5883 = vmatmul.mubr.msk.bf16.vlgmr.msra.gmra.mxu1 %vm1067_vm1, %v3846_v60 }
0x1183   : > { %v4001_v62 = vpop.f32.mrf.mxu0  ;;  %5898 = vmatprep.mubr.msk.bf16.mxu1 %vm6166_vm0, %v6165_v1  ;;  %5895 = vmatpush3.bf16.msra.mxu1 %v6049_v24 }
0x1184   : > { %5896 = vmatprep.subr.bf16.mxu1 %v6165_v1  ;;  %v4002_v43 = vadd.f32 %v6690_v13, %v4001_v62 }
0x1185   : > { %v5892_v3 = vpop.f32.mrf.mxu0 }
0x1187   : > { %v4004_v31 = vpop.f32.mrf.mxu0  ;;  %5897 = vmatpush3.bf16.msra.mxu1 %v6050_v17 }
0x1188   : > { %5908 = vmatprep.subr.bf16.mxu1 %v6165_v1 }
0x1189   : > { %v5893_v33 = vpop.f32.mrf.mxu0 }
0x1242   : > { %v3907_v27 = vpop.f32.mrf.mxu1 }
0x1243   : > { %v3908_v56 = vadd.f32 %v6875_v4, %v3907_v27 }
0x1244   : > { %v5884_v9 = vpop.f32.mrf.mxu1 }
0x1245   : > { %v3913_v32 = vadd.f32 %v3908_v56, %v3777_v53 }
0x1246   : > { %v3910_v7 = vpop.f32.mrf.mxu1 }
0x1247   : > { %v3916_v8 = vsel %vm1067_vm1, %v3913_v32, 0.0 }
0x1248   : > { %3917 = vadd.xlane.f32.xlu0 %v3916_v8  ;;  %v5885_v10 = vpop.f32.mrf.mxu1 }
0x12d1   : > { %v3918_v12 = vpop.xlane.xlu0 %3917 }
0x12d2   : > { %v3919_v14 = vmul.f32 0.03125, %v3918_v12 }
0x12d4   : > { %v3920_v15 = vsub.f32 %v3913_v32, %v3919_v14 }
0x12d6   : > { %v3921_v16 = vmul.f32 %v3920_v15, %v3920_v15 }
0x12d8   : > { %v3922_v19 = vsel %vm1067_vm1, %v3921_v16, 0.0 }
0x12d9   : > { %3923 = vadd.xlane.f32.xlu0 %v3922_v19 }
0x1362   : > { %v3924_v18 = vpop.xlane.xlu0 %3923 }
0x1363   : > { %v3925_v20 = vmul.f32 0.03125, %v3924_v18 }
0x1365   : > { %v3926_v2 = vadd.f32 1e-05, %v3925_v20 }
0x1367   : > { %6097 = vrsqrt.f32 %v3926_v2 }
0x1374   : > { %v6098_v21 = vpop.eup %6097 }
0x1375   : > { %v3928_v23 = vmul.f32 %v6098_v21, %v3920_v15 }
0x1377   : > { %v3935_v35 = vmul.f32 %v6885_v22, %v3928_v23 }
0x1379   : > { %v3942_v37 = vadd.f32 %v6888_v25, %v3935_v35 }
0x137b   : > { %v3943_v38 = vpack.c.bf16 %v3942_v37, %v3942_v37 }
0x137d   : > { %5899 = vmatmul.mubr.msk.bf16.vlgmr.msra.gmra.mxu1 %vm1067_vm1, %v3943_v38 }
0x137e   : > { %5910 = vmatprep.mubr.msk.bf16.mxu1 %vm6166_vm0, %v6165_v1 }
0x143d   : > { %v4067_v39 = vpop.f32.mrf.mxu1 }
0x143e   : > { %v6896_v40 = vadd.f32 %v6626_v0, %v4067_v39 }
0x143f   : > { %v5900_v41 = vpop.f32.mrf.mxu1 }
0x1440   : > { %4227 = vrot.lane.b32.xlu0 %v6896_v40, %s6169_s23  ;;  %4224 = vrot.lane.b32.xlu1 %v6896_v40, %s6168_s22 }
0x1441   : > { %v4070_v42 = vpop.f32.mrf.mxu1 }
0x1443   : > { %v5901_v44 = vpop.f32.mrf.mxu1 }
0x1444   : > { %4077 = vrot.lane.b32.xlu0 %v4002_v43, %s6169_s23  ;;  %4230 = vrot.lane.b32.xlu1 %v6896_v40, %s6167_s18  ;;  %s5373_s23 = sld [smem:[#allocation2]] }
0x1448   : > { %4074 = vrot.lane.b32.xlu1 %v4002_v43, %s6168_s22  ;;  %s7144_s22 = smov 24  }
0x144c   : > { %4080 = vrot.lane.b32.xlu1 %v4002_v43, %s6167_s18  ;;  %s7143_s18 = smov 8  }
0x14b2   : > { %v6908_v0 = vpop.permute.xlu0 %4227  ;;  %v6910_v47 = vpop.permute.xlu1 %4224 }
0x14b3   : > { %v4233_v48 = vcombine.low %v6896_v40, %v6908_v0  ;;  %v4234_v13 = vcombine.high %v6896_v40, %v6908_v0 }
0x14b5   : > { %v4241_v53 = vrot.slane %v4233_v48, %v6411_v29  ;;  %v4248_v55 = vrot.slane %v4234_v13, %v6411_v29 }
0x14b6   : > { %v6916_v11 = vpop.permute.xlu1 %4230  ;;  %v4078_v5 = vpop.permute.xlu0 %4077 }
0x14b7   : > { %v4249_v50 = vcombine.low %v6910_v47, %v6916_v11  ;;  %v4250_v52 = vcombine.high %v6910_v47, %v6916_v11  ;;  %v4083_v3 = vcombine.low %v4002_v43, %v4078_v5  ;;  %v4084_v31 = vcombine.high %v4002_v43, %v4078_v5 }
0x14b9   : > { %v4257_v45 = vrot.slane %v4249_v50, %v6411_v29  ;;  %v4264_v46 = vrot.slane %v4250_v52, %v6411_v29  ;;  %v4091_v16 = vrot.slane %v4083_v3, %v6411_v29  ;;  %v4098_v19 = vrot.slane %v4084_v31, %v6411_v29 }
0x14ba   : > { %v4075_v26 = vpop.permute.xlu1 %4074 }
0x14bb   : > { %v4265_v34 = vcombine.low %v4241_v53, %v4257_v45  ;;  %v4266_v54 = vcombine.high %v4241_v53, %v4257_v45  ;;  %v4281_v58 = vcombine.low %v4248_v55, %v4264_v46  ;;  %v4282_v59 = vcombine.high %v4248_v55, %v4264_v46 }
0x14bd   : > { %v4273_v30 = vrot.slane %v4265_v34, %v6424_v36  ;;  %v4280_v60 = vrot.slane %v4266_v54, %v6424_v36  ;;  %v4289_v61 = vrot.slane %v4281_v58, %v6424_v36  ;;  %v4296_v62 = vrot.slane %v4282_v59, %v6424_v36 }
0x14be   : > { %v4081_v33 = vpop.permute.xlu1 %4080 }
0x14bf   : > { %v4301_v27 = vcombine.low %v4273_v30, %v4280_v60  ;;  %v5583_v56 = vcombine.high %v4273_v30, %v4280_v60  ;;  %v4317_v9 = vcombine.low %v4289_v61, %v4296_v62  ;;  %v5584_v32 = vcombine.high %v4289_v61, %v4296_v62 }
0x14c0   : > { %v4099_v7 = vcombine.low %v4075_v26, %v4081_v33  ;;  %v4100_v8 = vcombine.high %v4075_v26, %v4081_v33 }
0x14c1   : > { %v4308_v10 = vrot.slane %v4301_v27, %v6411_v29  ;;  %v4316_v12 = vrot.slane %v5583_v56, %v6411_v29  ;;  %v4324_v14 = vrot.slane %v4317_v9, %v6411_v29  ;;  %v4332_v15 = vrot.slane %v5584_v32, %v6411_v29 }
0x14c2   : > { %v4107_v24 = vrot.slane %v4099_v7, %v6411_v29  ;;  %v4114_v17 = vrot.slane %v4100_v8, %v6411_v29 }
0x14c3   : > { %v4333_v18 = vcombine.low %v4308_v10, %v4316_v12  ;;  %v4349_v20 = vcombine.low %v4324_v14, %v4332_v15  ;;  %v4334_v2 = vcombine.high %v4308_v10, %v4316_v12  ;;  %v4350_v21 = vcombine.high %v4324_v14, %v4332_v15 }
0x14c4   : > { %v4115_v23 = vcombine.low %v4091_v16, %v4107_v24  ;;  %v4116_v35 = vcombine.high %v4091_v16, %v4107_v24  ;;  %v4131_v37 = vcombine.low %v4098_v19, %v4114_v17  ;;  %v4132_v38 = vcombine.high %v4098_v19, %v4114_v17 }
0x14c5   : > { %v4341_v39 = vrot.slane %v4333_v18, %v6424_v36  ;;  %v4357_v41 = vrot.slane %v4349_v20, %v6424_v36  ;;  %v4348_v52 = vrot.slane %v4334_v2, %v6424_v36  ;;  %v4364_v53 = vrot.slane %v4350_v21, %v6424_v36 }
0x14c6   : > { %v4123_v42 = vrot.slane %v4115_v23, %v6424_v36  ;;  %v4130_v43 = vrot.slane %v4116_v35, %v6424_v36  ;;  %v4139_v44 = vrot.slane %v4131_v37, %v6424_v36  ;;  %v4146_v48 = vrot.slane %v4132_v38, %v6424_v36 }
0x14c7   : > { %v4365_v13 = vcombine.low %v4341_v39, %v4357_v41  ;;  %v4366_v50 = vcombine.high %v4341_v39, %v4357_v41  ;;  %v4367_v31 = vcombine.low %v4348_v52, %v4364_v53  ;;  %v4368_v33 = vcombine.high %v4348_v52, %v4364_v53 }
0x14c8   : > { %v4151_v55 = vcombine.low %v4123_v42, %v4130_v43  ;;  %v5581_v45 = vcombine.high %v4123_v42, %v4130_v43  ;;  %v4167_v46 = vcombine.low %v4139_v44, %v4146_v48  ;;  %v5582_v26 = vcombine.high %v4139_v44, %v4146_v48 }
0x14c9   : > { %v4369_v5 = vpack.c.bf16 %v4365_v13, %v4365_v13  ;;  %v4370_v34 = vpack.c.bf16 %v4366_v50, %v4366_v50  ;;  %v4371_v10 = vpack.c.bf16 %v4367_v31, %v4367_v31  ;;  %v4372_v12 = vpack.c.bf16 %v4368_v33, %v4368_v33 }
0x14ca   : > { %v4158_v54 = vrot.slane %v4151_v55, %v6411_v29  ;;  %v4166_v58 = vrot.slane %v5581_v45, %v6411_v29  ;;  %v4174_v59 = vrot.slane %v4167_v46, %v6411_v29  ;;  %v4182_v30 = vrot.slane %v5582_v26, %v6411_v29 }
0x14cb   : > { %v4529_v60 = vsel %vm1678_vm2, %v4369_v5, 0  ;;  %v4575_v61 = vsel %vm1678_vm2, %v4370_v34, 0  ;;  %v4621_v24 = vsel %vm1678_vm2, %v4371_v10, 0  ;;  %v4667_v17 = vsel %vm1678_vm2, %v4372_v12, 0 }
0x14cc   : > { %v4183_v62 = vcombine.low %v4158_v54, %v4166_v58  ;;  %v4199_v3 = vcombine.low %v4174_v59, %v4182_v30  ;;  %5903 = vmatpush3.bf16.xpose.msra.mxu0 %v4529_v60  ;;  %5909 = vmatpush3.bf16.xpose.msra.mxu1 %v4575_v61  ;;  %v4184_v27 = vcombine.high %v4158_v54, %v4166_v58 }
0x14cd   : > { %5914 = vmatprep.subr.bf16.mxu0 %v6165_v1  ;;  %v4200_v56 = vcombine.high %v4174_v59, %v4182_v30  ;;  %5920 = vmatprep.subr.bf16.mxu1 %v6165_v1 }
0x14ce   : > { %v4191_v9 = vrot.slane %v4183_v62, %v6424_v36  ;;  %v4207_v32 = vrot.slane %v4199_v3, %v6424_v36  ;;  %v4198_v16 = vrot.slane %v4184_v27, %v6424_v36 }
0x14cf   : > { %v4214_v19 = vrot.slane %v4200_v56, %v6424_v36 }
0x14d0   : > { %v4215_v7 = vcombine.low %v4191_v9, %v4207_v32  ;;  %v4216_v8 = vcombine.high %v4191_v9, %v4207_v32 }
0x14d1   : > { %v4217_v18 = vcombine.low %v4198_v16, %v4214_v19  ;;  %v4218_v20 = vcombine.high %v4198_v16, %v4214_v19 }
0x14d2   : > { %v4219_v14 = vpack.c.bf16 %v4215_v7, %v4215_v7  ;;  %v4220_v15 = vpack.c.bf16 %v4216_v8, %v4216_v8 }
0x14d3   : > { %v4221_v2 = vpack.c.bf16 %v4217_v18, %v4217_v18  ;;  %v4222_v21 = vpack.c.bf16 %v4218_v20, %v4218_v20 }
0x14d4   : > { %5905 = vmatmul.mubr.msk.bf16.vlgmr.msra.gmra.mxu0 %vm1678_vm2, %v4219_v14  ;;  %5911 = vmatmul.mubr.msk.bf16.vlgmr.msra.gmra.mxu1 %vm1678_vm2, %v4220_v15 }
0x14d5   : > { %5915 = vmatpush3.bf16.xpose.msra.mxu0 %v4621_v24  ;;  %5921 = vmatpush3.bf16.xpose.msra.mxu1 %v4667_v17 }
0x14d6   : > { %5916 = vmatprep.mubr.msk.bf16.mxu0 %vm6166_vm0, %v6165_v1  ;;  %5922 = vmatprep.mubr.msk.bf16.mxu1 %vm6166_vm0, %v6165_v1 }
0x14d7   : > { %5926 = vmatprep.subr.bf16.mxu0 %v6165_v1  ;;  %5932 = vmatprep.subr.bf16.mxu1 %v6165_v1 }
0x14dc   : > { %5917 = vmatmul.mubr.msk.bf16.vlgmr.msra.gmra.mxu0 %vm1678_vm2, %v4221_v2  ;;  %5923 = vmatmul.mubr.msk.bf16.vlgmr.msra.gmra.mxu1 %vm1678_vm2, %v4222_v21 }
0x14dd   : > { %5928 = vmatprep.mubr.msk.bf16.mxu0 %vm6166_vm0, %v6165_v1  ;;  %5934 = vmatprep.mubr.msk.bf16.mxu1 %vm6166_vm0, %v6165_v1 }
0x1594   : > { %v4565_v23 = vpop.f32.mrf.mxu0  ;;  %v4611_v35 = vpop.f32.mrf.mxu1 }
0x1595   : > { %v4709_v37 = vmul.f32 0.35355338, %v4565_v23  ;;  %v4710_v38 = vmul.f32 0.35355338, %v4611_v35 }
0x1596   : > { %v5906_v39 = vpop.f32.mrf.mxu0  ;;  %v5912_v41 = vpop.f32.mrf.mxu1 }
0x1597   : > { %v4713_v42 = vadd.f32 %v4709_v37, %v6481_v6  ;;  %v4714_v43 = vadd.f32 %v4710_v38, %v6481_v6 }
0x1598   : > { %v4568_v44 = vpop.f32.mrf.mxu0  ;;  %v4614_v48 = vpop.f32.mrf.mxu1 }
0x1599   : > { %v4717_v13 = vsel %vm1678_vm2, %v4713_v42, -inf  ;;  %v4720_v50 = vsel %vm1678_vm2, %v4714_v43, -inf }
0x159a   : > { %4718 = vmax.xlane.f32.xlu0 %v4717_v13  ;;  %v5907_v52 = vpop.f32.mrf.mxu0  ;;  %4721 = vmax.xlane.f32.xlu1 %v4720_v50  ;;  %v5913_v53 = vpop.f32.mrf.mxu1 }
0x159c   : > { %v4657_v55 = vpop.f32.mrf.mxu0  ;;  %v4703_v45 = vpop.f32.mrf.mxu1 }
0x159d   : > { %v4711_v46 = vmul.f32 0.35355338, %v4657_v55  ;;  %v4712_v26 = vmul.f32 0.35355338, %v4703_v45 }
0x159e   : > { %v5918_v5 = vpop.f32.mrf.mxu0  ;;  %v5924_v34 = vpop.f32.mrf.mxu1 }
0x159f   : > { %v4715_v54 = vadd.f32 %v4711_v46, %v6481_v6  ;;  %v4716_v60 = vadd.f32 %v4712_v26, %v6481_v6 }
0x15a0   : > { %v4660_v58 = vpop.f32.mrf.mxu0  ;;  %v4706_v59 = vpop.f32.mrf.mxu1 }
0x15a1   : > { %v4723_v30 = vsel %vm1678_vm2, %v4715_v54, -inf  ;;  %v4726_v3 = vsel %vm1678_vm2, %v4716_v60, -inf }
0x15a2   : > { %4724 = vmax.xlane.f32.xlu0 %v4723_v30  ;;  %v5919_v61 = vpop.f32.mrf.mxu0  ;;  %v5925_v62 = vpop.f32.mrf.mxu1 }
0x15a6   : > { %4727 = vmax.xlane.f32.xlu0 %v4726_v3 }
0x15ab   : > { %4373 = vrot.lane.b32.xlu1 %v6896_v40, %s6172_s26 }
0x1623   : > { %v4719_v31 = vpop.xlane.xlu0 %4718  ;;  %v4722_v33 = vpop.xlane.xlu1 %4721 }
0x1624   : > { %v4729_v27 = vsub.f32 %v4713_v42, %v4719_v31  ;;  %v4730_v56 = vsub.f32 %v4714_v43, %v4722_v33 }
0x1626   : > { %v4733_v9 = vmul.f32 1.442695, %v4729_v27  ;;  %v4735_v32 = vmul.f32 1.442695, %v4730_v56 }
0x1628   : > { %6099 = vpow2.f32 %v4733_v9 }
0x1629   : > { %6101 = vpow2.f32 %v4735_v32 }
0x162b   : > { %v4725_v40 = vpop.xlane.xlu0 %4724 }
0x162c   : > { %v4731_v12 = vsub.f32 %v4715_v54, %v4725_v40 }
0x162e   : > { %v4737_v16 = vmul.f32 1.442695, %v4731_v12 }
0x162f   : > { %v4728_v14 = vpop.xlane.xlu0 %4727 }
0x1630   : > { %v4732_v15 = vsub.f32 %v4716_v60, %v4728_v14  ;;  %6103 = vpow2.f32 %v4737_v16 }
0x1632   : > { %v4739_v19 = vmul.f32 1.442695, %v4732_v15 }
0x1634   : > { %6105 = vpow2.f32 %v4739_v19 }
0x1635   : > { %v6984_v7 = vpop.eup %6099 }
0x1636   : > { %v6986_v6 = vpop.eup %6101  ;;  %v4741_v8 = vsel %vm1678_vm2, %v6984_v7, 0.0 }
0x1637   : > { %4742 = vadd.xlane.f32.xlu1 %v4741_v8  ;;  %v4744_v10 = vsel %vm1678_vm2, %v6986_v6, 0.0 }
0x1638   : > { %4745 = vadd.xlane.f32.xlu0 %v4744_v10 }
0x163d   : > { %v6998_v24 = vpop.eup %6103 }
0x1641   : > { %v7000_v17 = vpop.eup %6105 }
0x1648   : > { %4377 = vrot.lane.b32.xlu1 %v6908_v0, %s6172_s26  ;;  %v4747_v0 = vsel %vm1678_vm2, %v6998_v24, 0.0 }
0x164c   : > { %4379 = vrot.lane.b32.xlu1 %v6916_v11, %s6172_s26  ;;  %v4750_v11 = vsel %vm1678_vm2, %v7000_v17, 0.0 }
0x164e   : > { %4375 = vrot.lane.b32.xlu0 %v6910_v47, %s6172_s26  ;;  %v4374_v47 = vpop.permute.xlu1 %4373  ;;  %s1055_s26 = scalar_lea.vmem %s6352_s17, %s6374_s0 }
0x166d   : > { %4748 = vadd.xlane.f32.xlu0 %v4747_v0 }
0x1670   : > { %4751 = vadd.xlane.f32.xlu1 %v4750_v11 }
0x16c0   : > { %v4743_v18 = vpop.xlane.xlu1 %4742 }
0x16c1   : > { %v4746_v20 = vpop.xlane.xlu0 %4745  ;;  %6107 = vrcp.f32 %v4743_v18 }
0x16c2   : > { %6109 = vrcp.f32 %v4746_v20 }
0x16c4   : > { %v4378_v2 = vpop.permute.xlu1 %4377 }
0x16c5   : > { %v4385_v21 = vcombine.low %v4374_v47, %v4378_v2  ;;  %v4386_v23 = vcombine.high %v4374_v47, %v4378_v2  ;;  %v4376_v35 = vpop.permute.xlu0 %4375 }
0x16c7   : > { %v4393_v41 = vrot.slane %v4385_v21, %v6411_v29  ;;  %v4400_v42 = vrot.slane %v4386_v23, %v6411_v29 }
0x16c8   : > { %v4380_v37 = vpop.permute.xlu1 %4379 }
0x16c9   : > { %v4401_v38 = vcombine.low %v4376_v35, %v4380_v37  ;;  %v4402_v39 = vcombine.high %v4376_v35, %v4380_v37 }
0x16cb   : > { %v4409_v43 = vrot.slane %v4401_v38, %v6411_v29  ;;  %v4416_v44 = vrot.slane %v4402_v39, %v6411_v29 }
0x16cd   : > { %v4417_v48 = vcombine.low %v4393_v41, %v4409_v43  ;;  %v4418_v13 = vcombine.high %v4393_v41, %v4409_v43  ;;  %v4433_v50 = vcombine.low %v4400_v42, %v4416_v44  ;;  %v4434_v52 = vcombine.high %v4400_v42, %v4416_v44 }
0x16ce   : > { %v6108_v33 = vpop.eup %6107 }
0x16cf   : > { %v4425_v53 = vrot.slane %v4417_v48, %v6424_v36  ;;  %v4432_v55 = vrot.slane %v4418_v13, %v6424_v36  ;;  %v4441_v45 = vrot.slane %v4433_v50, %v6424_v36  ;;  %v4448_v46 = vrot.slane %v4434_v52, %v6424_v36  ;;  %v6110_v27 = vpop.eup %6109 }
0x16d0   : > { %v4757_v19 = vmul.f32 %v6108_v33, %v6984_v7  ;;  %v4758_v0 = vmul.f32 %v6110_v27, %v6986_v6 }
0x16d1   : > { %v4453_v26 = vcombine.low %v4425_v53, %v4432_v55  ;;  %v5585_v5 = vcombine.high %v4425_v53, %v4432_v55  ;;  %v4469_v34 = vcombine.low %v4441_v45, %v4448_v46  ;;  %v5586_v54 = vcombine.high %v4441_v45, %v4448_v46 }
0x16d2   : > { %v4761_v2 = vpack.c.bf16 %v4757_v19, %v4757_v19  ;;  %v4762_v21 = vpack.c.bf16 %v4758_v0, %v4758_v0 }
0x16d3   : > { %v4460_v58 = vrot.slane %v4453_v26, %v6411_v29  ;;  %v4468_v59 = vrot.slane %v5585_v5, %v6411_v29  ;;  %v4476_v30 = vrot.slane %v4469_v34, %v6411_v29  ;;  %v4484_v60 = vrot.slane %v5586_v54, %v6411_v29 }
0x16d5   : > { %v4485_v61 = vcombine.low %v4460_v58, %v4468_v59  ;;  %v4501_v62 = vcombine.low %v4476_v30, %v4484_v60  ;;  %v4486_v3 = vcombine.high %v4460_v58, %v4468_v59  ;;  %v4502_v31 = vcombine.high %v4476_v30, %v4484_v60 }
0x16d7   : > { %v4493_v56 = vrot.slane %v4485_v61, %v6424_v36  ;;  %v4509_v9 = vrot.slane %v4501_v62, %v6424_v36  ;;  %v4500_v32 = vrot.slane %v4486_v3, %v6424_v36  ;;  %v4516_v8 = vrot.slane %v4502_v31, %v6424_v36 }
0x16d9   : > { %v4517_v10 = vcombine.low %v4493_v56, %v4509_v9  ;;  %v4518_v40 = vcombine.high %v4493_v56, %v4509_v9  ;;  %v4519_v12 = vcombine.low %v4500_v32, %v4516_v8  ;;  %v4520_v14 = vcombine.high %v4500_v32, %v4516_v8  ;;  %v6051_v32 = vld [vmem:[%s7134_s10 + $0x8] sm:$0xff]  }
0x16db   : > { %v4521_v15 = vpack.c.bf16 %v4517_v10, %v4517_v10  ;;  %v4522_v16 = vpack.c.bf16 %v4518_v40, %v4518_v40  ;;  %v4523_v18 = vpack.c.bf16 %v4519_v12, %v4519_v12  ;;  %v4524_v20 = vpack.c.bf16 %v4520_v14, %v4520_v14 }
0x16dd   : > { %v4769_v11 = vsel %vm1922_vm4, %v4521_v15, 0  ;;  %v4815_v47 = vsel %vm1922_vm4, %v4522_v16, 0  ;;  %v4861_v7 = vsel %vm1922_vm4, %v4523_v18, 0  ;;  %v4907_v6 = vsel %vm1922_vm4, %v4524_v20, 0 }
0x16de   : > { %5927 = vmatpush3.bf16.msra.mxu0 %v4769_v11  ;;  %5933 = vmatpush3.bf16.msra.mxu1 %v4815_v47  ;;  %v6052_v11 = vld [vmem:[%s7134_s10] sm:$0xff]  }
0x16df   : > { %5938 = vmatprep.subr.bf16.mxu0 %v6165_v1  ;;  %5944 = vmatprep.subr.bf16.mxu1 %v6165_v1 }
0x16e1   : > { %5929 = vmatmul.mubr.msk.bf16.vlgmr.msra.gmra.mxu0 %vm1678_vm2, %v4761_v2  ;;  %5935 = vmatmul.mubr.msk.bf16.vlgmr.msra.gmra.mxu1 %vm1678_vm2, %v4762_v21 }
0x16e2   : > { %5939 = vmatpush3.bf16.msra.mxu0 %v4861_v7  ;;  %5945 = vmatpush3.bf16.msra.mxu1 %v4907_v6 }
0x16e3   : > { %5940 = vmatprep.mubr.msk.bf16.mxu0 %vm6166_vm0, %v6165_v1  ;;  %5946 = vmatprep.mubr.msk.bf16.mxu1 %vm6166_vm0, %v6165_v1 }
0x16e4   : > { %5950 = vmatprep.subr.bf16.mxu0 %v6165_v1  ;;  %5958 = vmatprep.subr.bf16.mxu1 %v6165_v1 }
0x16f6   : > { %v4749_v23 = vpop.xlane.xlu0 %4748 }
0x16f7   : > { %6111 = vrcp.f32 %v4749_v23 }
0x16f9   : > { %v4752_v35 = vpop.xlane.xlu1 %4751 }
0x16fa   : > { %6113 = vrcp.f32 %v4752_v35 }
0x1704   : > { %v6112_v37 = vpop.eup %6111 }
0x1705   : > { %v4759_v38 = vmul.f32 %v6112_v37, %v6998_v24 }
0x1707   : > { %v6114_v39 = vpop.eup %6113  ;;  %v4763_v41 = vpack.c.bf16 %v4759_v38, %v4759_v38 }
0x1708   : > { %v4760_v42 = vmul.f32 %v6114_v39, %v7000_v17 }
0x1709   : > { %5941 = vmatmul.mubr.msk.bf16.vlgmr.msra.gmra.mxu0 %vm1678_vm2, %v4763_v41 }
0x170a   : > { %v4764_v43 = vpack.c.bf16 %v4760_v42, %v4760_v42  ;;  %5954 = vmatprep.mubr.msk.bf16.mxu0 %vm6166_vm0, %v6165_v1  ;;  %5951 = vmatpush3.bf16.msra.mxu0 %v6051_v32  ;;  %v6056_v32 = vld [vmem:[%s7139_s2] sm:$0xff]  }
0x170b   : > { %5952 = vmatprep.subr.bf16.mxu0 %v6165_v1 }
0x170c   : > { %5947 = vmatmul.mubr.msk.bf16.vlgmr.msra.gmra.mxu1 %vm1678_vm2, %v4764_v43 }
0x170d   : > { %5962 = vmatprep.mubr.msk.bf16.mxu1 %vm6166_vm0, %v6165_v1 }
0x170e   : > { %5953 = vmatpush3.bf16.msra.mxu0 %v6052_v11 }
0x170f   : > { %5966 = vmatprep.subr.bf16.mxu0 %v6165_v1 }
0x17a1   : > { %v4805_v44 = vpop.f32.mrf.mxu0  ;;  %v4851_v48 = vpop.f32.mrf.mxu1 }
0x17a3   : > { %v5930_v13 = vpop.f32.mrf.mxu0  ;;  %v5936_v50 = vpop.f32.mrf.mxu1 }
0x17a5   : > { %v4808_v24 = vpop.f32.mrf.mxu0  ;;  %v4854_v52 = vpop.f32.mrf.mxu1 }
0x17a7   : > { %v5931_v53 = vpop.f32.mrf.mxu0  ;;  %v5937_v55 = vpop.f32.mrf.mxu1 }
0x17c9   : > { %v4897_v17 = vpop.f32.mrf.mxu0 }
0x17ca   : > { %v4949_v45 = vcombine.low %v4805_v44, %v4897_v17  ;;  %v4950_v46 = vcombine.high %v4805_v44, %v4897_v17 }
0x17cb   : > { %v5942_v26 = vpop.f32.mrf.mxu0 }
0x17cc   : > { %v4943_v5 = vpop.f32.mrf.mxu1  ;;  %v4957_v30 = vrot.slane %v4949_v45, %v6411_v29  ;;  %v4964_v60 = vrot.slane %v4950_v46, %v6411_v29 }
0x17cd   : > { %v4900_v34 = vpop.f32.mrf.mxu0  ;;  %v4965_v54 = vcombine.low %v4851_v48, %v4943_v5  ;;  %v4966_v58 = vcombine.high %v4851_v48, %v4943_v5 }
0x17ce   : > { %v5948_v59 = vpop.f32.mrf.mxu1 }
0x17cf   : > { %v4973_v61 = vrot.slane %v4965_v54, %v6411_v29  ;;  %v4980_v62 = vrot.slane %v4966_v58, %v6411_v29  ;;  %v5943_v3 = vpop.f32.mrf.mxu0 }
0x17d0   : > { %v4946_v31 = vpop.f32.mrf.mxu1 }
0x17d1   : > { %v4981_v33 = vcombine.low %v4957_v30, %v4973_v61  ;;  %v4982_v27 = vcombine.high %v4957_v30, %v4973_v61  ;;  %v4997_v56 = vcombine.low %v4964_v60, %v4980_v62  ;;  %v4998_v9 = vcombine.high %v4964_v60, %v4980_v62  ;;  %v6053_v60 = vld [vmem:[%s7136_s16 + $0x8] sm:$0xff]   ;;  %v6054_v61 = vld [vmem:[%s7136_s16] sm:$0xff]  }
0x17d2   : > { %v5949_v8 = vpop.f32.mrf.mxu1  ;;  %5959 = vmatpush3.bf16.msra.mxu1 %v6053_v60 }
0x17d3   : > { %v4989_v10 = vrot.slane %v4981_v33, %v6424_v36  ;;  %v4996_v40 = vrot.slane %v4982_v27, %v6424_v36  ;;  %v5005_v12 = vrot.slane %v4997_v56, %v6424_v36  ;;  %v5012_v14 = vrot.slane %v4998_v9, %v6424_v36  ;;  %5960 = vmatprep.subr.bf16.mxu1 %v6165_v1  ;;  %v6055_v9 = vld [vmem:[%s7139_s2 + $0x8] sm:$0xff]  }
0x17d5   : > { %v5017_v15 = vcombine.low %v4989_v10, %v4996_v40  ;;  %v5595_v16 = vcombine.high %v4989_v10, %v4996_v40  ;;  %v5033_v19 = vcombine.low %v5005_v12, %v5012_v14  ;;  %v5596_v0 = vcombine.high %v5005_v12, %v5012_v14 }
0x17d6   : > { %5961 = vmatpush3.bf16.msra.mxu1 %v6054_v61 }
0x17d7   : > { %v5024_v47 = vrot.slane %v5017_v15, %v6411_v29  ;;  %v5032_v18 = vrot.slane %v5595_v16, %v6411_v29  ;;  %v5040_v20 = vrot.slane %v5033_v19, %v6411_v29  ;;  %v5048_v2 = vrot.slane %v5596_v0, %v6411_v29 }
0x17d9   : > { %v5050_v21 = vcombine.high %v5024_v47, %v5032_v18  ;;  %v5066_v7 = vcombine.high %v5040_v20, %v5048_v2  ;;  %v5049_v6 = vcombine.low %v5024_v47, %v5032_v18  ;;  %v5065_v23 = vcombine.low %v5040_v20, %v5048_v2 }
0x17db   : > { %v5064_v35 = vrot.slane %v5050_v21, %v6424_v36  ;;  %v5080_v37 = vrot.slane %v5066_v7, %v6424_v36  ;;  %v5057_v38 = vrot.slane %v5049_v6, %v6424_v36  ;;  %v5073_v39 = vrot.slane %v5065_v23, %v6424_v36 }
0x17dd   : > { %v5083_v41 = vcombine.low %v5064_v35, %v5080_v37  ;;  %v5082_v42 = vcombine.high %v5057_v38, %v5073_v39  ;;  %v5081_v43 = vcombine.low %v5057_v38, %v5073_v39  ;;  %v5084_v29 = vcombine.high %v5064_v35, %v5080_v37  ;;  %v5613_v38 = vld [vmem:[%s6344_s9] ss:$0 sm:$0xff] }
0x17df   : > { %5090 = vrot.lane.b32.xlu1 %v5083_v41, %s6173_s28  ;;  %5086 = vrot.lane.b32.xlu0 %v5082_v42, %s7143_s18 }
0x17e3   : > { %5094 = vrot.lane.b32.xlu0 %v5084_v29, %s7144_s22 }
0x1851   : > { %v5087_v44 = vpop.permute.xlu0 %5086  ;;  %v5091_v48 = vpop.permute.xlu1 %5090 }
0x1852   : > { %v5097_v13 = vsel %vm1678_vm2, %v5081_v43, %v5087_v44  ;;  %v5374_v43 = vstv %s5373_s23 }
0x1853   : > { %v5098_v24 = vsel %vm2253_vm5, %v5097_v13, %v5091_v48 }
0x1855   : > { %v5095_v50 = vpop.permute.xlu0 %5094 }
0x1856   : > { %v5099_v52 = vsel %vm2255_vm6, %v5098_v24, %v5095_v50 }
0x1857   : > { %v5100_v36 = vpack.c.bf16 %v5099_v52, %v5099_v52 }
0x1859   : > { %5955 = vmatmul.mubr.msk.bf16.vlgmr.msra.gmra.mxu0 %vm1067_vm1, %v5100_v36 }
0x185a   : > { %5970 = vmatprep.mubr.msk.bf16.mxu0 %vm6166_vm0, %v6165_v1  ;;  %5967 = vmatpush3.bf16.msra.mxu0 %v6055_v9 }
0x185b   : > { %5968 = vmatprep.subr.bf16.mxu0 %v6165_v1 }
0x185e   : > { %5969 = vmatpush3.bf16.msra.mxu0 %v6056_v32 }
0x1919   : > { %v5161_v53 = vpop.f32.mrf.mxu0 }
0x191a   : > { %v5162_v55 = vadd.f32 %v6834_v63, %v5161_v53 }
0x191b   : > { %v5956_v17 = vpop.f32.mrf.mxu0 }
0x191c   : > { %v5167_v45 = vadd.f32 %v5162_v55, %v6641_v28 }
0x191d   : > { %v5164_v46 = vpop.f32.mrf.mxu0 }
0x191e   : > { %v5170_v26 = vsel %vm1067_vm1, %v5167_v45, 0.0 }
0x191f   : > { %5171 = vadd.xlane.f32.xlu1 %v5170_v26  ;;  %v5957_v5 = vpop.f32.mrf.mxu0 }
0x19a8   : > { %v5172_v34 = vpop.xlane.xlu1 %5171 }
0x19a9   : > { %v5173_v54 = vmul.f32 0.03125, %v5172_v34 }
0x19ab   : > { %v5174_v58 = vsub.f32 %v5167_v45, %v5173_v54 }
0x19ad   : > { %v5175_v59 = vmul.f32 %v5174_v58, %v5174_v58 }
0x19af   : > { %v5176_v30 = vsel %vm1067_vm1, %v5175_v59, 0.0 }
0x19b0   : > { %5177 = vadd.xlane.f32.xlu0 %v5176_v30 }
0x1a39   : > { %v5178_v28 = vpop.xlane.xlu0 %5177 }
0x1a3a   : > { %v5179_v63 = vmul.f32 0.03125, %v5178_v28 }
0x1a3c   : > { %v5180_v62 = vadd.f32 1e-05, %v5179_v63 }
0x1a3e   : > { %6115 = vrsqrt.f32 %v5180_v62 }
0x1a4b   : > { %v6116_v3 = vpop.eup %6115 }
0x1a4c   : > { %v5182_v31 = vmul.f32 %v6116_v3, %v5174_v58 }
0x1a4e   : > { %v5189_v33 = vmul.f32 %v6845_v49, %v5182_v31 }
0x1a50   : > { %v5196_v27 = vadd.f32 %v6848_v51, %v5189_v33 }
0x1a52   : > { %v5197_v56 = vpack.c.bf16 %v5196_v27, %v5196_v27 }
0x1a54   : > { %5963 = vmatmul.mubr.msk.bf16.vlgmr.msra.gmra.mxu1 %vm1067_vm1, %v5197_v56 }
0x1b14   : > { %v5258_v8 = vpop.f32.mrf.mxu1 }
0x1b15   : > { %v5259_v10 = vadd.f32 %v6868_v57, %v5258_v8 }
0x1b16   : > { %v5964_v40 = vpop.f32.mrf.mxu1 }
0x1b17   : > { %v5264_v12 = vmax.f32 %v5259_v10, 0.0 }
0x1b18   : > { %v5261_v14 = vpop.f32.mrf.mxu1 }
0x1b19   : > { %v5265_v15 = vpack.c.bf16 %v5264_v12, %v5264_v12 }
0x1b1a   : > { %v5965_v16 = vpop.f32.mrf.mxu1 }
0x1b1b   : > { %5971 = vmatmul.mubr.msk.bf16.vlgmr.msra.gmra.mxu0 %vm1067_vm1, %v5265_v15 }
0x1bdb   : > { %v5326_v49 = vpop.f32.mrf.mxu0 }
0x1bdc   : > { %v5327_v51 = vadd.f32 %v6875_v4, %v5326_v49 }
0x1bdd   : > { %v5972_v19 = vpop.f32.mrf.mxu0 }
0x1bde   : > { %v5332_v0 = vadd.f32 %v5327_v51, %v5196_v27 }
0x1bdf   : > { %v5329_v11 = vpop.f32.mrf.mxu0 }
0x1be0   : > { %v5335_v1 = vsel %vm1067_vm1, %v5332_v0, 0.0 }
0x1be1   : > { %5336 = vadd.xlane.f32.xlu0 %v5335_v1  ;;  %v5973_v47 = vpop.f32.mrf.mxu0 }
0x1c6a   : > { %v5337_v18 = vpop.xlane.xlu0 %5336 }
0x1c6b   : > { %v5338_v57 = vmul.f32 0.03125, %v5337_v18 }
0x1c6d   : > { %v5339_v20 = vsub.f32 %v5332_v0, %v5338_v57 }
0x1c6f   : > { %v5340_v2 = vmul.f32 %v5339_v20, %v5339_v20 }
0x1c71   : > { %v5341_v21 = vsel %vm1067_vm1, %v5340_v2, 0.0 }
0x1c72   : > { %5342 = vadd.xlane.f32.xlu1 %v5341_v21 }
0x1cfb   : > { %v5343_v7 = vpop.xlane.xlu1 %5342 }
0x1cfc   : > { %v5344_v6 = vmul.f32 0.03125, %v5343_v7 }
0x1cfe   : > { %v5345_v23 = vadd.f32 1e-05, %v5344_v6 }
0x1d00   : > { %6117 = vrsqrt.f32 %v5345_v23 }
0x1d0d   : > { %v6118_v4 = vpop.eup %6117 }
0x1d0e   : > { %v5347_v35 = vmul.f32 %v6118_v4, %v5339_v20 }
0x1d10   : > { %v5354_v37 = vmul.f32 %v6885_v22, %v5347_v35 }
0x1d12   : > { %v5361_v39 = vadd.f32 %v6888_v25, %v5354_v37 }
0x1d14   : > { %v5369_v41 = vmul.f32 %v5613_v38, %v5361_v39 }
0x1d16   : > { %v5370_v42 = vsel %vm1067_vm1, %v5369_v41, 0.0 }
0x1d17   : > { %5371 = vadd.xlane.f32.xlu0 %v5370_v42 }
0x1da0   : > { %v5372_v29 = vpop.xlane.xlu0 %5371 }
0x1da1   : > { %v5375_v44 = vadd.f32 %v5374_v43, %v5372_v29 }
0x1da3   : > { %v5614_v48 = vmul.f32 -1.442695, %v5375_v44 }
0x1da5   : > { %6119 = vpow2.f32 %v5614_v48 }
0x1db2   : > { %v6120_v13 = vpop.eup %6119 }
0x1db3   : > { %v5379_v50 = vadd.f32 1.0, %v6120_v13 }
0x1db5   : > { %6121 = vrcp.f32 %v5379_v50 }
0x1dc2   : > { %v6122_v24 = vpop.eup %6121 }
0x1dc3   : > { %5383 = vst.msk [vmem:[%s1055_s26] sm:$0xff] %vm5382_vm7, %v6122_v24 }
0x1dc4 PF: > { %s80_s15 = sadd.s32 1, %s6129_s15  }
0x1dc5   : > { %p77_p4 = scmp.ge.s32.totalorder %s80_s15, 4  }
0x1dc7   :  { %79 = sbr.rel (!%p77_p4) target bundleno = 66 (0x42), region = 223 }

</bundles_post_ra>
